<compile_context>
chip_gen: v5e
topology: v5e:2x2
jax: 0.10.0
libtpu: 0.0.40
codegen_flags: <defaults>
</compile_context>

<pallas_src>
import jax
import jax.numpy as jnp
from jax import lax
from jax.experimental import pallas as pl
from jax.experimental.pallas import tpu as pltpu

NEG_SLOPE = 0.01  # nn.LeakyReLU default negative_slope


# ---------------------------------------------------------------------------
# Chip-aware VMEM / tiling configuration
# ---------------------------------------------------------------------------
def _vmem_capacity_bytes():
    try:
        return int(pltpu.get_tpu_info().vmem_capacity_bytes)
    except Exception:
        return 64 * 1024 * 1024          # conservative (v7x per-TC VMEM)


def _device_kind():
    try:
        return jax.devices()[0].device_kind.lower()
    except Exception:
        return ""


_KIND = _device_kind()
IS_V7X = ("v7" in _KIND) or ("tpu7" in _KIND)
IS_V6E = "v6" in _KIND
VMEM_CAP = _vmem_capacity_bytes()
TILE_BUDGET = VMEM_CAP // 4              # bytes of double-buffered blocks per kernel
VMEM_LIMIT = (VMEM_CAP * 3) // 4         # explicit scoped-VMEM limit for every pallas_call
MAX_TILE = 8192 if IS_V6E else 4096      # v6e (128 MiB VMEM): bigger tiles hide DMA better
MIN_GRID = 2 if IS_V7X else 1            # only v7x has 2 TensorCores worth splitting for


def _lane_tile(n, bytes_per_col, min_grid=1, max_tile=MAX_TILE):
    """Pixel-tile size along the 128-lane axis.  `n` is always a multiple of 128."""
    cap = max(128, min(max_tile, (TILE_BUDGET // max(bytes_per_col, 1)) // 128 * 128))
    if min_grid > 1:
        cap = min(cap, max(128, (n // min_grid) // 128 * 128))
    t = min(cap, n)
    while n % t != 0:
        t -= 128
    return t


def _pad_lanes(x, n_pad):
    n = x.shape[-1]
    if n == n_pad:
        return x
    pad = [(0, 0)] * (x.ndim - 1) + [(0, n_pad - n)]
    return jnp.pad(x, pad)


# ---------------------------------------------------------------------------
# Pallas kernels (channels on sublanes, pixels on the 128-lane axis)
# Packed carry slab layout (2C+8 rows):
#   [0:C]       hidden state
#   [C:2C]      cumulative weight
#   [2C:2C+5]   location grid (mesh(2), flow(2), ones(1))
#   [2C+5]      binary fgmask
#   [2C+6:2C+8] forward flow (needed by the next frame's consistency check)
# ---------------------------------------------------------------------------
def _ynet_kernel(fr_ref, fl_ref, wff_ref, wfl_ref, wm_ref, feat_ref, fg_ref, fgb_ref):
    # TODO(synk): YNetPlus stub -- per-pixel 1x1 feature layer + fgmask head.
    h = (jnp.dot(wff_ref[...], fr_ref[0], preferred_element_type=jnp.float32)
         + jnp.dot(wfl_ref[...], fl_ref[0], preferred_element_type=jnp.float32))
    feat = jnp.where(h > 0, h, NEG_SLOPE * h)                   # LeakyReLU
    feat_ref[0] = feat
    logit = jnp.sum(wm_ref[...] * feat, axis=0, keepdims=True)  # (1, tn)
    fg = jax.nn.sigmoid(logit)
    fg_ref[0] = fg
    fgb_ref[0] = (fg > 0.5).astype(jnp.float32)                 # folded threshold


def _init_kernel(feat_ref, aux_ref, mesh_ref, wr2_ref, src_ref):
    # t = 0: weight = sigmoid(wr2 @ feat) (prev_state == 0), hid = weight*feat,
    # cum = weight, loc = [mesh, flow0, 1], fgb/flow copied into the carry slab.
    c = feat_ref.shape[1]
    feat = feat_ref[0]                                          # (C, tn)
    aux = aux_ref[0]                                            # (5, tn)
    fgb = aux[0:1]
    flow = aux[1:3]
    weight = jax.nn.sigmoid(
        jnp.dot(wr2_ref[...], feat, preferred_element_type=jnp.float32))
    src_ref[0:c, :] = weight * feat
    src_ref[c:2 * c, :] = weight
    src_ref[2 * c:2 * c + 2, :] = mesh_ref[...]
    src_ref[2 * c + 2:2 * c + 4, :] = flow
    src_ref[2 * c + 4:2 * c + 5, :] = jnp.ones_like(fgb)
    src_ref[2 * c + 5:2 * c + 6, :] = fgb
    src_ref[2 * c + 6:2 * c + 8, :] = flow


def _step_kernel(t_ref, feat_ref, aux_ref, g_ref, mesh_ref, wr_ref,
                 mask_ref, src_ref, act_ref):
    # Fused per-timestep update: fg/consistency mask + ConvRNN gate +
    # hidden/cum update + location update, written as one packed carry slab.
    del t_ref  # only used by the index_maps (scalar prefetch)
    c = feat_ref.shape[1]
    feat = feat_ref[0]                                          # (C, tn)
    aux = aux_ref[0]                                            # (5, tn)
    fgb = aux[0:1]                                              # fgmask_bin at t
    flow = aux[1:3]                                             # forward flow at t
    bflow = aux[3:5]                                            # inv_flow at t

    gh = g_ref[0:c, :]                                          # warped hidden
    gc = g_ref[c:2 * c, :]                                      # warped cum weight
    gloc = g_ref[2 * c:2 * c + 5, :]                            # warped location grid
    gfgb = g_ref[2 * c + 5:2 * c + 6, :]                        # warped prev fgmask_bin
    gwff = g_ref[2 * c + 6:2 * c + 8, :]                        # warped flow[t-1]

    # forward/backward flow consistency + fgmask mask
    s_fb = jnp.sum((gwff + bflow) ** 2, axis=0, keepdims=True)
    s_mag = jnp.sum(0.01 * (gwff * gwff + bflow * bflow), axis=0, keepdims=True)
    cons = (s_fb <= s_mag + 0.5).astype(jnp.float32)
    mask = (gfgb > 0.5).astype(jnp.float32) * fgb * cons
    mask_ref[...] = mask

    # ConvRNN stub gate: ONE fused (C, 2C) matmul on [prev_state ; feat]
    wh = gh * mask
    wc = gc * mask
    act_ref[0:c, :] = wh / jnp.maximum(wc, 1e-6)                # prev_state (exact divide)
    act_ref[c:2 * c, :] = feat
    weight = jax.nn.sigmoid(
        jnp.dot(wr_ref[...], act_ref[...], preferred_element_type=jnp.float32))

    # packed carry slab for this frame (also the next step's warp source)
    src_ref[0:c, :] = wh + weight * feat                        # hidden state
    src_ref[c:2 * c, :] = wc + weight                           # cumulative weight
    lw = gloc * mask
    src_ref[2 * c:2 * c + 2, :] = lw[0:2, :] + mesh_ref[...]
    src_ref[2 * c + 2:2 * c + 4, :] = lw[2:4, :] + flow
    src_ref[2 * c + 4:2 * c + 5, :] = lw[4:5, :] + 1.0
    src_ref[2 * c + 5:2 * c + 6, :] = fgb
    src_ref[2 * c + 6:2 * c + 8, :] = flow


def _emb_kernel(src_ref, w1_ref, w2_ref, emb_ref):
    # Fused SCM (Linear(4,C) -> LeakyReLU -> Linear(C,C), no biases) +
    # emb = hidden / clamp(cum, 1e-12) + locs, read straight from the carry slab.
    c = emb_ref.shape[1]
    hid = src_ref[0, 0:c, :]
    cum = src_ref[0, c:2 * c, :]
    loc = src_ref[0, 2 * c:2 * c + 5, :]
    x = loc[0:4] * pl.reciprocal(loc[4:5], approx=True)         # loc[4] >= 1
    h = jnp.dot(w1_ref[...], x, preferred_element_type=jnp.float32)
    h = jnp.where(h > 0, h, NEG_SLOPE * h)
    scm = jnp.dot(w2_ref[...], h, preferred_element_type=jnp.float32)
    emb_ref[0] = hid * pl.reciprocal(jnp.maximum(cum, 1e-12), approx=True) + scm


# ---------------------------------------------------------------------------
# Pallas wrappers
# ---------------------------------------------------------------------------
def pallas_ynet(frames_p, flow_p, wff, wfl, wm):
    """(T, Cin, n), (T, 2, n) -> feat (T, C, n), fg (T, 1, n), fgb (T, 1, n)."""
    t, cin, n = frames_p.shape
    c = wff.shape[0]
    tn = _lane_tile(n, (cin + 2 + c + 2) * 4 * 2)
    return pl.pallas_call(
        _ynet_kernel,
        out_shape=(jax.ShapeDtypeStruct((t, c, n), jnp.float32),
                   jax.ShapeDtypeStruct((t, 1, n), jnp.float32),
                   jax.ShapeDtypeStruct((t, 1, n), jnp.float32)),
        grid=(t, n // tn),
        in_specs=[pl.BlockSpec((1, cin, tn), lambda ti, i: (ti, 0, i)),
                  pl.BlockSpec((1, 2, tn), lambda ti, i: (ti, 0, i)),
                  pl.BlockSpec((c, cin), lambda ti, i: (0, 0)),
                  pl.BlockSpec((c, 2), lambda ti, i: (0, 0)),
                  pl.BlockSpec((c, 1), lambda ti, i: (0, 0))],
        out_specs=(pl.BlockSpec((1, c, tn), lambda ti, i: (ti, 0, i)),
                   pl.BlockSpec((1, 1, tn), lambda ti, i: (ti, 0, i)),
                   pl.BlockSpec((1, 1, tn), lambda ti, i: (ti, 0, i))),
        compiler_params=pltpu.CompilerParams(
            dimension_semantics=("parallel", "parallel"),
            vmem_limit_bytes=VMEM_LIMIT),
    )(frames_p, flow_p, wff, wfl, wm)


def pallas_init(feat_all, aux_all, mesh, wr2):
    """t = 0 carry slab (2C+8, n) -- no zero/one constant streams."""
    t, c, n = feat_all.shape
    ch = 2 * c + 8
    tn = _lane_tile(n, ((c + 5 + 2) + ch) * 4 * 2, min_grid=MIN_GRID)
    return pl.pallas_call(
        _init_kernel,
        out_shape=jax.ShapeDtypeStruct((ch, n), jnp.float32),
        grid=(n // tn,),
        in_specs=[pl.BlockSpec((1, c, tn), lambda i: (0, 0, i)),
                  pl.BlockSpec((1, 5, tn), lambda i: (0, 0, i)),
                  pl.BlockSpec((2, tn), lambda i: (0, i)),
                  pl.BlockSpec((c, c), lambda i: (0, 0))],
        out_specs=pl.BlockSpec((ch, tn), lambda i: (0, i)),
        compiler_params=pltpu.CompilerParams(
            dimension_semantics=("parallel",),
            vmem_limit_bytes=VMEM_LIMIT),
    )(feat_all, aux_all, mesh, wr2)


def pallas_step(t_arr, feat_all, aux_all, g, mesh, wr):
    """Fused per-timestep update; feat_all/aux_all are indexed in place at t."""
    tt, c, n = feat_all.shape
    ch = g.shape[0]                       # 2C + 8
    bytes_per_col = ((c + 5 + ch + 2) * 2 + (ch + 1) * 2 + 2 * c) * 4
    tn = _lane_tile(n, bytes_per_col, min_grid=MIN_GRID)
    grid_spec = pltpu.PrefetchScalarGridSpec(
        num_scalar_prefetch=1,
        grid=(n // tn,),
        in_specs=[pl.BlockSpec((1, c, tn), lambda i, t: (t[0], 0, i)),
                  pl.BlockSpec((1, 5, tn), lambda i, t: (t[0], 0, i)),
                  pl.BlockSpec((ch, tn), lambda i, t: (0, i)),
                  pl.BlockSpec((2, tn), lambda i, t: (0, i)),
                  pl.BlockSpec((c, 2 * c), lambda i, t: (0, 0))],
        out_specs=(pl.BlockSpec((1, tn), lambda i, t: (0, i)),
                   pl.BlockSpec((ch, tn), lambda i, t: (0, i))),
        scratch_shapes=[pltpu.VMEM((2 * c, tn), jnp.float32)])
    return pl.pallas_call(
        _step_kernel,
        out_shape=(jax.ShapeDtypeStruct((1, n), jnp.float32),
                   jax.ShapeDtypeStruct((ch, n), jnp.float32)),
        grid_spec=grid_spec,
        compiler_params=pltpu.CompilerParams(
            dimension_semantics=("parallel",),
            vmem_limit_bytes=VMEM_LIMIT),
    )(t_arr, feat_all, aux_all, g, mesh, wr)


def pallas_emb(src_all, w1, w2):
    """Packed slabs (T, 2C+8, n) -> trajectory embedding (T, C, n)."""
    t, ch, n = src_all.shape
    c = w2.shape[0]
    tn = _lane_tile(n, (ch + c) * 4 * 2)
    return pl.pallas_call(
        _emb_kernel,
        out_shape=jax.ShapeDtypeStruct((t, c, n), jnp.float32),
        grid=(t, n // tn),
        in_specs=[pl.BlockSpec((1, ch, tn), lambda ti, i: (ti, 0, i)),
                  pl.BlockSpec((c, 4), lambda ti, i: (0, 0)),
                  pl.BlockSpec((c, c), lambda ti, i: (0, 0))],
        out_specs=pl.BlockSpec((1, c, tn), lambda ti, i: (ti, 0, i)),
        compiler_params=pltpu.CompilerParams(
            dimension_semantics=("parallel", "parallel"),
            vmem_limit_bytes=VMEM_LIMIT),
    )(src_all, w1, w2)


# ---------------------------------------------------------------------------
# Bilinear warp (grid_sample) helpers -- address math hoisted once,
# pixel-major contiguous row gather, no broadcast index materialization.
# ---------------------------------------------------------------------------
def _bilinear_coeffs(gx, gy, H, W, P):
    """gx, gy: (T, B, P) absolute pixel coords -> flat idx/wgt (T, 4, B*P).

    Flat indices fold in the per-batch offset b*P; out-of-range corners get
    weight 0 (zero padding), indices clamped in range (always valid)."""
    t_, b_, _ = gx.shape
    x0 = jnp.floor(gx)
    y0 = jnp.floor(gy)
    wx1 = gx - x0
    wx0 = 1.0 - wx1
    wy1 = gy - y0
    wy0 = 1.0 - wy1
    boff = (jnp.arange(b_, dtype=jnp.int32) * P)[None, :, None]

    def corner(xi, yi, w):
        valid = (xi >= 0) & (xi <= W - 1) & (yi >= 0) & (yi <= H - 1)
        xc = jnp.clip(xi, 0, W - 1).astype(jnp.int32)
        yc = jnp.clip(yi, 0, H - 1).astype(jnp.int32)
        return yc * W + xc + boff, w * valid.astype(jnp.float32)

    i00, w00 = corner(x0, y0, wx0 * wy0)
    i10, w10 = corner(x0 + 1.0, y0, wx1 * wy0)
    i01, w01 = corner(x0, y0 + 1.0, wx0 * wy1)
    i11, w11 = corner(x0 + 1.0, y0 + 1.0, wx1 * wy1)
    idx = jnp.stack([i00, i10, i01, i11], axis=1).reshape(t_, 4, b_ * P)
    wgt = jnp.stack([w00, w10, w01, w11], axis=1).reshape(t_, 4, b_ * P)
    return idx, wgt


def _warp_rows(src_row, idx4, wgt4):
    """1-channel warp: src_row (n,), idx4/wgt4 (4, n) -> (n,)."""
    out = jnp.take(src_row, idx4[0]) * wgt4[0]
    for k in range(1, 4):
        out = out + jnp.take(src_row, idx4[k]) * wgt4[k]
    return out


# ---------------------------------------------------------------------------
# DenseTrajectory forward
# ---------------------------------------------------------------------------
def dense_trajectory_forward(frames, flow, inv_flow, params, C=32):
    B, Cin, T, H, W = frames.shape
    P = H * W
    n = B * P
    n_pad = ((n + 127) // 128) * 128
    f32 = jnp.float32
    CH = 2 * C + 8

    # pixel coordinates and their get_vgrid(0) normalization
    xx = jnp.tile(jnp.arange(W, dtype=f32)[None, :], (H, 1)).reshape(P)
    yy = jnp.tile(jnp.arange(H, dtype=f32)[:, None], (1, W)).reshape(P)
    mx = 2.0 * xx / max(W - 1, 1) - 1.0
    my = 2.0 * yy / max(H - 1, 1) - 1.0
    mesh = _pad_lanes(
        jnp.broadcast_to(jnp.stack([mx, my], 0)[:, None, :], (2, B, P)).reshape(2, n),
        n_pad)

    # time-major, channel-major layout: (T, channels, B, P)
    frames_tm = jnp.transpose(frames, (2, 1, 0, 3, 4)).reshape(T, Cin, B, P)
    flow_tm = jnp.transpose(flow, (2, 1, 0, 3, 4)).reshape(T, 2, B, P)
    iflow_tm = jnp.transpose(inv_flow, (2, 1, 0, 3, 4)).reshape(T, 2, B, P)

    # backward-flow warp coefficients (used for t = 1..T-1; cheap elementwise)
    bidx, bwgt = _bilinear_coeffs(xx[None, None, :] + iflow_tm[:, 0],
                                  yy[None, None, :] + iflow_tm[:, 1], H, W, P)
    bidx = _pad_lanes(bidx, n_pad)
    bwgt = _pad_lanes(bwgt, n_pad)
    # forward-flow warp coefficients only for frames 0..T-2 (tails)
    if T > 1:
        fidx, fwgt = _bilinear_coeffs(xx[None, None, :] + flow_tm[:T - 1, 0],
                                      yy[None, None, :] + flow_tm[:T - 1, 1], H, W, P)
        fidx = _pad_lanes(fidx, n_pad)
        fwgt = _pad_lanes(fwgt, n_pad)

    frames_p = _pad_lanes(frames_tm.reshape(T, Cin, n), n_pad)
    flow_p = _pad_lanes(flow_tm.reshape(T, 2, n), n_pad)
    iflow_p = _pad_lanes(iflow_tm.reshape(T, 2, n), n_pad)

    # ---- ynet over ALL T frames in one lane-dense Pallas call (+ fgb output) ----
    feat_all, fg_all, fgb_all = pallas_ynet(
        frames_p, flow_p, params["wff"], params["wfl"], params["wm"])

    # packed small-row per-frame inputs: [fgb(1), fwd_flow(2), inv_flow(2)]
    aux_all = jnp.concatenate([fgb_all, flow_p, iflow_p], axis=1)     # (T, 5, n_pad)

    wr = params["wr"]                                                 # (C, 2C) = [wr1|wr2]

    # ---- t = 0: dedicated init kernel (no zero/one constant streams) ----
    src0 = pallas_init(feat_all, aux_all, mesh, wr[:, C:])            # (2C+8, n_pad)

    # ---- t = 1..T-1: pixel-major gather + fused step kernel under lax.scan ----
    if T > 1:
        ts = jnp.arange(1, T, dtype=jnp.int32)

        def step(src_prev, t):
            idx_t = lax.dynamic_index_in_dim(bidx, t, 0, keepdims=False)   # (4, n_pad)
            wgt_t = lax.dynamic_index_in_dim(bwgt, t, 0, keepdims=False)
            # contiguous row gather: one (n, 2C+8) source, 4 corner fetches
            src_pm = src_prev.T                                            # (n_pad, 2C+8)
            g_pm = (jnp.take(src_pm, idx_t[0], axis=0) * wgt_t[0][:, None]
                    + jnp.take(src_pm, idx_t[1], axis=0) * wgt_t[1][:, None]
                    + jnp.take(src_pm, idx_t[2], axis=0) * wgt_t[2][:, None]
                    + jnp.take(src_pm, idx_t[3], axis=0) * wgt_t[3][:, None])
            g = g_pm.T                                                     # (2C+8, n_pad)
            mask_t, src_t = pallas_step(jnp.reshape(t, (1,)), feat_all, aux_all,
                                        g, mesh, wr)
            return src_t, (mask_t, src_t)

        _, (mask_s, src_s) = lax.scan(step, src0, ts)
        src_all = jnp.concatenate([src0[None], src_s], axis=0)            # (T, 2C+8, n_pad)
    else:
        src_all = src0[None]

    # ---- trajectory tails: batched 1-channel forward warp over T-1 frames ----
    if T > 1:
        warped = jax.vmap(_warp_rows)(mask_s[:, 0, :], fidx, fwgt)         # (T-1, n_pad)
        m_bin = (warped > 0.5).astype(f32)
        tails_head = ((fgb_all[:T - 1, 0, :] - m_bin) == 1.0).astype(f32)[:, None, :]
        tails_all = jnp.concatenate([tails_head, fgb_all[T - 1:]], axis=0)
    else:
        tails_all = fgb_all

    # ---- fused SCM + trajectory embedding straight from the packed slabs ----
    emb_all = pallas_emb(src_all, params["scm_w1"], params["scm_w2"])     # (T, C, n_pad)

    # ---- back to the PyTorch (B, ch, T, H, W) layout only at the API boundary ----
    def to_out(x_tcn, ch):
        x = x_tcn[..., :n].reshape(T, ch, B, P)
        return jnp.transpose(x, (2, 1, 0, 3)).reshape(B, ch, T, H, W)

    return to_out(fg_all, 1), to_out(emb_all, C), to_out(tails_all, 1)


def init_params(key, C=32, cin=3):
    # TODO(synk): YNetPlus / ConvRNN stubs -- weights in PyTorch Linear
    # (out_channels, in_channels) orientation; wr = [wr1 | wr2] fused gate.
    k1, k2, k3, k4, k5, k6 = jax.random.split(key, 6)
    s = 0.1
    return {
        "wff": s * jax.random.normal(k1, (C, cin), jnp.float32),     # ynet stub (frames)
        "wfl": s * jax.random.normal(k6, (C, 2), jnp.float32),       # ynet stub (flow)
        "wm": s * jax.random.normal(k2, (C, 1), jnp.float32),        # ynet stub fgmask head
        "wr": s * jax.random.normal(k3, (C, 2 * C), jnp.float32),    # ptrnn stub gate [wr1|wr2]
        "scm_w1": s * jax.random.normal(k4, (C, 4), jnp.float32),    # nn.Linear(4, C, bias=False)
        "scm_w2": s * jax.random.normal(k5, (C, C), jnp.float32),    # nn.Linear(C, C, bias=False)
    }


if __name__ == "__main__":
    key = jax.random.PRNGKey(0)
    B, Cin, T, H, W, C = 2, 3, 4, 16, 16, 32
    kf, kl, ki, kp = jax.random.split(key, 4)
    frames = jax.random.normal(kf, (B, Cin, T, H, W), jnp.float32)
    flow = 2.0 * jax.random.normal(kl, (B, 2, T, H, W), jnp.float32)
    inv_flow = 2.0 * jax.random.normal(ki, (B, 2, T, H, W), jnp.float32)
    params = init_params(kp, C=C, cin=Cin)

    fwd = jax.jit(dense_trajectory_forward, static_argnames=("C",))
    fgmask, emb, tails = fwd(frames, flow, inv_flow, params, C=C)
    jax.block_until_ready((fgmask, emb, tails))

    assert fgmask.shape == (B, 1, T, H, W)
    assert emb.shape == (B, C, T, H, W)
    assert tails.shape == (B, 1, T, H, W)
    assert bool(jnp.all(jnp.isfinite(emb)))
    assert bool(jnp.all(jnp.isfinite(fgmask)))
    print("KERNEL_OK")
</pallas_src>

<mosaic_0001>
module attributes {stable_mosaic.version = 11 : i64} {
  func.func @_ynet_kernel(%arg0: i32, %arg1: i32, %arg2: memref<1x3x512xf32, #tpu.memory_space<vmem>>, %arg3: memref<1x2x512xf32, #tpu.memory_space<vmem>>, %arg4: memref<32x3xf32, #tpu.memory_space<vmem>>, %arg5: memref<32x2xf32, #tpu.memory_space<vmem>>, %arg6: memref<32x1xf32, #tpu.memory_space<vmem>>, %arg7: memref<1x32x512xf32, #tpu.memory_space<vmem>>, %arg8: memref<1x1x512xf32, #tpu.memory_space<vmem>>, %arg9: memref<1x1x512xf32, #tpu.memory_space<vmem>>) attributes {dimension_semantics = [#tpu.dimension_semantics<parallel>, #tpu.dimension_semantics<parallel>], iteration_bounds = array<i64: 4, 1>, scalar_prefetch = 0 : i64, scratch_operands = 0 : i64, tpu.core_type = #tpu.core_type<tc>, window_params = [{transform_indices = @transform_0, window_bounds = array<i64: 1, 3, 512>}, {transform_indices = @transform_1, window_bounds = array<i64: 1, 2, 512>}, {pipeline_mode = #tpu.pipeline_mode<synchronous>, transform_indices = @transform_2, window_bounds = array<i64: 32, 3>}, {pipeline_mode = #tpu.pipeline_mode<synchronous>, transform_indices = @transform_3, window_bounds = array<i64: 32, 2>}, {pipeline_mode = #tpu.pipeline_mode<synchronous>, transform_indices = @transform_4, window_bounds = array<i64: 32, 1>}, {transform_indices = @transform_5, window_bounds = array<i64: 1, 32, 512>}, {transform_indices = @transform_6, window_bounds = array<i64: 1, 1, 512>}, {transform_indices = @transform_7, window_bounds = array<i64: 1, 1, 512>}]} {
    %c0 = arith.constant 0 : index
    %c0_0 = arith.constant 0 : index
    %0 = vector.load %arg4[%c0, %c0_0] : memref<32x3xf32, #tpu.memory_space<vmem>>, vector<32x3xf32>
    %c0_1 = arith.constant 0 : index
    %c0_2 = arith.constant 0 : index
    %c0_3 = arith.constant 0 : index
    %1 = vector.load %arg2[%c0_1, %c0_2, %c0_3] : memref<1x3x512xf32, #tpu.memory_space<vmem>>, vector<1x3x512xf32>
    %2 = vector.shape_cast %1 : vector<1x3x512xf32> to vector<3x512xf32>
    %cst = arith.constant dense<0.000000e+00> : vector<32x512xf32>
    %3 = tpu.matmul %0, %2, %cst {dimension_numbers = #tpu.dot_dimension_numbers<[1], [0], [0], [1], [0, 0, 1, 1], [], []>} : vector<32x3xf32>, vector<3x512xf32>, vector<32x512xf32> -> vector<32x512xf32>
    %c0_4 = arith.constant 0 : index
    %c0_5 = arith.constant 0 : index
    %4 = vector.load %arg5[%c0_4, %c0_5] : memref<32x2xf32, #tpu.memory_space<vmem>>, vector<32x2xf32>
    %c0_6 = arith.constant 0 : index
    %c0_7 = arith.constant 0 : index
    %c0_8 = arith.constant 0 : index
    %5 = vector.load %arg3[%c0_6, %c0_7, %c0_8] : memref<1x2x512xf32, #tpu.memory_space<vmem>>, vector<1x2x512xf32>
    %6 = vector.shape_cast %5 : vector<1x2x512xf32> to vector<2x512xf32>
    %cst_9 = arith.constant dense<0.000000e+00> : vector<32x512xf32>
    %7 = tpu.matmul %4, %6, %cst_9 {dimension_numbers = #tpu.dot_dimension_numbers<[1], [0], [0], [1], [0, 0, 1, 1], [], []>} : vector<32x2xf32>, vector<2x512xf32>, vector<32x512xf32> -> vector<32x512xf32>
    %8 = arith.addf %3, %7 : vector<32x512xf32>
    %cst_10 = arith.constant 0.000000e+00 : f32
    %9 = vector.broadcast %cst_10 : f32 to vector<32x512xf32>
    %10 = arith.cmpf ogt, %8, %9 : vector<32x512xf32>
    %cst_11 = arith.constant 0.00999999977 : f32
    %11 = vector.broadcast %cst_11 : f32 to vector<32x512xf32>
    %12 = arith.mulf %11, %8 : vector<32x512xf32>
    %13 = arith.select %10, %8, %12 : vector<32x512xi1>, vector<32x512xf32>
    %c0_12 = arith.constant 0 : index
    %c0_13 = arith.constant 0 : index
    %c0_14 = arith.constant 0 : index
    %14 = vector.load %arg7[%c0_12, %c0_13, %c0_14] : memref<1x32x512xf32, #tpu.memory_space<vmem>>, vector<1x32x512xf32>
    %15 = vector.shape_cast %14 : vector<1x32x512xf32> to vector<32x512xf32>
    %16 = vector.shape_cast %13 : vector<32x512xf32> to vector<1x32x512xf32>
    tpu.vector_store %arg7[%c0_12, %c0_13, %c0_14], %16 {strides = array<i32>} : memref<1x32x512xf32, #tpu.memory_space<vmem>>, vector<1x32x512xf32>,
    %c0_15 = arith.constant 0 : index
    %c0_16 = arith.constant 0 : index
    %17 = vector.load %arg6[%c0_15, %c0_16] : memref<32x1xf32, #tpu.memory_space<vmem>>, vector<32x1xf32>
    %18 = vector.broadcast %17 : vector<32x1xf32> to vector<32x512xf32>
    %19 = arith.mulf %18, %13 : vector<32x512xf32>
    %cst_17 = arith.constant dense<0.000000e+00> : vector<512xf32>
    %20 = vector.multi_reduction <add>, %19, %cst_17 [0] : vector<32x512xf32> to vector<512xf32>
    %21 = vector.shape_cast %20 : vector<512xf32> to vector<1x512xf32>
    %22 = arith.negf %21 : vector<1x512xf32>
    %23 = math.exp %22 : vector<1x512xf32>
    %cst_18 = arith.constant 1.000000e+00 : f32
    %24 = vector.broadcast %cst_18 : f32 to vector<1x512xf32>
    %25 = arith.addf %24, %23 : vector<1x512xf32>
    %26 = arith.divf %24, %25 : vector<1x512xf32>
    %c0_19 = arith.constant 0 : index
    %c0_20 = arith.constant 0 : index
    %c0_21 = arith.constant 0 : index
    %27 = vector.load %arg8[%c0_19, %c0_20, %c0_21] : memref<1x1x512xf32, #tpu.memory_space<vmem>>, vector<1x1x512xf32>
    %28 = vector.shape_cast %27 : vector<1x1x512xf32> to vector<1x512xf32>
    %29 = vector.shape_cast %26 : vector<1x512xf32> to vector<1x1x512xf32>
    tpu.vector_store %arg8[%c0_19, %c0_20, %c0_21], %29 {strides = array<i32>} : memref<1x1x512xf32, #tpu.memory_space<vmem>>, vector<1x1x512xf32>,
    %cst_22 = arith.constant 5.000000e-01 : f32
    %30 = vector.broadcast %cst_22 : f32 to vector<1x512xf32>
    %31 = arith.cmpf ogt, %26, %30 : vector<1x512xf32>
    %32 = arith.extui %31 : vector<1x512xi1> to vector<1x512xi32>
    %33 = arith.sitofp %32 : vector<1x512xi32> to vector<1x512xf32>
    %c0_23 = arith.constant 0 : index
    %c0_24 = arith.constant 0 : index
    %c0_25 = arith.constant 0 : index
    %34 = vector.load %arg9[%c0_23, %c0_24, %c0_25] : memref<1x1x512xf32, #tpu.memory_space<vmem>>, vector<1x1x512xf32>
    %35 = vector.shape_cast %34 : vector<1x1x512xf32> to vector<1x512xf32>
    %36 = vector.shape_cast %33 : vector<1x512xf32> to vector<1x1x512xf32>
    tpu.vector_store %arg9[%c0_23, %c0_24, %c0_25], %36 {strides = array<i32>} : memref<1x1x512xf32, #tpu.memory_space<vmem>>, vector<1x1x512xf32>,
    return
  }
  func.func @transform_0(%arg0: i32, %arg1: i32) -> (i32, i32, i32) {
    %c0_i32 = arith.constant 0 : i32
    %c0_i32_0 = arith.constant 0 : i32
    return %arg0, %c0_i32, %arg1 : i32, i32, i32
  }
  func.func @transform_1(%arg0: i32, %arg1: i32) -> (i32, i32, i32) {
    %c0_i32 = arith.constant 0 : i32
    %c0_i32_0 = arith.constant 0 : i32
    return %arg0, %c0_i32, %arg1 : i32, i32, i32
  }
  func.func @transform_2(%arg0: i32, %arg1: i32) -> (i32, i32) {
    %c0_i32 = arith.constant 0 : i32
    %c0_i32_0 = arith.constant 0 : i32
    %c0_i32_1 = arith.constant 0 : i32
    return %c0_i32, %c0_i32_0 : i32, i32
  }
  func.func @transform_3(%arg0: i32, %arg1: i32) -> (i32, i32) {
    %c0_i32 = arith.constant 0 : i32
    %c0_i32_0 = arith.constant 0 : i32
    %c0_i32_1 = arith.constant 0 : i32
    return %c0_i32, %c0_i32_0 : i32, i32
  }
  func.func @transform_4(%arg0: i32, %arg1: i32) -> (i32, i32) {
    %c0_i32 = arith.constant 0 : i32
    %c0_i32_0 = arith.constant 0 : i32
    %c0_i32_1 = arith.constant 0 : i32
    return %c0_i32, %c0_i32_0 : i32, i32
  }
  func.func @transform_5(%arg0: i32, %arg1: i32) -> (i32, i32, i32) {
    %c0_i32 = arith.constant 0 : i32
    %c0_i32_0 = arith.constant 0 : i32
    return %arg0, %c0_i32, %arg1 : i32, i32, i32
  }
  func.func @transform_6(%arg0: i32, %arg1: i32) -> (i32, i32, i32) {
    %c0_i32 = arith.constant 0 : i32
    %c0_i32_0 = arith.constant 0 : i32
    return %arg0, %c0_i32, %arg1 : i32, i32, i32
  }
  func.func @transform_7(%arg0: i32, %arg1: i32) -> (i32, i32, i32) {
    %c0_i32 = arith.constant 0 : i32
    %c0_i32_0 = arith.constant 0 : i32
    return %arg0, %c0_i32, %arg1 : i32, i32, i32
  }
}

module attributes {stable_mosaic.version = 11 : i64} {
  func.func @_init_kernel(%arg0: i32, %arg1: memref<1x32x512xf32, #tpu.memory_space<vmem>>, %arg2: memref<1x5x512xf32, #tpu.memory_space<vmem>>, %arg3: memref<2x512xf32, #tpu.memory_space<vmem>>, %arg4: memref<32x32xf32, #tpu.memory_space<vmem>>, %arg5: memref<72x512xf32, #tpu.memory_space<vmem>>) attributes {dimension_semantics = [#tpu.dimension_semantics<parallel>], iteration_bounds = array<i64: 1>, scalar_prefetch = 0 : i64, scratch_operands = 0 : i64, tpu.core_type = #tpu.core_type<tc>, window_params = [{transform_indices = @transform_0, window_bounds = array<i64: 1, 32, 512>}, {transform_indices = @transform_1, window_bounds = array<i64: 1, 5, 512>}, {transform_indices = @transform_2, window_bounds = array<i64: 2, 512>}, {pipeline_mode = #tpu.pipeline_mode<synchronous>, transform_indices = @transform_3, window_bounds = array<i64: 32, 32>}, {transform_indices = @transform_4, window_bounds = array<i64: 72, 512>}]} {
    %c0 = arith.constant 0 : index
    %c0_0 = arith.constant 0 : index
    %c0_1 = arith.constant 0 : index
    %0 = vector.load %arg1[%c0, %c0_0, %c0_1] : memref<1x32x512xf32, #tpu.memory_space<vmem>>, vector<1x32x512xf32>
    %1 = vector.shape_cast %0 : vector<1x32x512xf32> to vector<32x512xf32>
    %c0_2 = arith.constant 0 : index
    %c0_3 = arith.constant 0 : index
    %c0_4 = arith.constant 0 : index
    %2 = vector.load %arg2[%c0_2, %c0_3, %c0_4] : memref<1x5x512xf32, #tpu.memory_space<vmem>>, vector<1x5x512xf32>
    %3 = vector.shape_cast %2 : vector<1x5x512xf32> to vector<5x512xf32>
    %4 = vector.extract_strided_slice %3 {offsets = [0, 0], sizes = [1, 512], strides = [1, 1]} : vector<5x512xf32> to vector<1x512xf32>
    %5 = vector.extract_strided_slice %3 {offsets = [1, 0], sizes = [2, 512], strides = [1, 1]} : vector<5x512xf32> to vector<2x512xf32>
    %c0_5 = arith.constant 0 : index
    %c0_6 = arith.constant 0 : index
    %6 = vector.load %arg4[%c0_5, %c0_6] : memref<32x32xf32, #tpu.memory_space<vmem>>, vector<32x32xf32>
    %cst = arith.constant dense<0.000000e+00> : vector<32x512xf32>
    %7 = tpu.matmul %6, %1, %cst {dimension_numbers = #tpu.dot_dimension_numbers<[1], [0], [0], [1], [0, 0, 1, 1], [], []>} : vector<32x32xf32>, vector<32x512xf32>, vector<32x512xf32> -> vector<32x512xf32>
    %8 = arith.negf %7 : vector<32x512xf32>
    %9 = math.exp %8 : vector<32x512xf32>
    %cst_7 = arith.constant 1.000000e+00 : f32
    %10 = vector.broadcast %cst_7 : f32 to vector<32x512xf32>
    %11 = arith.addf %10, %9 : vector<32x512xf32>
    %12 = arith.divf %10, %11 : vector<32x512xf32>
    %13 = arith.mulf %12, %1 : vector<32x512xf32>
    %c0_8 = arith.constant 0 : index
    %c0_9 = arith.constant 0 : index
    %14 = vector.load %arg5[%c0_8, %c0_9] : memref<72x512xf32, #tpu.memory_space<vmem>>, vector<32x512xf32>
    tpu.vector_store %arg5[%c0_8, %c0_9], %13 {strides = array<i32>} : memref<72x512xf32, #tpu.memory_space<vmem>>, vector<32x512xf32>,
    %c32 = arith.constant 32 : index
    %c0_10 = arith.constant 0 : index
    %15 = vector.load %arg5[%c32, %c0_10] : memref<72x512xf32, #tpu.memory_space<vmem>>, vector<32x512xf32>
    tpu.vector_store %arg5[%c32, %c0_10], %12 {strides = array<i32>} : memref<72x512xf32, #tpu.memory_space<vmem>>, vector<32x512xf32>,
    %c0_11 = arith.constant 0 : index
    %c0_12 = arith.constant 0 : index
    %16 = vector.load %arg3[%c0_11, %c0_12] : memref<2x512xf32, #tpu.memory_space<vmem>>, vector<2x512xf32>
    %c64 = arith.constant 64 : index
    %c0_13 = arith.constant 0 : index
    %17 = vector.load %arg5[%c64, %c0_13] : memref<72x512xf32, #tpu.memory_space<vmem>>, vector<2x512xf32>
    tpu.vector_store %arg5[%c64, %c0_13], %16 {strides = array<i32>} : memref<72x512xf32, #tpu.memory_space<vmem>>, vector<2x512xf32>,
    %c66 = arith.constant 66 : index
    %c0_14 = arith.constant 0 : index
    %18 = vector.load %arg5[%c66, %c0_14] : memref<72x512xf32, #tpu.memory_space<vmem>>, vector<2x512xf32>
    tpu.vector_store %arg5[%c66, %c0_14], %5 {strides = array<i32>} : memref<72x512xf32, #tpu.memory_space<vmem>>, vector<2x512xf32>,
    %cst_15 = arith.constant 1.000000e+00 : f32
    %19 = vector.broadcast %cst_15 : f32 to vector<1x512xf32>
    %c68 = arith.constant 68 : index
    %c0_16 = arith.constant 0 : index
    %20 = vector.load %arg5[%c68, %c0_16] : memref<72x512xf32, #tpu.memory_space<vmem>>, vector<1x512xf32>
    tpu.vector_store %arg5[%c68, %c0_16], %19 {strides = array<i32>} : memref<72x512xf32, #tpu.memory_space<vmem>>, vector<1x512xf32>,
    %c69 = arith.constant 69 : index
    %c0_17 = arith.constant 0 : index
    %21 = vector.load %arg5[%c69, %c0_17] : memref<72x512xf32, #tpu.memory_space<vmem>>, vector<1x512xf32>
    tpu.vector_store %arg5[%c69, %c0_17], %4 {strides = array<i32>} : memref<72x512xf32, #tpu.memory_space<vmem>>, vector<1x512xf32>,
    %c70 = arith.constant 70 : index
    %c0_18 = arith.constant 0 : index
    %22 = vector.load %arg5[%c70, %c0_18] : memref<72x512xf32, #tpu.memory_space<vmem>>, vector<2x512xf32>
    tpu.vector_store %arg5[%c70, %c0_18], %5 {strides = array<i32>} : memref<72x512xf32, #tpu.memory_space<vmem>>, vector<2x512xf32>,
    return
  }
  func.func @transform_0(%arg0: i32) -> (i32, i32, i32) {
    %c0_i32 = arith.constant 0 : i32
    %c0_i32_0 = arith.constant 0 : i32
    %c0_i32_1 = arith.constant 0 : i32
    return %c0_i32, %c0_i32_0, %arg0 : i32, i32, i32
  }
  func.func @transform_1(%arg0: i32) -> (i32, i32, i32) {
    %c0_i32 = arith.constant 0 : i32
    %c0_i32_0 = arith.constant 0 : i32
    %c0_i32_1 = arith.constant 0 : i32
    return %c0_i32, %c0_i32_0, %arg0 : i32, i32, i32
  }
  func.func @transform_2(%arg0: i32) -> (i32, i32) {
    %c0_i32 = arith.constant 0 : i32
    %c0_i32_0 = arith.constant 0 : i32
    return %c0_i32, %arg0 : i32, i32
  }
  func.func @transform_3(%arg0: i32) -> (i32, i32) {
    %c0_i32 = arith.constant 0 : i32
    %c0_i32_0 = arith.constant 0 : i32
    %c0_i32_1 = arith.constant 0 : i32
    return %c0_i32, %c0_i32_0 : i32, i32
  }
  func.func @transform_4(%arg0: i32) -> (i32, i32) {
    %c0_i32 = arith.constant 0 : i32
    %c0_i32_0 = arith.constant 0 : i32
    return %c0_i32, %arg0 : i32, i32
  }
}

module attributes {stable_mosaic.version = 11 : i64} {
  func.func @_step_kernel(%arg0: i32, %arg1: memref<1xi32, #tpu.memory_space<smem>>, %arg2: memref<1x32x512xf32, #tpu.memory_space<vmem>>, %arg3: memref<1x5x512xf32, #tpu.memory_space<vmem>>, %arg4: memref<72x512xf32, #tpu.memory_space<vmem>>, %arg5: memref<2x512xf32, #tpu.memory_space<vmem>>, %arg6: memref<32x64xf32, #tpu.memory_space<vmem>>, %arg7: memref<1x512xf32, #tpu.memory_space<vmem>>, %arg8: memref<72x512xf32, #tpu.memory_space<vmem>>, %arg9: memref<64x512xf32, #tpu.memory_space<vmem>>) attributes {dimension_semantics = [#tpu.dimension_semantics<parallel>], iteration_bounds = array<i64: 1>, scalar_prefetch = 1 : i64, scratch_operands = 1 : i64, tpu.core_type = #tpu.core_type<tc>, window_params = [{transform_indices = @transform_0, window_bounds = array<i64: 1, 32, 512>}, {transform_indices = @transform_1, window_bounds = array<i64: 1, 5, 512>}, {transform_indices = @transform_2, window_bounds = array<i64: 72, 512>}, {transform_indices = @transform_3, window_bounds = array<i64: 2, 512>}, {pipeline_mode = #tpu.pipeline_mode<synchronous>, transform_indices = @transform_4, window_bounds = array<i64: 32, 64>}, {transform_indices = @transform_5, window_bounds = array<i64: 1, 512>}, {transform_indices = @transform_6, window_bounds = array<i64: 72, 512>}]} {
    %c0 = arith.constant 0 : index
    %c0_0 = arith.constant 0 : index
    %c0_1 = arith.constant 0 : index
    %0 = vector.load %arg2[%c0, %c0_0, %c0_1] : memref<1x32x512xf32, #tpu.memory_space<vmem>>, vector<1x32x512xf32>
    %1 = vector.shape_cast %0 : vector<1x32x512xf32> to vector<32x512xf32>
    %c0_2 = arith.constant 0 : index
    %c0_3 = arith.constant 0 : index
    %c0_4 = arith.constant 0 : index
    %2 = vector.load %arg3[%c0_2, %c0_3, %c0_4] : memref<1x5x512xf32, #tpu.memory_space<vmem>>, vector<1x5x512xf32>
    %3 = vector.shape_cast %2 : vector<1x5x512xf32> to vector<5x512xf32>
    %4 = vector.extract_strided_slice %3 {offsets = [0, 0], sizes = [1, 512], strides = [1, 1]} : vector<5x512xf32> to vector<1x512xf32>
    %5 = vector.extract_strided_slice %3 {offsets = [1, 0], sizes = [2, 512], strides = [1, 1]} : vector<5x512xf32> to vector<2x512xf32>
    %6 = vector.extract_strided_slice %3 {offsets = [3, 0], sizes = [2, 512], strides = [1, 1]} : vector<5x512xf32> to vector<2x512xf32>
    %c0_5 = arith.constant 0 : index
    %c0_6 = arith.constant 0 : index
    %7 = vector.load %arg4[%c0_5, %c0_6] : memref<72x512xf32, #tpu.memory_space<vmem>>, vector<32x512xf32>
    %c32 = arith.constant 32 : index
    %c0_7 = arith.constant 0 : index
    %8 = vector.load %arg4[%c32, %c0_7] : memref<72x512xf32, #tpu.memory_space<vmem>>, vector<32x512xf32>
    %c64 = arith.constant 64 : index
    %c0_8 = arith.constant 0 : index
    %9 = vector.load %arg4[%c64, %c0_8] : memref<72x512xf32, #tpu.memory_space<vmem>>, vector<5x512xf32>
    %c69 = arith.constant 69 : index
    %c0_9 = arith.constant 0 : index
    %10 = vector.load %arg4[%c69, %c0_9] : memref<72x512xf32, #tpu.memory_space<vmem>>, vector<1x512xf32>
    %c70 = arith.constant 70 : index
    %c0_10 = arith.constant 0 : index
    %11 = vector.load %arg4[%c70, %c0_10] : memref<72x512xf32, #tpu.memory_space<vmem>>, vector<2x512xf32>
    %12 = arith.addf %11, %6 : vector<2x512xf32>
    %13 = arith.mulf %12, %12 : vector<2x512xf32>
    %cst = arith.constant dense<0.000000e+00> : vector<512xf32>
    %14 = vector.multi_reduction <add>, %13, %cst [0] : vector<2x512xf32> to vector<512xf32>
    %15 = vector.shape_cast %14 : vector<512xf32> to vector<1x512xf32>
    %16 = arith.mulf %11, %11 : vector<2x512xf32>
    %17 = arith.mulf %6, %6 : vector<2x512xf32>
    %18 = arith.addf %16, %17 : vector<2x512xf32>
    %cst_11 = arith.constant 0.00999999977 : f32
    %19 = vector.broadcast %cst_11 : f32 to vector<2x512xf32>
    %20 = arith.mulf %19, %18 : vector<2x512xf32>
    %cst_12 = arith.constant dense<0.000000e+00> : vector<512xf32>
    %21 = vector.multi_reduction <add>, %20, %cst_12 [0] : vector<2x512xf32> to vector<512xf32>
    %22 = vector.shape_cast %21 : vector<512xf32> to vector<1x512xf32>
    %cst_13 = arith.constant 5.000000e-01 : f32
    %23 = vector.broadcast %cst_13 : f32 to vector<1x512xf32>
    %24 = arith.addf %22, %23 : vector<1x512xf32>
    %25 = arith.cmpf ole, %15, %24 : vector<1x512xf32>
    %26 = arith.extui %25 : vector<1x512xi1> to vector<1x512xi32>
    %27 = arith.sitofp %26 : vector<1x512xi32> to vector<1x512xf32>
    %cst_14 = arith.constant 5.000000e-01 : f32
    %28 = vector.broadcast %cst_14 : f32 to vector<1x512xf32>
    %29 = arith.cmpf ogt, %10, %28 : vector<1x512xf32>
    %30 = arith.extui %29 : vector<1x512xi1> to vector<1x512xi32>
    %31 = arith.sitofp %30 : vector<1x512xi32> to vector<1x512xf32>
    %32 = arith.mulf %31, %4 : vector<1x512xf32>
    %33 = arith.mulf %32, %27 : vector<1x512xf32>
    %c0_15 = arith.constant 0 : index
    %c0_16 = arith.constant 0 : index
    %34 = vector.load %arg7[%c0_15, %c0_16] : memref<1x512xf32, #tpu.memory_space<vmem>>, vector<1x512xf32>
    tpu.vector_store %arg7[%c0_15, %c0_16], %33 {strides = array<i32>} : memref<1x512xf32, #tpu.memory_space<vmem>>, vector<1x512xf32>,
    %35 = vector.broadcast %33 : vector<1x512xf32> to vector<32x512xf32>
    %36 = arith.mulf %7, %35 : vector<32x512xf32>
    %37 = vector.broadcast %33 : vector<1x512xf32> to vector<32x512xf32>
    %38 = arith.mulf %8, %37 : vector<32x512xf32>
    %cst_17 = arith.constant 9.99999997E-7 : f32
    %39 = vector.broadcast %cst_17 : f32 to vector<32x512xf32>
    %40 = arith.maximumf %38, %39 : vector<32x512xf32>
    %41 = arith.divf %36, %40 : vector<32x512xf32>
    %c0_18 = arith.constant 0 : index
    %c0_19 = arith.constant 0 : index
    %42 = vector.load %arg9[%c0_18, %c0_19] : memref<64x512xf32, #tpu.memory_space<vmem>>, vector<32x512xf32>
    tpu.vector_store %arg9[%c0_18, %c0_19], %41 {strides = array<i32>} : memref<64x512xf32, #tpu.memory_space<vmem>>, vector<32x512xf32>,
    %c32_20 = arith.constant 32 : index
    %c0_21 = arith.constant 0 : index
    %43 = vector.load %arg9[%c32_20, %c0_21] : memref<64x512xf32, #tpu.memory_space<vmem>>, vector<32x512xf32>
    tpu.vector_store %arg9[%c32_20, %c0_21], %1 {strides = array<i32>} : memref<64x512xf32, #tpu.memory_space<vmem>>, vector<32x512xf32>,
    %c0_22 = arith.constant 0 : index
    %c0_23 = arith.constant 0 : index
    %44 = vector.load %arg6[%c0_22, %c0_23] : memref<32x64xf32, #tpu.memory_space<vmem>>, vector<32x64xf32>
    %c0_24 = arith.constant 0 : index
    %c0_25 = arith.constant 0 : index
    %45 = vector.load %arg9[%c0_24, %c0_25] : memref<64x512xf32, #tpu.memory_space<vmem>>, vector<64x512xf32>
    %cst_26 = arith.constant dense<0.000000e+00> : vector<32x512xf32>
    %46 = tpu.matmul %44, %45, %cst_26 {dimension_numbers = #tpu.dot_dimension_numbers<[1], [0], [0], [1], [0, 0, 1, 1], [], []>} : vector<32x64xf32>, vector<64x512xf32>, vector<32x512xf32> -> vector<32x512xf32>
    %47 = arith.negf %46 : vector<32x512xf32>
    %48 = math.exp %47 : vector<32x512xf32>
    %cst_27 = arith.constant 1.000000e+00 : f32
    %49 = vector.broadcast %cst_27 : f32 to vector<32x512xf32>
    %50 = arith.addf %49, %48 : vector<32x512xf32>
    %51 = arith.divf %49, %50 : vector<32x512xf32>
    %52 = arith.mulf %51, %1 : vector<32x512xf32>
    %53 = arith.addf %36, %52 : vector<32x512xf32>
    %c0_28 = arith.constant 0 : index
    %c0_29 = arith.constant 0 : index
    %54 = vector.load %arg8[%c0_28, %c0_29] : memref<72x512xf32, #tpu.memory_space<vmem>>, vector<32x512xf32>
    tpu.vector_store %arg8[%c0_28, %c0_29], %53 {strides = array<i32>} : memref<72x512xf32, #tpu.memory_space<vmem>>, vector<32x512xf32>,
    %55 = arith.addf %38, %51 : vector<32x512xf32>
    %c32_30 = arith.constant 32 : index
    %c0_31 = arith.constant 0 : index
    %56 = vector.load %arg8[%c32_30, %c0_31] : memref<72x512xf32, #tpu.memory_space<vmem>>, vector<32x512xf32>
    tpu.vector_store %arg8[%c32_30, %c0_31], %55 {strides = array<i32>} : memref<72x512xf32, #tpu.memory_space<vmem>>, vector<32x512xf32>,
    %57 = vector.broadcast %33 : vector<1x512xf32> to vector<5x512xf32>
    %58 = arith.mulf %9, %57 : vector<5x512xf32>
    %59 = vector.extract_strided_slice %58 {offsets = [0, 0], sizes = [2, 512], strides = [1, 1]} : vector<5x512xf32> to vector<2x512xf32>
    %c0_32 = arith.constant 0 : index
    %c0_33 = arith.constant 0 : index
    %60 = vector.load %arg5[%c0_32, %c0_33] : memref<2x512xf32, #tpu.memory_space<vmem>>, vector<2x512xf32>
    %61 = arith.addf %59, %60 : vector<2x512xf32>
    %c64_34 = arith.constant 64 : index
    %c0_35 = arith.constant 0 : index
    %62 = vector.load %arg8[%c64_34, %c0_35] : memref<72x512xf32, #tpu.memory_space<vmem>>, vector<2x512xf32>
    tpu.vector_store %arg8[%c64_34, %c0_35], %61 {strides = array<i32>} : memref<72x512xf32, #tpu.memory_space<vmem>>, vector<2x512xf32>,
    %63 = vector.extract_strided_slice %58 {offsets = [2, 0], sizes = [2, 512], strides = [1, 1]} : vector<5x512xf32> to vector<2x512xf32>
    %64 = arith.addf %63, %5 : vector<2x512xf32>
    %c66 = arith.constant 66 : index
    %c0_36 = arith.constant 0 : index
    %65 = vector.load %arg8[%c66, %c0_36] : memref<72x512xf32, #tpu.memory_space<vmem>>, vector<2x512xf32>
    tpu.vector_store %arg8[%c66, %c0_36], %64 {strides = array<i32>} : memref<72x512xf32, #tpu.memory_space<vmem>>, vector<2x512xf32>,
    %66 = vector.extract_strided_slice %58 {offsets = [4, 0], sizes = [1, 512], strides = [1, 1]} : vector<5x512xf32> to vector<1x512xf32>
    %cst_37 = arith.constant 1.000000e+00 : f32
    %67 = vector.broadcast %cst_37 : f32 to vector<1x512xf32>
    %68 = arith.addf %66, %67 : vector<1x512xf32>
    %c68 = arith.constant 68 : index
    %c0_38 = arith.constant 0 : index
    %69 = vector.load %arg8[%c68, %c0_38] : memref<72x512xf32, #tpu.memory_space<vmem>>, vector<1x512xf32>
    tpu.vector_store %arg8[%c68, %c0_38], %68 {strides = array<i32>} : memref<72x512xf32, #tpu.memory_space<vmem>>, vector<1x512xf32>,
    %c69_39 = arith.constant 69 : index
    %c0_40 = arith.constant 0 : index
    %70 = vector.load %arg8[%c69_39, %c0_40] : memref<72x512xf32, #tpu.memory_space<vmem>>, vector<1x512xf32>
    tpu.vector_store %arg8[%c69_39, %c0_40], %4 {strides = array<i32>} : memref<72x512xf32, #tpu.memory_space<vmem>>, vector<1x512xf32>,
    %c70_41 = arith.constant 70 : index
    %c0_42 = arith.constant 0 : index
    %71 = vector.load %arg8[%c70_41, %c0_42] : memref<72x512xf32, #tpu.memory_space<vmem>>, vector<2x512xf32>
    tpu.vector_store %arg8[%c70_41, %c0_42], %5 {strides = array<i32>} : memref<72x512xf32, #tpu.memory_space<vmem>>, vector<2x512xf32>,
    return
  }
  func.func @transform_0(%arg0: i32, %arg1: memref<1xi32, #tpu.memory_space<smem>>) -> (i32, i32, i32) {
    %c0 = arith.constant 0 : index
    %0 = memref.load %arg1[%c0] : memref<1xi32, #tpu.memory_space<smem>>
    %c0_i32 = arith.constant 0 : i32
    %c0_i32_0 = arith.constant 0 : i32
    return %0, %c0_i32, %arg0 : i32, i32, i32
  }
  func.func @transform_1(%arg0: i32, %arg1: memref<1xi32, #tpu.memory_space<smem>>) -> (i32, i32, i32) {
    %c0 = arith.constant 0 : index
    %0 = memref.load %arg1[%c0] : memref<1xi32, #tpu.memory_space<smem>>
    %c0_i32 = arith.constant 0 : i32
    %c0_i32_0 = arith.constant 0 : i32
    return %0, %c0_i32, %arg0 : i32, i32, i32
  }
  func.func @transform_2(%arg0: i32, %arg1: memref<1xi32, #tpu.memory_space<smem>>) -> (i32, i32) {
    %c0_i32 = arith.constant 0 : i32
    %c0_i32_0 = arith.constant 0 : i32
    return %c0_i32, %arg0 : i32, i32
  }
  func.func @transform_3(%arg0: i32, %arg1: memref<1xi32, #tpu.memory_space<smem>>) -> (i32, i32) {
    %c0_i32 = arith.constant 0 : i32
    %c0_i32_0 = arith.constant 0 : i32
    return %c0_i32, %arg0 : i32, i32
  }
  func.func @transform_4(%arg0: i32, %arg1: memref<1xi32, #tpu.memory_space<smem>>) -> (i32, i32) {
    %c0_i32 = arith.constant 0 : i32
    %c0_i32_0 = arith.constant 0 : i32
    %c0_i32_1 = arith.constant 0 : i32
    return %c0_i32, %c0_i32_0 : i32, i32
  }
  func.func @transform_5(%arg0: i32, %arg1: memref<1xi32, #tpu.memory_space<smem>>) -> (i32, i32) {
    %c0_i32 = arith.constant 0 : i32
    %c0_i32_0 = arith.constant 0 : i32
    return %c0_i32, %arg0 : i32, i32
  }
  func.func @transform_6(%arg0: i32, %arg1: memref<1xi32, #tpu.memory_space<smem>>) -> (i32, i32) {
    %c0_i32 = arith.constant 0 : i32
    %c0_i32_0 = arith.constant 0 : i32
    return %c0_i32, %arg0 : i32, i32
  }
}

module attributes {stable_mosaic.version = 11 : i64} {
  func.func @_emb_kernel(%arg0: i32, %arg1: i32, %arg2: memref<1x72x512xf32, #tpu.memory_space<vmem>>, %arg3: memref<32x4xf32, #tpu.memory_space<vmem>>, %arg4: memref<32x32xf32, #tpu.memory_space<vmem>>, %arg5: memref<1x32x512xf32, #tpu.memory_space<vmem>>) attributes {dimension_semantics = [#tpu.dimension_semantics<parallel>, #tpu.dimension_semantics<parallel>], iteration_bounds = array<i64: 4, 1>, scalar_prefetch = 0 : i64, scratch_operands = 0 : i64, tpu.core_type = #tpu.core_type<tc>, window_params = [{transform_indices = @transform_0, window_bounds = array<i64: 1, 72, 512>}, {pipeline_mode = #tpu.pipeline_mode<synchronous>, transform_indices = @transform_1, window_bounds = array<i64: 32, 4>}, {pipeline_mode = #tpu.pipeline_mode<synchronous>, transform_indices = @transform_2, window_bounds = array<i64: 32, 32>}, {transform_indices = @transform_3, window_bounds = array<i64: 1, 32, 512>}]} {
    %c0 = arith.constant 0 : index
    %c0_0 = arith.constant 0 : index
    %c0_1 = arith.constant 0 : index
    %0 = vector.load %arg2[%c0, %c0_0, %c0_1] : memref<1x72x512xf32, #tpu.memory_space<vmem>>, vector<1x32x512xf32>
    %1 = vector.shape_cast %0 : vector<1x32x512xf32> to vector<32x512xf32>
    %c0_2 = arith.constant 0 : index
    %c32 = arith.constant 32 : index
    %c0_3 = arith.constant 0 : index
    %2 = vector.load %arg2[%c0_2, %c32, %c0_3] : memref<1x72x512xf32, #tpu.memory_space<vmem>>, vector<1x32x512xf32>
    %3 = vector.shape_cast %2 : vector<1x32x512xf32> to vector<32x512xf32>
    %c0_4 = arith.constant 0 : index
    %c64 = arith.constant 64 : index
    %c0_5 = arith.constant 0 : index
    %4 = vector.load %arg2[%c0_4, %c64, %c0_5] : memref<1x72x512xf32, #tpu.memory_space<vmem>>, vector<1x5x512xf32>
    %5 = vector.shape_cast %4 : vector<1x5x512xf32> to vector<5x512xf32>
    %6 = vector.extract_strided_slice %5 {offsets = [0, 0], sizes = [4, 512], strides = [1, 1]} : vector<5x512xf32> to vector<4x512xf32>
    %7 = vector.extract_strided_slice %5 {offsets = [4, 0], sizes = [1, 512], strides = [1, 1]} : vector<5x512xf32> to vector<1x512xf32>
    %8 = tpu.reciprocal %7 {approx = true} : vector<1x512xf32> -> vector<1x512xf32>
    %9 = vector.broadcast %8 : vector<1x512xf32> to vector<4x512xf32>
    %10 = arith.mulf %6, %9 : vector<4x512xf32>
    %c0_6 = arith.constant 0 : index
    %c0_7 = arith.constant 0 : index
    %11 = vector.load %arg3[%c0_6, %c0_7] : memref<32x4xf32, #tpu.memory_space<vmem>>, vector<32x4xf32>
    %cst = arith.constant dense<0.000000e+00> : vector<32x512xf32>
    %12 = tpu.matmul %11, %10, %cst {dimension_numbers = #tpu.dot_dimension_numbers<[1], [0], [0], [1], [0, 0, 1, 1], [], []>} : vector<32x4xf32>, vector<4x512xf32>, vector<32x512xf32> -> vector<32x512xf32>
    %cst_8 = arith.constant 0.000000e+00 : f32
    %13 = vector.broadcast %cst_8 : f32 to vector<32x512xf32>
    %14 = arith.cmpf ogt, %12, %13 : vector<32x512xf32>
    %cst_9 = arith.constant 0.00999999977 : f32
    %15 = vector.broadcast %cst_9 : f32 to vector<32x512xf32>
    %16 = arith.mulf %15, %12 : vector<32x512xf32>
    %17 = arith.select %14, %12, %16 : vector<32x512xi1>, vector<32x512xf32>
    %c0_10 = arith.constant 0 : index
    %c0_11 = arith.constant 0 : index
    %18 = vector.load %arg4[%c0_10, %c0_11] : memref<32x32xf32, #tpu.memory_space<vmem>>, vector<32x32xf32>
    %cst_12 = arith.constant dense<0.000000e+00> : vector<32x512xf32>
    %19 = tpu.matmul %18, %17, %cst_12 {dimension_numbers = #tpu.dot_dimension_numbers<[1], [0], [0], [1], [0, 0, 1, 1], [], []>} : vector<32x32xf32>, vector<32x512xf32>, vector<32x512xf32> -> vector<32x512xf32>
    %cst_13 = arith.constant 9.99999996E-13 : f32
    %20 = vector.broadcast %cst_13 : f32 to vector<32x512xf32>
    %21 = arith.maximumf %3, %20 : vector<32x512xf32>
    %22 = tpu.reciprocal %21 {approx = true} : vector<32x512xf32> -> vector<32x512xf32>
    %23 = arith.mulf %1, %22 : vector<32x512xf32>
    %24 = arith.addf %23, %19 : vector<32x512xf32>
    %c0_14 = arith.constant 0 : index
    %c0_15 = arith.constant 0 : index
    %c0_16 = arith.constant 0 : index
    %25 = vector.load %arg5[%c0_14, %c0_15, %c0_16] : memref<1x32x512xf32, #tpu.memory_space<vmem>>, vector<1x32x512xf32>
    %26 = vector.shape_cast %25 : vector<1x32x512xf32> to vector<32x512xf32>
    %27 = vector.shape_cast %24 : vector<32x512xf32> to vector<1x32x512xf32>
    tpu.vector_store %arg5[%c0_14, %c0_15, %c0_16], %27 {strides = array<i32>} : memref<1x32x512xf32, #tpu.memory_space<vmem>>, vector<1x32x512xf32>,
    return
  }
  func.func @transform_0(%arg0: i32, %arg1: i32) -> (i32, i32, i32) {
    %c0_i32 = arith.constant 0 : i32
    %c0_i32_0 = arith.constant 0 : i32
    return %arg0, %c0_i32, %arg1 : i32, i32, i32
  }
  func.func @transform_1(%arg0: i32, %arg1: i32) -> (i32, i32) {
    %c0_i32 = arith.constant 0 : i32
    %c0_i32_0 = arith.constant 0 : i32
    %c0_i32_1 = arith.constant 0 : i32
    return %c0_i32, %c0_i32_0 : i32, i32
  }
  func.func @transform_2(%arg0: i32, %arg1: i32) -> (i32, i32) {
    %c0_i32 = arith.constant 0 : i32
    %c0_i32_0 = arith.constant 0 : i32
    %c0_i32_1 = arith.constant 0 : i32
    return %c0_i32, %c0_i32_0 : i32, i32
  }
  func.func @transform_3(%arg0: i32, %arg1: i32) -> (i32, i32, i32) {
    %c0_i32 = arith.constant 0 : i32
    %c0_i32_0 = arith.constant 0 : i32
    return %arg0, %c0_i32, %arg1 : i32, i32, i32
  }
}

</mosaic_0001>

<bundles_post_ra>
// kernel: custom-call.21
= control target key start
LH: loop header
LB: loop body
LE: loop exit
PB: predicated region body
PF: predicated region fallthrough
CT: control target
= control target key end

     0   :  { %s6_s0 = inlined_call_operand.vmem [shape: f32[3,72,512], index: 0, kind: output, shape index: {}]  }

// kernel: custom-call.20
= control target key start
LH: loop header
LB: loop body
LE: loop exit
PB: predicated region body
PF: predicated region fallthrough
CT: control target
= control target key end

     0   :  { %s6_s0 = inlined_call_operand.vmem [shape: f32[3,1,512], index: 0, kind: output, shape index: {}]  }

// kernel: dense_trajectory_forward.3
= control target key start
LH: loop header
LB: loop body
LE: loop exit
PB: predicated region body
PF: predicated region fallthrough
CT: control target
= control target key end

     0   :  { %s1326_s24 = smov 0   ;;  %s1328_s25 = smov 0   ;;  %s1509_s0 = inlined_call_operand.vmem [shape: f32[4,3,512], index: 0, kind: input, shape index: {}]   ;;  %s1510_s1 = inlined_call_operand.vmem [shape: f32[4,2,512], index: 1, kind: input, shape index: {}]   ;;  %s1511_s2 = inlined_call_operand.vmem [shape: f32[32,3], index: 2, kind: input, shape index: {}]   ;;  %s1512_s3 = inlined_call_operand.vmem [shape: f32[32,2], index: 3, kind: input, shape index: {}]   ;;  %s1513_s4 = inlined_call_operand.vmem [shape: f32[32,1], index: 4, kind: input, shape index: {}]   ;;  %s1514_s5 = inlined_call_operand.vmem [shape: f32[4,32,512], index: 5, kind: output, shape index: {0}]   ;;  %s1515_s6 = inlined_call_operand.vmem [shape: f32[4,1,512], index: 6, kind: output, shape index: {1}]   ;;  %s1516_s7 = inlined_call_operand.vmem [shape: f32[4,1,512], index: 7, kind: output, shape index: {2}]  }
   0x1   :  { %s1330_s26 = smov 0  }
   0x2 LB: > { %s30_s27 = sadd.s32 1, %s1278_s25  ;;  %p1154_p0 = scmp.ge.s32.totalorder %s1282_s26, 1  ;;  %s1282_s26 = sphi %s1330_s26, %s18_s26   ;;  %s1278_s25 = sphi %s1328_s25, %s1520_s25   ;;  %s1274_s24 = sphi %s1326_s24, %s1519_s24  }
   0x3   : > { %p32_p1 = scmp.ge.s32.totalorder %s30_s27, 4  ;;  %p284_p2 = scmp.lt.s32.totalorder %s1282_s26, 5 }
   0x5   : > { %s1522_s27 = smov (%p32_p1, %s30_s27), 0  ;;  %p285_p3 = pnand %p1154_p0, %p284_p2 }
   0x6   : > { %p350_p4 = scmp.lt.s32.totalorder (!%p285_p3), %s1274_s24, 3 }
   0x7   : > { %288 = sbr.rel (%p285_p3) target bundleno = 272 (0x110), region = 40 }
   0xc   : > { %s1524_s24 = smov (!%p350_p4, %s1274_s24), 3  ;;  %vm427_vm0 = vcmask 1041408   ;;  %v403_v3 = vld [vmem:[%s1512_s3] sm:$0xff]  ;;  %vm414_vm1 = vcmask 15360   ;;  %vm574_vm2 = vcmask 1042432   ;;  %v404_v8 = vld [vmem:[%s1512_s3 + $0x8] sm:$0xff] }
   0xd   : > { %s1214_s28 = sshll.u32 %s1524_s24, 3  ;;  %s1213_s9 = sshll.u32 %s1524_s24, 4  ;;  %v763_v13 = vld [vmem:[%s1513_s4] sm:$0xff]  ;;  %v1284_v14 = vmov 0   ;;  %v405_v15 = vld [vmem:[%s1512_s3 + $0x10] sm:$0xff]  ;;  %v764_v16 = vld [vmem:[%s1513_s4 + $0x8] sm:$0xff] }
   0xe   : > { %s367_s8 = scalar_lea.vmem %s1510_s1, %s1214_s28  ;;  %s357_s12 = scalar_lea.vmem %s1509_s0, %s1213_s9  ;;  %1242 = vset.pattern.permute.xlu0 %v1284_v14  ;;  %1243 = vset.pattern.permute.xlu1 %v1284_v14  ;;  %v406_v17 = vld [vmem:[%s1512_s3 + $0x18] sm:$0xff]  ;;  %v765_v18 = vld [vmem:[%s1513_s4 + $0x10] sm:$0xff]  ;;  %v397_v19 = vld [vmem:[%s1511_s2] sm:$0xff]  ;;  %vm561_vm3 = vcmask 23552  }
   0xf   : > { %v407_v0 = vld [vmem:[%s367_s8] sm:$0xff]  ;;  %v402_v2 = vld [vmem:[%s357_s12 + $0x8] sm:$0x77]  ;;  %769 = vperm.xlu0 %1242, %v763_v13   ;;  %779 = vperm.xlu1 %1243, %v765_v18   ;;  %v766_v20 = vld [vmem:[%s1513_s4 + $0x18] sm:$0xff]  ;;  %s1215_s18 = sshll.u32 %s1524_s24, 7  ;;  %s1161_s22 = sshll.u32 %s1524_s24, 2 }
  0x10   : > { %409 = vst [vmem:[#allocation1] ss:$4 sm:$0xff] %v407_v0  ;;  %v401_v1 = vld [vmem:[%s357_s12] sm:$0x77]  ;;  %v398_v21 = vld [vmem:[%s1511_s2 + $0x8] sm:$0xff]  ;;  %v399_v22 = vld [vmem:[%s1511_s2 + $0x10] sm:$0xff]  ;;  %s1442_s21 = scalar_lea.vmem %s1514_s5, %s1215_s18  ;;  %s386_s29 = scalar_lea.vmem %s1515_s6, %s1161_s22 }
  0x11   : > { %v400_v23 = vld [vmem:[%s1511_s2 + $0x18] sm:$0xff]  ;;  %s395_s8 = scalar_lea.vmem %s1516_s7, %s1161_s22 }
  0x17   : > { %v410_v4 = vld.sshfl [vmem:[#allocation1] sm:$0xff pattern:$0x73625140]  ;;  %v411_v5 = vld.sshfl [vmem:[#allocation1 + $0x8] sm:$0xff pattern:$0x73625140]  ;;  %774 = vperm.xlu0 %1242, %v764_v16   ;;  %784 = vperm.xlu1 %1243, %v766_v20  }
  0x18   : > { %1163 = vmatpush.msk.msra.mxu0 %vm427_vm0, %v410_v4  ;;  %1168 = vmatpush.msk.msra.mxu1 %vm427_vm0, %v411_v5  ;;  %554 = vst [vmem:[#allocation1] ss:$2 sm:$0xff] %v401_v1  ;;  %v412_v6 = vld.sshfl [vmem:[#allocation1 + $0x10] sm:$0xff pattern:$0x73625140] }
  0x19   : > { %1173 = vmatpush.msk.msra.mxu2 %vm427_vm0, %v412_v6  ;;  %v413_v7 = vld.sshfl [vmem:[#allocation1 + $0x18] sm:$0xff pattern:$0x73625140]  ;;  %1164 = vmatmul.msk.f32.vlgmr.msra.gmra.mxu0 %vm414_vm1, %v403_v3 }
  0x1a   : > { %1178 = vmatpush.msk.msra.mxu3 %vm427_vm0, %v413_v7  ;;  %556 = vst [vmem:[#allocation1 + $0x10] ss:$2 sm:$0xff] %v402_v2  ;;  %1169 = vmatmul.msk.f32.vlgmr.msra.gmra.mxu1 %vm414_vm1, %v403_v3 }
  0x1b   : > { %1174 = vmatmul.msk.f32.vlgmr.msra.gmra.mxu2 %vm414_vm1, %v403_v3  ;;  %1179 = vmatmul.msk.f32.vlgmr.msra.gmra.mxu3 %vm414_vm1, %v403_v3 }
  0x1f   : > { %v558_v9 = vld.sshfl [vmem:[#allocation1 + $0x8] sm:$0xff pattern:$0x75316420]  ;;  %v557_v10 = vld.sshfl [vmem:[#allocation1] sm:$0xff pattern:$0x75316420] }
  0x20   : > { %1188 = vmatpush.msk.msrb.mxu1 %vm574_vm2, %v558_v9  ;;  %1183 = vmatpush.msk.msrb.mxu0 %vm574_vm2, %v557_v10 }
  0x21   : > { %v559_v11 = vld.sshfl [vmem:[#allocation1 + $0x10] sm:$0xff pattern:$0x75316420]  ;;  %v560_v12 = vld.sshfl [vmem:[#allocation1 + $0x18] sm:$0xff pattern:$0x75316420]  ;;  %1165 = vmatmul.msk.f32.gmra.mxu0 %vm414_vm1, %v404_v8 }
  0x22   : > { %1193 = vmatpush.msk.msrb.mxu2 %vm574_vm2, %v559_v11  ;;  %1198 = vmatpush.msk.msrb.mxu3 %vm574_vm2, %v560_v12 }
  0x23   : > { %1170 = vmatmul.msk.f32.gmra.mxu1 %vm414_vm1, %v404_v8  ;;  %1175 = vmatmul.msk.f32.gmra.mxu2 %vm414_vm1, %v404_v8 }
  0x24   : > { %1180 = vmatmul.msk.f32.gmra.mxu3 %vm414_vm1, %v404_v8 }
  0x29   : > { %1166 = vmatmul.msk.f32.gmra.mxu0 %vm414_vm1, %v405_v15 }
  0x2b   : > { %1171 = vmatmul.msk.f32.gmra.mxu1 %vm414_vm1, %v405_v15  ;;  %1176 = vmatmul.msk.f32.gmra.mxu2 %vm414_vm1, %v405_v15 }
  0x2c   : > { %1181 = vmatmul.msk.f32.gmra.mxu3 %vm414_vm1, %v405_v15 }
  0x31   : > { %1167 = vmatmul.msk.f32.gmra.mxu0 %vm414_vm1, %v406_v17 }
  0x33   : > { %1172 = vmatmul.msk.f32.gmra.mxu1 %vm414_vm1, %v406_v17  ;;  %1177 = vmatmul.msk.f32.gmra.mxu2 %vm414_vm1, %v406_v17 }
  0x34   : > { %1182 = vmatmul.msk.f32.gmra.mxu3 %vm414_vm1, %v406_v17 }
  0x39   : > { %1184 = vmatmul.msk.f32.vlgmr.msrb.gmra.mxu0 %vm561_vm3, %v397_v19 }
  0x3b   : > { %1189 = vmatmul.msk.f32.vlgmr.msrb.gmra.mxu1 %vm561_vm3, %v397_v19  ;;  %1194 = vmatmul.msk.f32.vlgmr.msrb.gmra.mxu2 %vm561_vm3, %v397_v19 }
  0x3c   : > { %1199 = vmatmul.msk.f32.vlgmr.msrb.gmra.mxu3 %vm561_vm3, %v397_v19 }
  0x41   : > { %1185 = vmatmul.msk.f32.gmra.mxu0 %vm561_vm3, %v398_v21 }
  0x43   : > { %1190 = vmatmul.msk.f32.gmra.mxu1 %vm561_vm3, %v398_v21  ;;  %1195 = vmatmul.msk.f32.gmra.mxu2 %vm561_vm3, %v398_v21 }
  0x44   : > { %1200 = vmatmul.msk.f32.gmra.mxu3 %vm561_vm3, %v398_v21 }
  0x49   : > { %1186 = vmatmul.msk.f32.gmra.mxu0 %vm561_vm3, %v399_v22 }
  0x4b   : > { %1191 = vmatmul.msk.f32.gmra.mxu1 %vm561_vm3, %v399_v22  ;;  %1196 = vmatmul.msk.f32.gmra.mxu2 %vm561_vm3, %v399_v22 }
  0x4c   : > { %1201 = vmatmul.msk.f32.gmra.mxu3 %vm561_vm3, %v399_v22 }
  0x51   : > { %1187 = vmatmul.msk.f32.gmra.mxu0 %vm561_vm3, %v400_v23 }
  0x53   : > { %1192 = vmatmul.msk.f32.gmra.mxu1 %vm561_vm3, %v400_v23  ;;  %1197 = vmatmul.msk.f32.gmra.mxu2 %vm561_vm3, %v400_v23 }
  0x54   : > { %1202 = vmatmul.msk.f32.gmra.mxu3 %vm561_vm3, %v400_v23 }
  0x81   : > { %v1446_v57 = vpop.permute.xlu0 %769  ;;  %v780_v12 = vpop.permute.xlu1 %779 }
  0x89   : > { %v775_v15 = vpop.permute.xlu0 %774 }
  0x96   : > { %v453_v24 = vpop.f32.mrf.mxu0 }
  0x97   : > { %v482_v25 = vpop.f32.mrf.mxu1 }
  0x9e   : > { %v511_v26 = vpop.f32.mrf.mxu2  ;;  %v540_v27 = vpop.f32.mrf.mxu3 }
  0x9f   : > { %v456_v28 = vpop.f32.mrf.mxu0 }
  0xa0   : > { %v485_v29 = vpop.f32.mrf.mxu1 }
  0xa6   : > { %v514_v30 = vpop.f32.mrf.mxu2 }
  0xa7   : > { %v543_v31 = vpop.f32.mrf.mxu3  ;;  %v459_v32 = vpop.f32.mrf.mxu0 }
  0xa8   : > { %v488_v33 = vpop.f32.mrf.mxu1 }
  0xae   : > { %v1426_v34 = vpop.f32.mrf.mxu2 }
  0xaf   : > { %v1428_v35 = vpop.f32.mrf.mxu3  ;;  %v1430_v36 = vpop.f32.mrf.mxu0 }
  0xb0   : > { %v1432_v37 = vpop.f32.mrf.mxu1 }
  0xb6   : > { %v1434_v38 = vpop.f32.mrf.mxu2 }
  0xb7   : > { %v1437_v39 = vpop.f32.mrf.mxu3  ;;  %v600_v40 = vpop.f32.mrf.mxu0 }
  0xb8   : > { %v601_v41 = vadd.f32 %v600_v40, %v453_v24  ;;  %v629_v42 = vpop.f32.mrf.mxu1 }
  0xb9   : > { %v630_v43 = vadd.f32 %v629_v42, %v482_v25 }
  0xba   : > { %vm699_vm4 = vcmp.gt.f32.partialorder %v601_v41, 0.0  ;;  %v715_v44 = vmul.f32 0.01, %v601_v41 }
  0xbb   : > { %vm700_vm5 = vcmp.gt.f32.partialorder %v630_v43, 0.0  ;;  %v716_v45 = vmul.f32 0.01, %v630_v43 }
  0xbc   : > { %v731_v46 = vsel %vm699_vm4, %v601_v41, %v715_v44  ;;  %v785_v44 = vpop.permute.xlu1 %784 }
  0xbd   : > { %747 = vst [vmem:[%s1442_s21] sm:$0xff] %v731_v46  ;;  %v732_v47 = vsel %vm700_vm5, %v630_v43, %v716_v45  ;;  %v787_v20 = vmul.f32 %v1446_v57, %v731_v46 }
  0xbe   : > { %748 = vst [vmem:[%s1442_s21 + $0x8] sm:$0xff] %v732_v47  ;;  %v658_v48 = vpop.f32.mrf.mxu2  ;;  %v788_v21 = vmul.f32 %v1446_v57, %v732_v47 }
  0xbf   : > { %v659_v49 = vadd.f32 %v658_v48, %v511_v26  ;;  %v687_v50 = vpop.f32.mrf.mxu3  ;;  %v603_v51 = vpop.f32.mrf.mxu0 }
  0xc0   : > { %v688_v52 = vadd.f32 %v687_v50, %v540_v27  ;;  %v604_v53 = vadd.f32 %v603_v51, %v456_v28  ;;  %v632_v54 = vpop.f32.mrf.mxu1 }
  0xc1   : > { %vm701_vm6 = vcmp.gt.f32.partialorder %v659_v49, 0.0  ;;  %v717_v55 = vmul.f32 0.01, %v659_v49  ;;  %v633_v56 = vadd.f32 %v632_v54, %v485_v29 }
  0xc2   : > { %vm702_vm7 = vcmp.gt.f32.partialorder %v688_v52, 0.0  ;;  %v718_v58 = vmul.f32 0.01, %v688_v52  ;;  %vm703_vm8 = vcmp.gt.f32.partialorder %v604_v53, 0.0  ;;  %v719_v59 = vmul.f32 0.01, %v604_v53 }
  0xc3   : > { %v1448_v60 = vsel %vm701_vm6, %v659_v49, %v717_v55  ;;  %vm704_vm9 = vcmp.gt.f32.partialorder %v633_v56, 0.0  ;;  %v720_v61 = vmul.f32 0.01, %v633_v56 }
  0xc4   : > { %749 = vst [vmem:[%s1442_s21 + $0x10] sm:$0xff] %v1448_v60  ;;  %v1452_v62 = vsel %vm702_vm7, %v688_v52, %v718_v58  ;;  %v735_v63 = vsel %vm703_vm8, %v604_v53, %v719_v59  ;;  %v789_v52 = vmul.f32 %v1446_v57, %v1448_v60 }
  0xc5   : > { %750 = vst [vmem:[%s1442_s21 + $0x18] sm:$0xff] %v1452_v62  ;;  %v736_v0 = vsel %vm704_vm9, %v633_v56, %v720_v61  ;;  %v791_v22 = vmul.f32 %v775_v15, %v735_v63  ;;  %v790_v58 = vmul.f32 %v1446_v57, %v1452_v62 }
  0xc6   : > { %751 = vst [vmem:[%s1442_s21 + $0x20] sm:$0xff] %v735_v63  ;;  %v661_v1 = vpop.f32.mrf.mxu2  ;;  %v792_v26 = vmul.f32 %v775_v15, %v736_v0 }
  0xc7   : > { %752 = vst [vmem:[%s1442_s21 + $0x28] sm:$0xff] %v736_v0  ;;  %v662_v2 = vadd.f32 %v661_v1, %v514_v30  ;;  %v690_v3 = vpop.f32.mrf.mxu3  ;;  %v606_v4 = vpop.f32.mrf.mxu0  ;;  %v803_v41 = vadd.f32 %v791_v22, %v787_v20 }
  0xc8   : > { %v691_v5 = vadd.f32 %v690_v3, %v543_v31  ;;  %v607_v6 = vadd.f32 %v606_v4, %v459_v32  ;;  %v635_v7 = vpop.f32.mrf.mxu1 }
  0xc9   : > { %vm705_vm10 = vcmp.gt.f32.partialorder %v662_v2, 0.0  ;;  %v721_v8 = vmul.f32 0.01, %v662_v2  ;;  %v636_v9 = vadd.f32 %v635_v7, %v488_v33 }
  0xca   : > { %vm706_vm11 = vcmp.gt.f32.partialorder %v691_v5, 0.0  ;;  %v722_v10 = vmul.f32 0.01, %v691_v5  ;;  %vm707_vm12 = vcmp.gt.f32.partialorder %v607_v6, 0.0  ;;  %v723_v11 = vmul.f32 0.01, %v607_v6 }
  0xcb   : > { %v737_v13 = vsel %vm705_vm10, %v662_v2, %v721_v8  ;;  %vm708_vm13 = vcmp.gt.f32.partialorder %v636_v9, 0.0  ;;  %v724_v14 = vmul.f32 0.01, %v636_v9 }
  0xcc   : > { %753 = vst [vmem:[%s1442_s21 + $0x30] sm:$0xff] %v737_v13  ;;  %v738_v16 = vsel %vm706_vm11, %v691_v5, %v722_v10  ;;  %v739_v17 = vsel %vm707_vm12, %v607_v6, %v723_v11 }
  0xcd   : > { %754 = vst [vmem:[%s1442_s21 + $0x38] sm:$0xff] %v738_v16  ;;  %v740_v18 = vsel %vm708_vm13, %v636_v9, %v724_v14  ;;  %v795_v27 = vmul.f32 %v780_v12, %v739_v17  ;;  %v794_v53 = vmul.f32 %v775_v15, %v738_v16 }
  0xce   : > { %755 = vst [vmem:[%s1442_s21 + $0x40] sm:$0xff] %v739_v17  ;;  %v664_v19 = vpop.f32.mrf.mxu2  ;;  %v796_v31 = vmul.f32 %v780_v12, %v740_v18 }
  0xcf   : > { %756 = vst [vmem:[%s1442_s21 + $0x48] sm:$0xff] %v740_v18  ;;  %v665_v23 = vadd.f32 %v664_v19, %v1426_v34  ;;  %v693_v24 = vpop.f32.mrf.mxu3  ;;  %v609_v25 = vpop.f32.mrf.mxu0  ;;  %v804_v48 = vadd.f32 %v803_v41, %v795_v27  ;;  %v830_v5 = vadd.f32 %v794_v53, %v790_v58 }
  0xd0   : > { %v694_v28 = vadd.f32 %v693_v24, %v1428_v35  ;;  %v610_v29 = vadd.f32 %v609_v25, %v1430_v36  ;;  %v638_v30 = vpop.f32.mrf.mxu1  ;;  %v812_v35 = vadd.f32 %v792_v26, %v788_v21 }
  0xd1   : > { %vm709_vm14 = vcmp.gt.f32.partialorder %v665_v23, 0.0  ;;  %v725_v32 = vmul.f32 0.01, %v665_v23  ;;  %v639_v33 = vadd.f32 %v638_v30, %v1432_v37  ;;  %v793_v37 = vmul.f32 %v775_v15, %v737_v13 }
  0xd2   : > { %vm710_vm15 = vcmp.gt.f32.partialorder %v694_v28, 0.0  ;;  %v726_v40 = vmul.f32 0.01, %v694_v28  ;;  %vm711_vm1 = vcmp.gt.f32.partialorder %v610_v29, 0.0  ;;  %v727_v34 = vmul.f32 0.01, %v610_v29 }
  0xd3   : > { %v741_v42 = vsel %vm709_vm14, %v665_v23, %v725_v32  ;;  %vm712_vm2 = vcmp.gt.f32.partialorder %v639_v33, 0.0  ;;  %v728_v43 = vmul.f32 0.01, %v639_v33  ;;  %v813_v50 = vadd.f32 %v812_v35, %v796_v31 }
  0xd4   : > { %757 = vst [vmem:[%s1442_s21 + $0x50] sm:$0xff] %v741_v42  ;;  %v742_v36 = vsel %vm710_vm15, %v694_v28, %v726_v40  ;;  %v743_v45 = vsel %vm711_vm1, %v610_v29, %v727_v34  ;;  %v797_v59 = vmul.f32 %v780_v12, %v741_v42  ;;  %v821_v60 = vadd.f32 %v793_v37, %v789_v52 }
  0xd5   : > { %758 = vst [vmem:[%s1442_s21 + $0x58] sm:$0xff] %v742_v36  ;;  %v744_v46 = vsel %vm712_vm2, %v639_v33, %v728_v43  ;;  %v799_v47 = vmul.f32 %v785_v44, %v743_v45  ;;  %v798_v0 = vmul.f32 %v780_v12, %v742_v36 }
  0xd6   : > { %759 = vst [vmem:[%s1442_s21 + $0x60] sm:$0xff] %v743_v45  ;;  %v800_v49 = vmul.f32 %v785_v44, %v744_v46  ;;  %v667_v51 = vpop.f32.mrf.mxu2  ;;  %v822_v7 = vadd.f32 %v821_v60, %v797_v59 }
  0xd7   : > { %760 = vst [vmem:[%s1442_s21 + $0x68] sm:$0xff] %v744_v46  ;;  %v805_v54 = vadd.f32 %v804_v48, %v799_v47  ;;  %v668_v55 = vadd.f32 %v667_v51, %v1434_v38  ;;  %v696_v56 = vpop.f32.mrf.mxu3  ;;  %v831_v9 = vadd.f32 %v830_v5, %v798_v0 }
  0xd8   : > { %v814_v61 = vadd.f32 %v813_v50, %v800_v49  ;;  %v697_v63 = vadd.f32 %v696_v56, %v1437_v39 }
  0xd9   : > { %v806_v1 = vrot.slane %v805_v54, 4  ;;  %vm713_vm3 = vcmp.gt.f32.partialorder %v668_v55, 0.0  ;;  %v729_v2 = vmul.f32 0.01, %v668_v55 }
  0xda   : > { %v815_v3 = vrot.slane %v814_v61, 4  ;;  %vm714_vm4 = vcmp.gt.f32.partialorder %v697_v63, 0.0  ;;  %v730_v4 = vmul.f32 0.01, %v697_v63 }
  0xdb   : > { %v807_v38 = vadd.f32 %v806_v1, %v805_v54  ;;  %v745_v6 = vsel %vm713_vm3, %v668_v55, %v729_v2 }
  0xdc   : > { %v816_v8 = vadd.f32 %v815_v3, %v814_v61  ;;  %761 = vst [vmem:[%s1442_s21 + $0x70] sm:$0xff] %v745_v6  ;;  %v801_v57 = vmul.f32 %v785_v44, %v745_v6  ;;  %v746_v62 = vsel %vm714_vm4, %v697_v63, %v730_v4 }
  0xdd   : > { %v808_v10 = vrot.slane %v807_v38, 2  ;;  %762 = vst [vmem:[%s1442_s21 + $0x78] sm:$0xff] %v746_v62  ;;  %v802_v39 = vmul.f32 %v785_v44, %v746_v62 }
  0xde   : > { %v817_v11 = vrot.slane %v816_v8, 2  ;;  %v823_v12 = vadd.f32 %v822_v7, %v801_v57 }
  0xdf   : > { %v809_v13 = vadd.f32 %v808_v10, %v807_v38  ;;  %v832_v14 = vadd.f32 %v831_v9, %v802_v39 }
  0xe0   : > { %v818_v15 = vadd.f32 %v817_v11, %v816_v8  ;;  %v824_v16 = vrot.slane %v823_v12, 4 }
  0xe1   : > { %v810_v17 = vrot.slane %v809_v13, 1  ;;  %v833_v18 = vrot.slane %v832_v14, 4 }
  0xe2   : > { %v819_v19 = vrot.slane %v818_v15, 1  ;;  %v825_v20 = vadd.f32 %v824_v16, %v823_v12 }
  0xe3   : > { %v811_v21 = vadd.f32 %v810_v17, %v809_v13  ;;  %v834_v22 = vadd.f32 %v833_v18, %v832_v14 }
  0xe4   : > { %v820_v23 = vadd.f32 %v819_v19, %v818_v15  ;;  %v826_v24 = vrot.slane %v825_v20, 2  ;;  %v928_v15 = vlaneseq  ;;  %v1285_v19 = vmov 0.0  }
  0xe5   : > { %v1203_v25 = vmul.f32 -1.442695, %v811_v21  ;;  %v835_v26 = vrot.slane %v834_v22, 2 }
  0xe6   : > { %v1204_v27 = vmul.f32 -1.442695, %v820_v23  ;;  %v827_v28 = vadd.f32 %v826_v24, %v825_v20 }
  0xe7   : > { %1244 = vpow2.f32 %v1203_v25  ;;  %v836_v29 = vadd.f32 %v835_v26, %v834_v22 }
  0xe8   : > { %1246 = vpow2.f32 %v1204_v27  ;;  %v828_v30 = vrot.slane %v827_v28, 1 }
  0xe9   : > { %v837_v31 = vrot.slane %v836_v29, 1 }
  0xea   : > { %v829_v32 = vadd.f32 %v828_v30, %v827_v28 }
  0xeb   : > { %v838_v33 = vadd.f32 %v837_v31, %v836_v29 }
  0xec   : > { %v1205_v40 = vmul.f32 -1.442695, %v829_v32 }
  0xed   : > { %v1245_v34 = vpop.eup %1244  ;;  %v1206_v41 = vmul.f32 -1.442695, %v838_v33 }
  0xee   : > { %v1247_v42 = vpop.eup %1246  ;;  %v851_v43 = vadd.f32 1.0, %v1245_v34  ;;  %1248 = vpow2.f32 %v1205_v40 }
  0xef   : > { %v852_v35 = vadd.f32 1.0, %v1247_v42  ;;  %1250 = vpow2.f32 %v1206_v41 }
  0xf0   : > { %1252 = vrcp.f32 %v851_v43  ;;  %v866_v63 = vand.u32 2147483648, %v851_v43  ;;  %vm860_vm9 = vweird.f32 %v851_v43  ;;  %v864_v4 = vand.u32 2147483647, %v851_v43 }
  0xf1   : > { %1254 = vrcp.f32 %v852_v35  ;;  %v881_v52 = vand.u32 2147483648, %v852_v35  ;;  %v879_v56 = vand.u32 2147483647, %v852_v35  ;;  %vm875_vm6 = vweird.f32 %v852_v35 }
  0xf2   : > { %v867_v57 = vor.u32 1.1754944e-38, %v866_v63  ;;  %vm865_vm2 = vcmp.eq.f32.partialorder %v864_v4, 8.507059e+37 }
  0xf3   : > { %v882_v0 = vor.u32 1.1754944e-38, %v881_v52  ;;  %vm880_vm10 = vcmp.eq.f32.partialorder %v879_v56, 8.507059e+37 }
  0xf4   : > { %v1249_v36 = vpop.eup %1248 }
  0xf5   : > { %v1251_v44 = vpop.eup %1250  ;;  %v853_v45 = vadd.f32 1.0, %v1249_v36 }
  0xf6   : > { %v1253_v46 = vpop.eup %1252  ;;  %v854_v47 = vadd.f32 1.0, %v1251_v44 }
  0xf7   : > { %v1255_v48 = vpop.eup %1254  ;;  %v856_v37 = vmul.f32 %v1253_v46, %v851_v43  ;;  %1256 = vrcp.f32 %v853_v45  ;;  %vm861_vm7 = vweird.f32 %v1253_v46  ;;  %v896_v5 = vand.u32 2147483648, %v853_v45 }
  0xf8   : > { %v871_v49 = vmul.f32 %v1255_v48, %v852_v35  ;;  %1258 = vrcp.f32 %v854_v47  ;;  %vm876_vm5 = vweird.f32 %v1255_v48  ;;  %v894_v7 = vand.u32 2147483647, %v853_v45  ;;  %vm1481_vm12 = vmor %vm860_vm9, %vm861_vm7 }
  0xf9   : > { %v857_v50 = vsub.f32 1.0, %v856_v37  ;;  %vm877_vm8 = vmor %vm875_vm6, %vm876_vm5  ;;  %vm890_vm13 = vweird.f32 %v853_v45  ;;  %v909_v39 = vand.u32 2147483647, %v854_v47  ;;  %v911_v11 = vand.u32 2147483648, %v854_v47 }
  0xfa   : > { %v872_v51 = vsub.f32 1.0, %v871_v49  ;;  %v897_v12 = vor.u32 1.1754944e-38, %v896_v5  ;;  %vm895_vm3 = vcmp.eq.f32.partialorder %v894_v7, 8.507059e+37  ;;  %vm905_vm4 = vweird.f32 %v854_v47 }
  0xfb   : > { %v858_v53 = vmul.f32 %v1253_v46, %v857_v50  ;;  %vm910_vm7 = vcmp.eq.f32.partialorder %v909_v39, 8.507059e+37  ;;  %v912_v21 = vor.u32 1.1754944e-38, %v911_v11 }
  0xfc   : > { %v873_v54 = vmul.f32 %v1255_v48, %v872_v51 }
  0xfd   : > { %v1257_v55 = vpop.eup %1256  ;;  %v859_v1 = vadd.f32 %v1253_v46, %v858_v53 }
  0xfe   : > { %v874_v58 = vadd.f32 %v1255_v48, %v873_v54  ;;  %v886_v59 = vmul.f32 %v1257_v55, %v853_v45  ;;  %v1259_v61 = vpop.eup %1258  ;;  %vm891_vm11 = vweird.f32 %v1257_v55 }
  0xff   : > { %v901_v3 = vmul.f32 %v1259_v61, %v854_v47  ;;  %v863_v9 = vsel %vm1481_vm12, %v1253_v46, %v859_v1  ;;  %vm892_vm15 = vmor %vm890_vm13, %vm891_vm11  ;;  %vm906_vm1 = vweird.f32 %v1259_v61  ;;  %vm930_vm12 = vcmp.lt.s32.totalorder %v928_v15, 512 }
 0x100   : > { %v878_v2 = vsel %vm877_vm8, %v1255_v48, %v874_v58  ;;  %v887_v60 = vsub.f32 1.0, %v886_v59  ;;  %v868_v16 = vsel %vm865_vm2, %v867_v57, %v863_v9  ;;  %vm907_vm6 = vmor %vm905_vm4, %vm906_vm1  ;;  %vm922_vm8 = vcmask 1040384  }
 0x101   : > { %v883_v38 = vsel %vm880_vm10, %v882_v0, %v878_v2  ;;  %v902_v62 = vsub.f32 1.0, %v901_v3  ;;  %vm933_vm9 = vcmp.gt.f32.partialorder %v868_v16, 0.5  ;;  %vm924_vm10 = vcmask 1042434  }
 0x102   : > { %v888_v6 = vmul.f32 %v1257_v55, %v887_v60  ;;  %vm934_vm14 = vcmp.gt.f32.partialorder %v883_v38, 0.5  ;;  %v919_v22 = vrot.slane %v883_v38, 7  ;;  %v1207_v40 = vsel %vm933_vm9, 1.0, %v1285_v19 }
 0x103   : > { %v903_v13 = vmul.f32 %v1259_v61, %v902_v62  ;;  %v1208_v20 = vsel %vm934_vm14, 1.0, %v1285_v19 }
 0x104   : > { %v889_v10 = vadd.f32 %v1257_v55, %v888_v6  ;;  %v949_v27 = vrot.slane %v1208_v20, 7  ;;  %v923_v31 = vsel %vm922_vm8, %v868_v16, %v919_v22 }
 0x105   : > { %v904_v18 = vadd.f32 %v1259_v61, %v903_v13 }
 0x106   : > { %v893_v14 = vsel %vm892_vm15, %v1257_v55, %v889_v10  ;;  %v952_v41 = vsel %vm922_vm8, %v1207_v40, %v949_v27 }
 0x107   : > { %v898_v17 = vsel %vm895_vm3, %v897_v12, %v893_v14  ;;  %v908_v25 = vsel %vm907_vm6, %v1259_v61, %v904_v18 }
 0x108   : > { %vm935_vm5 = vcmp.gt.f32.partialorder %v898_v17, 0.5  ;;  %v920_v23 = vrot.slane %v898_v17, 6  ;;  %v913_v26 = vsel %vm910_vm7, %v912_v21, %v908_v25 }
 0x109   : > { %v1209_v24 = vsel %vm935_vm5, 1.0, %v1285_v19  ;;  %v921_v29 = vrot.slane %v913_v26, 5  ;;  %vm936_vm11 = vcmp.gt.f32.partialorder %v913_v26, 0.5 }
 0x10a   : > { %v950_v28 = vrot.slane %v1209_v24, 6  ;;  %v1210_v30 = vsel %vm936_vm11, 1.0, %v1285_v19 }
 0x10b   : > { %v925_v32 = vsel %vm924_vm10, %v920_v23, %v921_v29  ;;  %v951_v33 = vrot.slane %v1210_v30, 5 }
 0x10c   : > { %v926_v34 = vsel %vm427_vm0, %v923_v31, %v925_v32 }
 0x10d   : > { %932 = vst.msk [vmem:[%s386_s29] sm:$0xf] %vm930_vm12, %v926_v34  ;;  %v953_v42 = vsel %vm924_vm10, %v950_v28, %v951_v33 }
 0x10e   : > { %v954_v43 = vsel %vm427_vm0, %v952_v41, %v953_v42 }
 0x10f   : > { %956 = vst.msk [vmem:[%s395_s8] sm:$0xf] %vm930_vm12, %v954_v43 }
 0x110 PF: > { %s18_s26 = sadd.s32 1, %s1282_s26   ;;  %s1519_s24 = smov %s1278_s25 }
 0x111   : > { %p15_p5 = scmp.ge.s32.totalorder %s18_s26, 6   ;;  %s1520_s25 = smov %s1522_s27 }
 0x113   :  { %17 = sbr.rel (!%p15_p5) target bundleno = 2 (0x2), region = 98 }

// kernel: dense_trajectory_forward.4
= control target key start
LH: loop header
LB: loop body
LE: loop exit
PB: predicated region body
PF: predicated region fallthrough
CT: control target
= control target key end

     0   :  { %vm41_vm0 = vcmask 261120   ;;  %s1266_s0 = inlined_call_operand.vmem [shape: f32[4,32,512], index: 0, kind: input, shape index: {}]   ;;  %s1267_s3 = inlined_call_operand.vmem [shape: f32[32,32], index: 3, kind: input, shape index: {}]   ;;  %s1268_s4 = inlined_call_operand.vmem [shape: f32[72,512], index: 4, kind: output, shape index: {}]   ;;  %s1269_s2 = inlined_call_operand.vmem [shape: f32[2,512], index: 2, kind: input, shape index: {}]   ;;  %s1270_s1 = inlined_call_operand.vmem [shape: f32[4,5,512], index: 1, kind: input, shape index: {}]  }
   0x1   :  { %v716_v0 = vld [vmem:[%s1266_s0 + $0x60] sm:$0xff]  ;;  %v722_v1 = vld [vmem:[%s1266_s0 + $0x68] sm:$0xff]  ;;  %v728_v2 = vld [vmem:[%s1266_s0 + $0x70] sm:$0xff] }
   0x2   :  { %66 = vmatpush.msra.mxu0 %v716_v0  ;;  %95 = vmatpush.msra.mxu1 %v722_v1  ;;  %v733_v3 = vld [vmem:[%s1266_s0 + $0x78] sm:$0xff]  ;;  %v738_v4 = vld [vmem:[%s1266_s0 + $0x40] sm:$0xff]  ;;  %v745_v5 = vld [vmem:[%s1266_s0 + $0x48] sm:$0xff] }
   0x3   :  { %124 = vmatpush.msra.mxu2 %v728_v2  ;;  %153 = vmatpush.msra.mxu3 %v733_v3  ;;  %v750_v6 = vld [vmem:[%s1266_s0 + $0x50] sm:$0xff]  ;;  %v755_v7 = vld [vmem:[%s1266_s0 + $0x58] sm:$0xff]  ;;  %v762_v8 = vld [vmem:[%s1266_s0 + $0x20] sm:$0xff] }
   0x4   :  { %67 = vmatpush.msra.mxu0 %v738_v4  ;;  %96 = vmatpush.msra.mxu1 %v745_v5  ;;  %v767_v9 = vld [vmem:[%s1266_s0 + $0x28] sm:$0xff]  ;;  %v772_v10 = vld [vmem:[%s1266_s0 + $0x30] sm:$0xff]  ;;  %v779_v11 = vld [vmem:[%s1266_s0 + $0x38] sm:$0xff] }
   0x5   :  { %125 = vmatpush.msra.mxu2 %v750_v6  ;;  %154 = vmatpush.msra.mxu3 %v755_v7  ;;  %v784_v12 = vld [vmem:[%s1266_s0] sm:$0xff]  ;;  %v789_v13 = vld [vmem:[%s1266_s0 + $0x8] sm:$0xff]  ;;  %v796_v14 = vld [vmem:[%s1266_s0 + $0x10] sm:$0xff] }
   0x6   :  { %68 = vmatpush.msra.mxu0 %v762_v8  ;;  %97 = vmatpush.msra.mxu1 %v767_v9  ;;  %v801_v15 = vld [vmem:[%s1266_s0 + $0x18] sm:$0xff]  ;;  %v37_v16 = vld [vmem:[%s1267_s3] sm:$0xff]  ;;  %v38_v17 = vld [vmem:[%s1267_s3 + $0x8] sm:$0xff] }
   0x7   :  { %126 = vmatpush.msra.mxu2 %v772_v10  ;;  %155 = vmatpush.msra.mxu3 %v779_v11  ;;  %v39_v18 = vld [vmem:[%s1267_s3 + $0x10] sm:$0xff]  ;;  %v40_v19 = vld [vmem:[%s1267_s3 + $0x18] sm:$0xff] }
   0x8   :  { %69 = vmatpush.msra.mxu0 %v784_v12  ;;  %98 = vmatpush.msra.mxu1 %v789_v13 }
   0x9   :  { %127 = vmatpush.msra.mxu2 %v796_v14  ;;  %156 = vmatpush.msra.mxu3 %v801_v15 }
   0xa   :  { %588 = vmatmul.msk.f32.vlgmr.msra.gmra.mxu0 %vm41_vm0, %v37_v16  ;;  %592 = vmatmul.msk.f32.vlgmr.msra.gmra.mxu1 %vm41_vm0, %v37_v16 }
   0xb   :  { %596 = vmatmul.msk.f32.vlgmr.msra.gmra.mxu2 %vm41_vm0, %v37_v16  ;;  %600 = vmatmul.msk.f32.vlgmr.msra.gmra.mxu3 %vm41_vm0, %v37_v16 }
  0x12   :  { %589 = vmatmul.msk.f32.gmra.mxu0 %vm41_vm0, %v38_v17  ;;  %593 = vmatmul.msk.f32.gmra.mxu1 %vm41_vm0, %v38_v17 }
  0x13   :  { %597 = vmatmul.msk.f32.gmra.mxu2 %vm41_vm0, %v38_v17  ;;  %601 = vmatmul.msk.f32.gmra.mxu3 %vm41_vm0, %v38_v17 }
  0x1a   :  { %590 = vmatmul.msk.f32.gmra.mxu0 %vm41_vm0, %v39_v18  ;;  %594 = vmatmul.msk.f32.gmra.mxu1 %vm41_vm0, %v39_v18 }
  0x1b   :  { %598 = vmatmul.msk.f32.gmra.mxu2 %vm41_vm0, %v39_v18  ;;  %602 = vmatmul.msk.f32.gmra.mxu3 %vm41_vm0, %v39_v18 }
  0x22   :  { %591 = vmatmul.msk.f32.gmra.mxu0 %vm41_vm0, %v40_v19  ;;  %595 = vmatmul.msk.f32.gmra.mxu1 %vm41_vm0, %v40_v19 }
  0x23   :  { %599 = vmatmul.msk.f32.gmra.mxu2 %vm41_vm0, %v40_v19  ;;  %603 = vmatmul.msk.f32.gmra.mxu3 %vm41_vm0, %v40_v19 }
  0x87   :  { %v71_v20 = vpop.f32.mrf.mxu0  ;;  %v100_v21 = vpop.f32.mrf.mxu1 }
  0x88   :  { %v604_v22 = vmul.f32 -1.442695, %v71_v20  ;;  %v605_v23 = vmul.f32 -1.442695, %v100_v21 }
  0x8a   :  { %623 = vpow2.f32 %v604_v22 }
  0x8b   :  { %625 = vpow2.f32 %v605_v23 }
  0x8e   :  { %v129_v24 = vpop.f32.mrf.mxu2  ;;  %v158_v25 = vpop.f32.mrf.mxu3 }
  0x8f   :  { %v606_v26 = vmul.f32 -1.442695, %v129_v24  ;;  %v607_v27 = vmul.f32 -1.442695, %v158_v25  ;;  %v74_v28 = vpop.f32.mrf.mxu0  ;;  %v103_v29 = vpop.f32.mrf.mxu1 }
  0x90   :  { %v624_v30 = vpop.eup %623  ;;  %v608_v33 = vmul.f32 -1.442695, %v74_v28  ;;  %v609_v35 = vmul.f32 -1.442695, %v103_v29 }
  0x91   :  { %v626_v31 = vpop.eup %625  ;;  %v218_v32 = vadd.f32 1.0, %v624_v30  ;;  %627 = vpow2.f32 %v606_v26 }
  0x92   :  { %v219_v34 = vadd.f32 1.0, %v626_v31  ;;  %629 = vpow2.f32 %v607_v27 }
  0x93   :  { %631 = vrcp.f32 %v218_v32  ;;  %v243_v38 = vand.u32 2147483647, %v218_v32  ;;  %v245_v39 = vand.u32 2147483648, %v218_v32  ;;  %vm239_vm1 = vweird.f32 %v218_v32 }
  0x94   :  { %633 = vrcp.f32 %v219_v34  ;;  %v258_v41 = vand.u32 2147483647, %v219_v34  ;;  %v260_v42 = vand.u32 2147483648, %v219_v34  ;;  %vm254_vm2 = vweird.f32 %v219_v34 }
  0x95   :  { %635 = vpow2.f32 %v608_v33  ;;  %vm842_vm3 = vcmp.eq.f32.partialorder %v243_v38, 8.507059e+37  ;;  %v246_v53 = vor.u32 1.1754944e-38, %v245_v39 }
  0x96   :  { %637 = vpow2.f32 %v609_v35  ;;  %v132_v36 = vpop.f32.mrf.mxu2  ;;  %v161_v44 = vpop.f32.mrf.mxu3  ;;  %vm846_vm4 = vcmp.eq.f32.partialorder %v258_v41, 8.507059e+37  ;;  %v261_v59 = vor.u32 1.1754944e-38, %v260_v42 }
  0x97   :  { %v628_v37 = vpop.eup %627  ;;  %v610_v47 = vmul.f32 -1.442695, %v132_v36  ;;  %v77_v50 = vpop.f32.mrf.mxu0  ;;  %v611_v55 = vmul.f32 -1.442695, %v161_v44 }
  0x98   :  { %v630_v40 = vpop.eup %629  ;;  %v837_v43 = vadd.f32 1.0, %v628_v37  ;;  %v106_v60 = vpop.f32.mrf.mxu1  ;;  %v612_v62 = vmul.f32 -1.442695, %v77_v50 }
  0x99   :  { %v632_v45 = vpop.eup %631  ;;  %v839_v46 = vadd.f32 1.0, %v630_v40  ;;  %v856_v20 = vmul.f32 -1.442695, %v106_v60 }
  0x9a   :  { %v634_v48 = vpop.eup %633  ;;  %v235_v49 = vmul.f32 %v632_v45, %v218_v32  ;;  %639 = vrcp.f32 %v837_v43  ;;  %vm240_vm5 = vweird.f32 %v632_v45  ;;  %v273_v16 = vand.u32 2147483647, %v837_v43 }
  0x9b   :  { %v636_v51 = vpop.eup %635  ;;  %v250_v54 = vmul.f32 %v634_v48, %v219_v34  ;;  %641 = vrcp.f32 %v839_v46  ;;  %vm255_vm6 = vweird.f32 %v634_v48  ;;  %v275_v23 = vand.u32 2147483648, %v837_v43  ;;  %vm241_vm7 = vmor %vm239_vm1, %vm240_vm5 }
  0x9c   :  { %v638_v56 = vpop.eup %637  ;;  %v236_v57 = vsub.f32 1.0, %v235_v49  ;;  %643 = vpow2.f32 %v610_v47  ;;  %v852_v17 = vadd.f32 1.0, %v636_v51  ;;  %v288_v24 = vand.u32 2147483647, %v839_v46  ;;  %vm256_vm10 = vmor %vm254_vm2, %vm255_vm6 }
  0x9d   :  { %v251_v61 = vsub.f32 1.0, %v250_v54  ;;  %v854_v18 = vadd.f32 1.0, %v638_v56  ;;  %645 = vpow2.f32 %v611_v55  ;;  %vm269_vm8 = vweird.f32 %v837_v43 }
  0x9e   :  { %v237_v63 = vmul.f32 %v632_v45, %v236_v57  ;;  %647 = vrcp.f32 %v852_v17  ;;  %vm284_vm9 = vweird.f32 %v839_v46  ;;  %vm868_vm11 = vcmp.eq.f32.partialorder %v273_v16, 8.507059e+37  ;;  %v135_v37 = vpop.f32.mrf.mxu2 }
  0x9f   :  { %v252_v19 = vmul.f32 %v634_v48, %v251_v61  ;;  %v290_v30 = vand.u32 2147483648, %v839_v46  ;;  %649 = vrcp.f32 %v854_v18  ;;  %v276_v39 = vor.u32 1.1754944e-38, %v275_v23 }
  0xa0   :  { %v640_v21 = vpop.eup %639  ;;  %v238_v22 = vadd.f32 %v632_v45, %v237_v63  ;;  %vm883_vm12 = vcmp.eq.f32.partialorder %v288_v24, 8.507059e+37  ;;  %651 = vpow2.f32 %v612_v62  ;;  %v614_v49 = vmul.f32 -1.442695, %v135_v37 }
  0xa1   :  { %v253_v25 = vadd.f32 %v634_v48, %v252_v19  ;;  %v265_v26 = vmul.f32 %v640_v21, %v837_v43  ;;  %v642_v27 = vpop.eup %641  ;;  %vm270_vm13 = vweird.f32 %v640_v21  ;;  %v291_v47 = vor.u32 1.1754944e-38, %v290_v30 }
  0xa2   :  { %v242_v28 = vsel %vm241_vm7, %v632_v45, %v238_v22  ;;  %v644_v31 = vpop.eup %643  ;;  %v280_v36 = vmul.f32 %v642_v27, %v839_v46  ;;  %vm285_vm14 = vweird.f32 %v642_v27  ;;  %vm271_vm15 = vmor %vm269_vm8, %vm270_vm13  ;;  %vm299_vm0 = vweird.f32 %v852_v17 }
  0xa3   :  { %v247_v32 = vsel %vm842_vm3, %v246_v53, %v242_v28  ;;  %v257_v33 = vsel %vm256_vm10, %v634_v48, %v253_v25  ;;  %v266_v35 = vsub.f32 1.0, %v265_v26  ;;  %v646_v41 = vpop.eup %645  ;;  %v894_v48 = vadd.f32 1.0, %v644_v31  ;;  %vm286_vm1 = vmor %vm284_vm9, %vm285_vm14 }
  0xa4   :  { %v474_v34 = vmul.f32 %v247_v32, %v784_v12  ;;  %506 = vst [vmem:[%s1268_s4 + $0x80] sm:$0xff] %v247_v32  ;;  %v262_v38 = vsel %vm846_vm4, %v261_v59, %v257_v33  ;;  %v281_v44 = vsub.f32 1.0, %v280_v36  ;;  %v648_v45 = vpop.eup %647  ;;  %v303_v53 = vand.u32 2147483647, %v852_v17 }
  0xa5   :  { %v475_v42 = vmul.f32 %v262_v38, %v789_v13  ;;  %507 = vst [vmem:[%s1268_s4 + $0x88] sm:$0xff] %v262_v38  ;;  %v267_v12 = vmul.f32 %v640_v21, %v266_v35  ;;  %v295_v51 = vmul.f32 %v648_v45, %v852_v17  ;;  %v650_v52 = vpop.eup %649  ;;  %653 = vrcp.f32 %v894_v48  ;;  %v164_v35 = vpop.f32.mrf.mxu3 }
  0xa6   :  { %490 = vst [vmem:[%s1268_s4] sm:$0xff] %v474_v34  ;;  %v282_v50 = vmul.f32 %v642_v27, %v281_v44  ;;  %v905_v54 = vadd.f32 1.0, %v646_v41  ;;  %v310_v58 = vmul.f32 %v650_v52, %v854_v18  ;;  %vm300_vm2 = vweird.f32 %v648_v45  ;;  %v652_v19 = vpop.eup %651 }
  0xa7   :  { %491 = vst [vmem:[%s1268_s4 + $0x8] sm:$0xff] %v475_v42  ;;  %v268_v13 = vadd.f32 %v640_v21, %v267_v12  ;;  %v296_v57 = vsub.f32 1.0, %v295_v51  ;;  %v305_v43 = vand.u32 2147483648, %v852_v17  ;;  %v320_v60 = vand.u32 2147483648, %v854_v18  ;;  %vm301_vm5 = vmor %vm299_vm0, %vm300_vm2 }
  0xa8   :  { %v283_v56 = vadd.f32 %v642_v27, %v282_v50  ;;  %v311_v16 = vsub.f32 1.0, %v310_v58  ;;  %vm314_vm3 = vweird.f32 %v854_v18  ;;  %v318_v46 = vand.u32 2147483647, %v854_v18 }
  0xa9   :  { %v272_v55 = vsel %vm271_vm15, %v640_v21, %v268_v13  ;;  %v297_v63 = vmul.f32 %v648_v45, %v296_v57  ;;  %655 = vrcp.f32 %v905_v54  ;;  %vm315_vm4 = vweird.f32 %v650_v52  ;;  %v138_v57 = vpop.f32.mrf.mxu2 }
  0xaa   :  { %v277_v59 = vsel %vm868_vm11, %v276_v39, %v272_v55  ;;  %v287_v62 = vsel %vm286_vm1, %v642_v27, %v283_v56  ;;  %v312_v23 = vmul.f32 %v650_v52, %v311_v16  ;;  %vm304_vm6 = vcmp.eq.f32.partialorder %v303_v53, 8.507059e+37  ;;  %vm316_vm7 = vmor %vm314_vm3, %vm315_vm4  ;;  %v80_v39 = vpop.f32.mrf.mxu0 }
  0xab   :  { %v476_v61 = vmul.f32 %v277_v59, %v796_v14  ;;  %508 = vst [vmem:[%s1268_s4 + $0x90] sm:$0xff] %v277_v59  ;;  %v292_v21 = vsel %vm883_vm12, %v291_v47, %v287_v62  ;;  %v298_v22 = vadd.f32 %v648_v45, %v297_v63  ;;  %v654_v24 = vpop.eup %653  ;;  %v306_v25 = vor.u32 1.1754944e-38, %v305_v43 }
  0xac   :  { %v477_v14 = vmul.f32 %v292_v21, %v801_v15  ;;  %509 = vst [vmem:[%s1268_s4 + $0x98] sm:$0xff] %v292_v21  ;;  %v933_v26 = vadd.f32 1.0, %v652_v19  ;;  %657 = vpow2.f32 %v856_v20  ;;  %v313_v27 = vadd.f32 %v650_v52, %v312_v23 }
  0xad   :  { %492 = vst [vmem:[%s1268_s4 + $0x10] sm:$0xff] %v476_v61  ;;  %v302_v15 = vsel %vm301_vm5, %v648_v45, %v298_v22  ;;  %v321_v28 = vor.u32 1.1754944e-38, %v320_v60  ;;  %v325_v29 = vmul.f32 %v654_v24, %v894_v48  ;;  %v333_v17 = vand.u32 2147483647, %v894_v48  ;;  %v109_v45 = vpop.f32.mrf.mxu1 }
  0xae   :  { %493 = vst [vmem:[%s1268_s4 + $0x18] sm:$0xff] %v477_v14  ;;  %v307_v30 = vsel %vm304_vm6, %v306_v25, %v302_v15  ;;  %v335_v31 = vand.u32 2147483648, %v894_v48  ;;  %659 = vrcp.f32 %v933_v26  ;;  %v317_v32 = vsel %vm316_vm7, %v650_v52, %v313_v27 }
  0xaf   :  { %v478_v20 = vmul.f32 %v307_v30, %v762_v8  ;;  %510 = vst [vmem:[%s1268_s4 + $0xa0] sm:$0xff] %v307_v30  ;;  %vm319_vm8 = vcmp.eq.f32.partialorder %v318_v46, 8.507059e+37  ;;  %v326_v33 = vsub.f32 1.0, %v325_v29  ;;  %v656_v36 = vpop.eup %655  ;;  %vm329_vm9 = vweird.f32 %v894_v48 }
  0xb0   :  { %v322_v37 = vsel %vm319_vm8, %v321_v28, %v317_v32  ;;  %v348_v18 = vand.u32 2147483647, %v905_v54  ;;  %661 = vpow2.f32 %v614_v49  ;;  %vm330_vm10 = vweird.f32 %v654_v24 }
  0xb1   :  { %494 = vst [vmem:[%s1268_s4 + $0x20] sm:$0xff] %v478_v20  ;;  %v479_v8 = vmul.f32 %v322_v37, %v767_v9  ;;  %v327_v34 = vmul.f32 %v654_v24, %v326_v33  ;;  %v340_v38 = vmul.f32 %v656_v36, %v905_v54  ;;  %vm959_vm11 = vcmp.eq.f32.partialorder %v333_v17, 8.507059e+37  ;;  %vm331_vm13 = vmor %vm329_vm9, %vm330_vm10 }
  0xb2   :  { %v658_v40 = vpop.eup %657  ;;  %511 = vst [vmem:[%s1268_s4 + $0xa8] sm:$0xff] %v322_v37  ;;  %v336_v42 = vor.u32 1.1754944e-38, %v335_v31  ;;  %v350_v12 = vand.u32 2147483648, %v905_v54  ;;  %v615_v44 = vmul.f32 -1.442695, %v164_v35  ;;  %vm344_vm12 = vweird.f32 %v905_v54  ;;  %v167_v54 = vpop.f32.mrf.mxu3 }
  0xb3   :  { %495 = vst [vmem:[%s1268_s4 + $0x28] sm:$0xff] %v479_v8  ;;  %v328_v9 = vadd.f32 %v654_v24, %v327_v34  ;;  %v341_v47 = vsub.f32 1.0, %v340_v38  ;;  %v968_v49 = vadd.f32 1.0, %v658_v40  ;;  %vm345_vm14 = vweird.f32 %v656_v36  ;;  %v1034_v8 = vld [vmem:[%s1270_s1] sm:$0x1f] }
  0xb4   :  { %v660_v13 = vpop.eup %659  ;;  %vm973_vm15 = vcmp.eq.f32.partialorder %v348_v18, 8.507059e+37  ;;  %663 = vpow2.f32 %v615_v44  ;;  %v616_v51 = vmul.f32 -1.442695, %v80_v39  ;;  %v617_v56 = vmul.f32 -1.442695, %v109_v45  ;;  %vm346_vm1 = vmor %vm344_vm12, %vm345_vm14 }
  0xb5   :  { %v332_v52 = vsel %vm331_vm13, %v654_v24, %v328_v9  ;;  %v342_v53 = vmul.f32 %v656_v36, %v341_v47  ;;  %v355_v55 = vmul.f32 %v660_v13, %v933_v26  ;;  %v351_v43 = vor.u32 1.1754944e-38, %v350_v12 }
  0xb6   :  { %v662_v58 = vpop.eup %661  ;;  %v337_v59 = vsel %vm959_vm11, %v336_v42, %v332_v52  ;;  %vm359_vm0 = vweird.f32 %v933_v26  ;;  %665 = vrcp.f32 %v968_v49  ;;  %v363_v62 = vand.u32 2147483647, %v933_v26 }
  0xb7   :  { %v480_v48 = vmul.f32 %v337_v59, %v772_v10  ;;  %512 = vst [vmem:[%s1268_s4 + $0xb0] sm:$0xff] %v337_v59  ;;  %v343_v60 = vadd.f32 %v656_v36, %v342_v53  ;;  %v356_v61 = vsub.f32 1.0, %v355_v55  ;;  %v365_v63 = vand.u32 2147483648, %v933_v26  ;;  %v522_v10 = vld [vmem:[%s1269_s2] sm:$0xff] }
  0xb8   :  { %v991_v16 = vadd.f32 1.0, %v662_v58  ;;  %667 = vpow2.f32 %v616_v51  ;;  %v618_v19 = vmul.f32 -1.442695, %v138_v57  ;;  %vm360_vm2 = vweird.f32 %v660_v13  ;;  %524 = vst [vmem:[#allocation1] ss:$4 sm:$0xff] %v522_v10 }
  0xb9   :  { %496 = vst [vmem:[%s1268_s4 + $0x30] sm:$0xff] %v480_v48  ;;  %v347_v21 = vsel %vm346_vm1, %v656_v36, %v343_v60  ;;  %v357_v46 = vmul.f32 %v660_v13, %v356_v61  ;;  %669 = vpow2.f32 %v617_v56  ;;  %vm361_vm3 = vmor %vm359_vm0, %vm360_vm2  ;;  %vm364_vm4 = vcmp.eq.f32.partialorder %v363_v62, 8.507059e+37 }
  0xba   :  { %v664_v14 = vpop.eup %663  ;;  %v352_v22 = vsel %vm973_vm15, %v351_v43, %v347_v21  ;;  %671 = vrcp.f32 %v991_v16  ;;  %v366_v27 = vor.u32 1.1754944e-38, %v365_v63  ;;  %v378_v28 = vand.u32 2147483647, %v968_v49 }
  0xbb   :  { %v481_v23 = vmul.f32 %v352_v22, %v779_v11  ;;  %513 = vst [vmem:[%s1268_s4 + $0xb8] sm:$0xff] %v352_v22  ;;  %v358_v24 = vadd.f32 %v660_v13, %v357_v46  ;;  %v1006_v25 = vadd.f32 1.0, %v664_v14  ;;  %v619_v29 = vmul.f32 -1.442695, %v167_v54 }
  0xbc   :  { %v1008_v15 = vpop.eup %665  ;;  %v380_v17 = vand.u32 2147483648, %v968_v49  ;;  %673 = vpow2.f32 %v618_v19  ;;  %v393_v26 = vand.u32 2147483647, %v991_v16  ;;  %v395_v32 = vand.u32 2147483648, %v991_v16 }
  0xbd   :  { %497 = vst [vmem:[%s1268_s4 + $0x38] sm:$0xff] %v481_v23  ;;  %v362_v11 = vsel %vm361_vm3, %v660_v13, %v358_v24  ;;  %v370_v30 = vmul.f32 %v1008_v15, %v968_v49  ;;  %675 = vrcp.f32 %v1006_v25  ;;  %vm374_vm5 = vweird.f32 %v968_v49 }
  0xbe   :  { %v668_v31 = vpop.eup %667  ;;  %v367_v20 = vsel %vm364_vm4, %v366_v27, %v362_v11  ;;  %vm1036_vm6 = vcmp.eq.f32.partialorder %v378_v28, 8.507059e+37  ;;  %677 = vpow2.f32 %v619_v29  ;;  %vm375_vm7 = vweird.f32 %v1008_v15  ;;  %v1130_v29 = vld [vmem:[%s1270_s1 + $0x8] sm:$0x1f] }
  0xbf   :  { %v670_v33 = vpop.eup %669  ;;  %v482_v35 = vmul.f32 %v367_v20, %v738_v4  ;;  %514 = vst [vmem:[%s1268_s4 + $0xc0] sm:$0xff] %v367_v20  ;;  %v371_v36 = vsub.f32 1.0, %v370_v30  ;;  %v1027_v37 = vadd.f32 1.0, %v668_v31  ;;  %v410_v4 = vand.u32 2147483648, %v1006_v25  ;;  %vm376_vm10 = vmor %vm374_vm5, %vm375_vm7 }
  0xc0   :  { %v1029_v18 = vpop.eup %671  ;;  %v1041_v38 = vadd.f32 1.0, %v670_v33  ;;  %v408_v41 = vand.u32 2147483647, %v1006_v25  ;;  %v525_v42 = vld.sshfl [vmem:[#allocation1] sm:$0xff pattern:$0x73625140]  ;;  %vm389_vm9 = vweird.f32 %v991_v16  ;;  %vm404_vm12 = vweird.f32 %v1006_v25 }
  0xc1   :  { %498 = vst [vmem:[%s1268_s4 + $0x40] sm:$0xff] %v482_v35  ;;  %v372_v39 = vmul.f32 %v1008_v15, %v371_v36  ;;  %v385_v40 = vmul.f32 %v1029_v18, %v991_v16  ;;  %v381_v12 = vor.u32 1.1754944e-38, %v380_v17  ;;  %vm1051_vm8 = vcmp.eq.f32.partialorder %v393_v26, 8.507059e+37  ;;  %v526_v9 = vld.sshfl [vmem:[#allocation1 + $0x8] sm:$0xff pattern:$0x73625140] }
  0xc2   :  { %v396_v45 = vor.u32 1.1754944e-38, %v395_v32  ;;  %679 = vrcp.f32 %v1027_v37  ;;  %v674_v47 = vpop.eup %673  ;;  %v527_v51 = vld.sshfl [vmem:[#allocation1 + $0x10] sm:$0xff pattern:$0x73625140]  ;;  %533 = vst [vmem:[%s1268_s4 + $0x100] sm:$0x3] %v525_v42  ;;  %vm390_vm11 = vweird.f32 %v1029_v18  ;;  %vm419_vm14 = vweird.f32 %v1027_v37 }
  0xc3   :  { %v373_v13 = vadd.f32 %v1008_v15, %v372_v39  ;;  %v386_v50 = vsub.f32 1.0, %v385_v40  ;;  %681 = vrcp.f32 %v1041_v38  ;;  %v1062_v52 = vpop.eup %675  ;;  %v411_v53 = vor.u32 1.1754944e-38, %v410_v4  ;;  %v528_v49 = vld.sshfl [vmem:[#allocation1 + $0x18] sm:$0xff pattern:$0x73625140]  ;;  %vm391_vm15 = vmor %vm389_vm9, %vm390_vm11 }
  0xc4   :  { %v541_v55 = vrot.slane %v1034_v8, 7  ;;  %v400_v58 = vmul.f32 %v1062_v52, %v1006_v25  ;;  %vm1075_vm13 = vcmp.eq.f32.partialorder %v408_v41, 8.507059e+37  ;;  %534 = vst [vmem:[%s1268_s4 + $0x108] sm:$0x3] %v526_v9  ;;  %v678_v43 = vpop.eup %677  ;;  %v423_v60 = vand.u32 2147483647, %v1027_v37 }
  0xc5   :  { %v377_v56 = vsel %vm376_vm10, %v1008_v15, %v373_v13  ;;  %v387_v57 = vmul.f32 %v1029_v18, %v386_v50  ;;  %v425_v61 = vand.u32 2147483648, %v1027_v37  ;;  %v1087_v62 = vadd.f32 1.0, %v674_v47  ;;  %535 = vst [vmem:[%s1268_s4 + $0x110] sm:$0x3] %v527_v51  ;;  %v1162_v39 = vld [vmem:[%s1270_s1 + $0x18] sm:$0x1f] }
  0xc6   :  { %v382_v48 = vsel %vm1036_vm6, %v381_v12, %v377_v56  ;;  %v401_v10 = vsub.f32 1.0, %v400_v58  ;;  %v438_v21 = vand.u32 2147483647, %v1041_v38  ;;  %vm434_vm0 = vweird.f32 %v1041_v38  ;;  %536 = vst [vmem:[%s1268_s4 + $0x118] sm:$0x3] %v528_v49 }
  0xc7   :  { %v483_v63 = vmul.f32 %v382_v48, %v745_v5  ;;  %515 = vst [vmem:[%s1268_s4 + $0xc8] sm:$0xff] %v382_v48  ;;  %v388_v19 = vadd.f32 %v1029_v18, %v387_v57  ;;  %v440_v54 = vand.u32 2147483648, %v1041_v38  ;;  %683 = vrcp.f32 %v1087_v62 }
  0xc8   :  { %v680_v46 = vpop.eup %679  ;;  %v1105_v5 = vadd.f32 1.0, %v678_v43  ;;  %v402_v22 = vmul.f32 %v1062_v52, %v401_v10  ;;  %vm405_vm1 = vweird.f32 %v1062_v52  ;;  %vm1119_vm2 = vcmp.eq.f32.partialorder %v423_v60, 8.507059e+37  ;;  %549 = vst [vmem:[%s1268_s4 + $0x100] sm:$0xc] %v541_v55 }
  0xc9   :  { %v682_v14 = vpop.eup %681  ;;  %499 = vst [vmem:[%s1268_s4 + $0x48] sm:$0xff] %v483_v63  ;;  %v392_v16 = vsel %vm391_vm15, %v1029_v18, %v388_v19  ;;  %v415_v23 = vmul.f32 %v680_v46, %v1027_v37  ;;  %v426_v27 = vor.u32 1.1754944e-38, %v425_v61  ;;  %vm1137_vm3 = vcmp.eq.f32.partialorder %v438_v21, 8.507059e+37  ;;  %vm406_vm4 = vmor %vm404_vm12, %vm405_vm1 }
  0xca   :  { %v397_v24 = vsel %vm1051_vm8, %v396_v45, %v392_v16  ;;  %v430_v28 = vmul.f32 %v682_v14, %v1041_v38  ;;  %v403_v30 = vadd.f32 %v1062_v52, %v402_v22  ;;  %v441_v26 = vor.u32 1.1754944e-38, %v440_v54 }
  0xcb   :  { %v484_v11 = vmul.f32 %v397_v24, %v750_v6  ;;  %516 = vst [vmem:[%s1268_s4 + $0xd0] sm:$0xff] %v397_v24  ;;  %v416_v17 = vsub.f32 1.0, %v415_v23  ;;  %v453_v32 = vand.u32 2147483647, %v1087_v62  ;;  %685 = vrcp.f32 %v1105_v5  ;;  %v1148_v6 = vld [vmem:[%s1270_s1 + $0x10] sm:$0x1f] }
  0xcc   :  { %v431_v20 = vsub.f32 1.0, %v430_v28  ;;  %v407_v33 = vsel %vm406_vm4, %v1062_v52, %v403_v30  ;;  %vm420_vm5 = vweird.f32 %v680_v46  ;;  %vm435_vm6 = vweird.f32 %v682_v14 }
  0xcd   :  { %500 = vst [vmem:[%s1268_s4 + $0x50] sm:$0xff] %v484_v11  ;;  %v417_v35 = vmul.f32 %v680_v46, %v416_v17  ;;  %vm449_vm7 = vweird.f32 %v1087_v62  ;;  %v684_v25 = vpop.eup %683  ;;  %v412_v36 = vsel %vm1075_vm13, %v411_v53, %v407_v33  ;;  %v542_v34 = vrot.slane %v1130_v29, 7  ;;  %vm421_vm8 = vmor %vm419_vm14, %vm420_vm5 }
  0xce   :  { %v432_v18 = vmul.f32 %v682_v14, %v431_v20  ;;  %v543_v4 = vrot.slane %v1148_v6, 7  ;;  %v485_v40 = vmul.f32 %v412_v36, %v755_v7  ;;  %517 = vst [vmem:[%s1268_s4 + $0xd8] sm:$0xff] %v412_v36  ;;  %v445_v42 = vmul.f32 %v684_v25, %v1087_v62  ;;  %vm436_vm11 = vmor %vm434_vm0, %vm435_vm6 }
  0xcf   :  { %v418_v41 = vadd.f32 %v680_v46, %v417_v35  ;;  %v455_v12 = vand.u32 2147483648, %v1087_v62  ;;  %vm450_vm9 = vweird.f32 %v684_v25  ;;  %vm1172_vm10 = vcmp.eq.f32.partialorder %v453_v32, 8.507059e+37  ;;  %550 = vst [vmem:[%s1268_s4 + $0x108] sm:$0xc] %v542_v34 }
  0xd0   :  { %v433_v44 = vadd.f32 %v682_v14, %v432_v18  ;;  %v553_v7 = vlaneseq  ;;  %501 = vst [vmem:[%s1268_s4 + $0x58] sm:$0xff] %v485_v40  ;;  %v446_v37 = vsub.f32 1.0, %v445_v42  ;;  %v544_v47 = vrot.slane %v1162_v39, 7  ;;  %vm451_vm15 = vmor %vm449_vm7, %vm450_vm9 }
  0xd1   :  { %v422_v9 = vsel %vm421_vm8, %v680_v46, %v418_v41  ;;  %v560_v13 = vrot.slane %v1148_v6, 6  ;;  %v686_v50 = vpop.eup %685  ;;  %551 = vst [vmem:[%s1268_s4 + $0x110] sm:$0xc] %v543_v4  ;;  %v561_v53 = vrot.slane %v1162_v39, 5  ;;  %vm562_vm13 = vcmask 1040384  }
  0xd2   :  { %v427_v51 = vsel %vm1119_vm2, %v426_v27, %v422_v9  ;;  %v437_v52 = vsel %vm436_vm11, %v682_v14, %v433_v44  ;;  %v447_v56 = vmul.f32 %v684_v25, %v446_v37  ;;  %v460_v57 = vmul.f32 %v686_v50, %v1105_v5  ;;  %552 = vst [vmem:[%s1268_s4 + $0x118] sm:$0xc] %v544_v47 }
  0xd3   :  { %v486_v55 = vmul.f32 %v427_v51, %v716_v0  ;;  %518 = vst [vmem:[%s1268_s4 + $0xe0] sm:$0xff] %v427_v51  ;;  %v442_v38 = vsel %vm1137_vm3, %v441_v26, %v437_v52  ;;  %vm1204_vm12 = vcmp.lt.s32.totalorder %v553_v7, 512  ;;  %vm564_vm14 = vcmask 1042434  }
  0xd4   :  { %v487_v58 = vmul.f32 %v442_v38, %v722_v1  ;;  %519 = vst [vmem:[%s1268_s4 + $0xe8] sm:$0xff] %v442_v38  ;;  %v448_v0 = vadd.f32 %v684_v25, %v447_v56  ;;  %v461_v49 = vsub.f32 1.0, %v460_v57  ;;  %v563_v43 = vsel %vm562_vm13, %v1034_v8, %v542_v34 }
  0xd5   :  { %502 = vst [vmem:[%s1268_s4 + $0x60] sm:$0xff] %v486_v55  ;;  %v565_v48 = vsel %vm564_vm14, %v560_v13, %v561_v53  ;;  %v456_v1 = vor.u32 1.1754944e-38, %v455_v12  ;;  %v468_v60 = vand.u32 2147483647, %v1105_v5  ;;  %v470_v61 = vand.u32 2147483648, %v1105_v5 }
  0xd6   :  { %503 = vst [vmem:[%s1268_s4 + $0x68] sm:$0xff] %v487_v58  ;;  %vm566_vm0 = vcmask 1041408   ;;  %v452_v63 = vsel %vm451_vm15, %v684_v25, %v448_v0  ;;  %v462_v19 = vmul.f32 %v686_v50, %v461_v49  ;;  %vm465_vm1 = vweird.f32 %v686_v50 }
  0xd7   :  { %v567_v10 = vsel %vm566_vm0, %v563_v43, %v565_v48  ;;  %v457_v21 = vsel %vm1172_vm10, %v456_v1, %v452_v63  ;;  %v687_v46 = vmov 1.0   ;;  %v572_v62 = vrot.slane %v1034_v8, 3 }
  0xd8   :  { %620 = vst.msk [vmem:[%s1268_s4 + $0x104] ss:$8 sm:$0xf] %vm1204_vm12, %v687_v46  ;;  %v488_v54 = vmul.f32 %v457_v21, %v728_v2  ;;  %v463_v14 = vadd.f32 %v686_v50, %v462_v19  ;;  %vm464_vm2 = vweird.f32 %v1105_v5  ;;  %v471_v16 = vor.u32 1.1754944e-38, %v470_v61 }
  0xd9   :  { %520 = vst [vmem:[%s1268_s4 + $0xf0] sm:$0xff] %v457_v21  ;;  %vm466_vm3 = vmor %vm464_vm2, %vm465_vm1  ;;  %v573_v22 = vrot.slane %v1130_v29, 3  ;;  %vm469_vm4 = vcmp.eq.f32.partialorder %v468_v60, 8.507059e+37  ;;  %v574_v23 = vrot.slane %v1148_v6, 3  ;;  %v575_v24 = vrot.slane %v1162_v39, 3 }
  0xda   :  { %621 = vst.msk [vmem:[%s1268_s4 + $0x105] ss:$8 sm:$0xf] %vm1204_vm12, %v567_v10  ;;  %v467_v2 = vsel %vm466_vm3, %v686_v50, %v463_v14 }
  0xdb   :  { %504 = vst [vmem:[%s1268_s4 + $0x70] sm:$0xff] %v488_v54  ;;  %v472_v8 = vsel %vm469_vm4, %v471_v16, %v467_v2 }
  0xdc   :  { %580 = vst [vmem:[%s1268_s4 + $0x100] sm:$0xc0] %v572_v62  ;;  %v489_v5 = vmul.f32 %v472_v8, %v733_v3 }
  0xdd   :  { %521 = vst [vmem:[%s1268_s4 + $0xf8] sm:$0xff] %v472_v8 }
  0xde   :  { %581 = vst [vmem:[%s1268_s4 + $0x108] sm:$0xc0] %v573_v22 }
  0xdf   :  { %505 = vst [vmem:[%s1268_s4 + $0x78] sm:$0xff] %v489_v5 }
  0xe0   :  { %582 = vst [vmem:[%s1268_s4 + $0x110] sm:$0xc0] %v574_v23 }
  0xe1   :  { %583 = vst [vmem:[%s1268_s4 + $0x118] sm:$0xc0] %v575_v24 }

// kernel: closed_call.13
= control target key start
LH: loop header
LB: loop body
LE: loop exit
PB: predicated region body
PF: predicated region fallthrough
CT: control target
= control target key end

     0   :  { %vm158_vm0 = vcmask 1041408   ;;  %vm276_vm2 = vcmask 1040384   ;;  %vm278_vm3 = vcmask 1042434   ;;  %s2552_s0 = inlined_call_operand.<no memory space> [shape: s32[1], index: 0, kind: input, shape index: {}]   ;;  %s2553_s1 = inlined_call_operand.vmem [shape: f32[4,32,512], index: 1, kind: input, shape index: {}]   ;;  %s2554_s3 = inlined_call_operand.vmem [shape: f32[72,512], index: 3, kind: input, shape index: {}]   ;;  %s2555_s2 = inlined_call_operand.vmem [shape: f32[4,5,512], index: 2, kind: input, shape index: {}]   ;;  %s2556_s7 = inlined_call_operand.vmem [shape: f32[72,512], index: 7, kind: output, shape index: {1}]   ;;  %s2557_s4 = inlined_call_operand.vmem [shape: f32[2,512], index: 4, kind: input, shape index: {}]   ;;  %s2558_s6 = inlined_call_operand.vmem [shape: f32[1,512], index: 6, kind: output, shape index: {0}]   ;;  %s2559_s5 = inlined_call_operand.vmem [shape: f32[32,64], index: 5, kind: input, shape index: {}]  }
   0x1   :  { %p51_p0 = scmp.lt.s32.totalorder %s2552_s0, 3  ;;  %v122_v0 = vld [vmem:[%s2554_s3 + $0x100] sm:$0xc0]  ;;  %v123_v4 = vld [vmem:[%s2554_s3 + $0x108] sm:$0xc0] }
   0x2   :  { %v124_v5 = vld [vmem:[%s2554_s3 + $0x110] sm:$0xc0]  ;;  %v125_v6 = vld [vmem:[%s2554_s3 + $0x118] sm:$0xc0]  ;;  %v187_v19 = vmul.f32 %v122_v0, %v122_v0  ;;  %v188_v23 = vmul.f32 %v123_v4, %v123_v4 }
   0x3   :  { %s2633_s0 = smov (!%p51_p0, %s2552_s0), 3  ;;  %v189_v24 = vmul.f32 %v124_v5, %v124_v5  ;;  %v190_v25 = vmul.f32 %v125_v6, %v125_v6 }
   0x4   :  { %s1313_s28 = sshll.u32 %s2633_s0, 7  ;;  %s1314_s9 = sshll.u32 %s2633_s0, 5 }
   0x5   :  { %s1478_s8 = scalar_lea.vmem %s2553_s1, %s1313_s28  ;;  %s62_s18 = scalar_lea.vmem %s2555_s2, %s1314_s9 }
   0x6   :  { %v76_v1 = vld [vmem:[%s1478_s8 + $0x60] sm:$0xff]  ;;  %v77_v2 = vld [vmem:[%s1478_s8 + $0x68] sm:$0xff]  ;;  %v78_v3 = vld [vmem:[%s1478_s8 + $0x70] sm:$0xff] }
   0x7   :  { %686 = vmatpush.msra.mxu0 %v76_v1  ;;  %715 = vmatpush.msra.mxu1 %v77_v2  ;;  %v79_v7 = vld [vmem:[%s1478_s8 + $0x78] sm:$0xff]  ;;  %v72_v8 = vld [vmem:[%s1478_s8 + $0x40] sm:$0xff]  ;;  %v73_v9 = vld [vmem:[%s1478_s8 + $0x48] sm:$0xff] }
   0x8   :  { %744 = vmatpush.msra.mxu2 %v78_v3  ;;  %773 = vmatpush.msra.mxu3 %v79_v7  ;;  %v74_v10 = vld [vmem:[%s1478_s8 + $0x50] sm:$0xff]  ;;  %v75_v11 = vld [vmem:[%s1478_s8 + $0x58] sm:$0xff]  ;;  %v68_v12 = vld [vmem:[%s1478_s8 + $0x20] sm:$0xff] }
   0x9   :  { %687 = vmatpush.msra.mxu0 %v72_v8  ;;  %716 = vmatpush.msra.mxu1 %v73_v9  ;;  %v69_v13 = vld [vmem:[%s1478_s8 + $0x28] sm:$0xff]  ;;  %v70_v14 = vld [vmem:[%s1478_s8 + $0x30] sm:$0xff]  ;;  %v71_v15 = vld [vmem:[%s1478_s8 + $0x38] sm:$0xff] }
   0xa   :  { %745 = vmatpush.msra.mxu2 %v74_v10  ;;  %774 = vmatpush.msra.mxu3 %v75_v11  ;;  %v64_v16 = vld [vmem:[%s1478_s8] sm:$0xff]  ;;  %v65_v17 = vld [vmem:[%s1478_s8 + $0x8] sm:$0xff]  ;;  %v66_v18 = vld [vmem:[%s1478_s8 + $0x10] sm:$0xff] }
   0xb   :  { %688 = vmatpush.msra.mxu0 %v68_v12  ;;  %717 = vmatpush.msra.mxu1 %v69_v13  ;;  %v67_v20 = vld [vmem:[%s1478_s8 + $0x18] sm:$0xff]  ;;  %v1511_v21 = vld [vmem:[%s62_s18] sm:$0x1f]  ;;  %v1513_v22 = vld [vmem:[%s62_s18 + $0x8] sm:$0x1f] }
   0xc   :  { %746 = vmatpush.msra.mxu2 %v70_v14  ;;  %775 = vmatpush.msra.mxu3 %v71_v15  ;;  %v1515_v26 = vld [vmem:[%s62_s18 + $0x10] sm:$0x1f]  ;;  %v1517_v27 = vld [vmem:[%s62_s18 + $0x18] sm:$0x1f]  ;;  %v130_v28 = vrot.slane %v1511_v21, 5  ;;  %v131_v29 = vrot.slane %v1513_v22, 5  ;;  %v191_v30 = vmul.f32 %v1511_v21, %v1511_v21  ;;  %v192_v31 = vmul.f32 %v1513_v22, %v1513_v22 }
   0xd   :  { %689 = vmatpush.msra.mxu0 %v64_v16  ;;  %718 = vmatpush.msra.mxu1 %v65_v17  ;;  %v132_v32 = vrot.slane %v1515_v26, 5  ;;  %v133_v33 = vrot.slane %v1517_v27, 5  ;;  %v193_v34 = vmul.f32 %v1515_v26, %v1515_v26  ;;  %v194_v35 = vmul.f32 %v1517_v27, %v1517_v27 }
   0xe   :  { %747 = vmatpush.msra.mxu2 %v66_v18  ;;  %776 = vmatpush.msra.mxu3 %v67_v20  ;;  %v138_v36 = vadd.f32 %v130_v28, %v122_v0  ;;  %v139_v37 = vadd.f32 %v131_v29, %v123_v4  ;;  %v199_v38 = vrot.slane %v191_v30, 5  ;;  %v200_v39 = vrot.slane %v192_v31, 5  ;;  %v1273_v20 = vld [vmem:[%s2554_s3 + $0x105] ss:$8 sm:$0xf] }
   0xf   :  { %v140_v40 = vadd.f32 %v132_v32, %v124_v5  ;;  %v141_v41 = vadd.f32 %v133_v33, %v125_v6  ;;  %v201_v42 = vrot.slane %v193_v34, 5  ;;  %v202_v43 = vrot.slane %v194_v35, 5 }
  0x10   :  { %v142_v44 = vmul.f32 %v138_v36, %v138_v36  ;;  %v143_v45 = vmul.f32 %v139_v37, %v139_v37  ;;  %v207_v46 = vadd.f32 %v199_v38, %v187_v19  ;;  %v208_v47 = vadd.f32 %v200_v39, %v188_v23 }
  0x11   :  { %v144_v48 = vmul.f32 %v140_v40, %v140_v40  ;;  %v145_v49 = vmul.f32 %v141_v41, %v141_v41  ;;  %v209_v50 = vadd.f32 %v201_v42, %v189_v24  ;;  %v210_v51 = vadd.f32 %v202_v43, %v190_v25 }
  0x12   :  { %v150_v52 = vrot.slane %v142_v44, 6  ;;  %v151_v53 = vrot.slane %v143_v45, 6  ;;  %v211_v54 = vmul.f32 0.01, %v207_v46  ;;  %v212_v55 = vmul.f32 0.01, %v208_v47 }
  0x13   :  { %v152_v56 = vrot.slane %v144_v48, 6  ;;  %v153_v57 = vrot.slane %v145_v49, 6  ;;  %v213_v58 = vmul.f32 0.01, %v209_v50  ;;  %v214_v59 = vmul.f32 0.01, %v210_v51 }
  0x14   :  { %v159_v60 = vsel %vm158_vm0, %v150_v52, 0.0  ;;  %v166_v61 = vsel %vm158_vm0, %v151_v53, 0.0  ;;  %v219_v62 = vrot.slane %v211_v54, 6  ;;  %v220_v63 = vrot.slane %v212_v55, 6 }
  0x15   :  { %v160_v0 = vrot.slane %v159_v60, 4  ;;  %v167_v1 = vrot.slane %v166_v61, 4  ;;  %v173_v2 = vsel %vm158_vm0, %v152_v56, 0.0  ;;  %v180_v3 = vsel %vm158_vm0, %v153_v57, 0.0 }
  0x16   :  { %v174_v4 = vrot.slane %v173_v2, 4  ;;  %v181_v5 = vrot.slane %v180_v3, 4  ;;  %v221_v6 = vrot.slane %v213_v58, 6  ;;  %v222_v7 = vrot.slane %v214_v59, 6 }
  0x17   :  { %v161_v8 = vadd.f32 %v160_v0, %v159_v60  ;;  %v168_v9 = vadd.f32 %v167_v1, %v166_v61  ;;  %v227_v10 = vsel %vm158_vm0, %v219_v62, 0.0  ;;  %v234_v11 = vsel %vm158_vm0, %v220_v63, 0.0 }
  0x18   :  { %v175_v12 = vadd.f32 %v174_v4, %v173_v2  ;;  %v182_v13 = vadd.f32 %v181_v5, %v180_v3  ;;  %v228_v14 = vrot.slane %v227_v10, 4  ;;  %v235_v15 = vrot.slane %v234_v11, 4  ;;  %v104_v2 = vld [vmem:[%s2554_s3 + $0xa0] sm:$0xff] }
  0x19   :  { %v162_v16 = vrot.slane %v161_v8, 2  ;;  %v169_v17 = vrot.slane %v168_v9, 2  ;;  %v241_v18 = vsel %vm158_vm0, %v221_v6, 0.0  ;;  %v248_v19 = vsel %vm158_vm0, %v222_v7, 0.0 }
  0x1a   :  { %v176_v23 = vrot.slane %v175_v12, 2  ;;  %v183_v24 = vrot.slane %v182_v13, 2  ;;  %v229_v25 = vadd.f32 %v228_v14, %v227_v10  ;;  %v236_v28 = vadd.f32 %v235_v15, %v234_v11  ;;  %v1182_v15 = vld [vmem:[%s2557_s4] sm:$0xff] }
  0x1b   :  { %v163_v29 = vadd.f32 %v162_v16, %v161_v8  ;;  %v170_v30 = vadd.f32 %v169_v17, %v168_v9  ;;  %v242_v31 = vrot.slane %v241_v18, 4  ;;  %v249_v32 = vrot.slane %v248_v19, 4  ;;  %1184 = vst [vmem:[#allocation1] ss:$4 sm:$0xff] %v1182_v15 }
  0x1c   :  { %v177_v34 = vadd.f32 %v176_v23, %v175_v12  ;;  %v184_v35 = vadd.f32 %v183_v24, %v182_v13  ;;  %v230_v36 = vrot.slane %v229_v25, 2  ;;  %v237_v37 = vrot.slane %v236_v28, 2 }
  0x1d   :  { %v164_v38 = vrot.slane %v163_v29, 1  ;;  %v243_v39 = vadd.f32 %v242_v31, %v241_v18  ;;  %v250_v40 = vadd.f32 %v249_v32, %v248_v19  ;;  %vm271_vm1 = vcmp.gt.f32.partialorder %v1273_v20, 0.5  ;;  %v116_v31 = vld [vmem:[%s2554_s3 + $0x100] sm:$0x1f] }
  0x1e   :  { %v171_v41 = vrot.slane %v170_v30, 1  ;;  %v231_v42 = vadd.f32 %v230_v36, %v229_v25  ;;  %v238_v43 = vadd.f32 %v237_v37, %v236_v28  ;;  %v178_v44 = vrot.slane %v177_v34, 1  ;;  %v114_v36 = vld [vmem:[%s2554_s3 + $0xf0] sm:$0xff] }
  0x1f   :  { %v244_v45 = vrot.slane %v243_v39, 2  ;;  %v251_v46 = vrot.slane %v250_v40, 2  ;;  %v165_v47 = vadd.f32 %v164_v38, %v163_v29  ;;  %v185_v48 = vrot.slane %v184_v35, 1 }
  0x20   :  { %v232_v49 = vrot.slane %v231_v42, 1  ;;  %v239_v50 = vrot.slane %v238_v43, 1  ;;  %v274_v53 = vrot.slane %v1513_v22, 7  ;;  %v275_v54 = vrot.slane %v1515_v26, 6 }
  0x21   :  { %v245_v51 = vadd.f32 %v244_v45, %v243_v39  ;;  %v252_v52 = vadd.f32 %v251_v46, %v250_v40  ;;  %v172_v55 = vadd.f32 %v171_v41, %v170_v30  ;;  %v295_v58 = vlaneseq  ;;  %v112_v30 = vld [vmem:[%s2554_s3 + $0xe0] sm:$0xff] }
  0x22   :  { %v233_v56 = vadd.f32 %v232_v49, %v231_v42  ;;  %v240_v57 = vadd.f32 %v239_v50, %v238_v43  ;;  %v277_v61 = vsel %vm276_vm2, %v1511_v21, %v274_v53  ;;  %v279_v62 = vsel %vm278_vm3, %v275_v54, %v133_v33  ;;  %v1185_v43 = vld.sshfl [vmem:[#allocation1] sm:$0xff pattern:$0x73625140]  ;;  %v1186_v50 = vld.sshfl [vmem:[#allocation1 + $0x8] sm:$0xff pattern:$0x73625140] }
  0x23   :  { %v246_v59 = vrot.slane %v245_v51, 1  ;;  %v253_v60 = vrot.slane %v252_v52, 1  ;;  %v280_v1 = vsel %vm158_vm0, %v277_v61, %v279_v62  ;;  %vm1554_vm4 = vcmp.lt.s32.totalorder %v295_v58, 512  ;;  %v97_v58 = vld [vmem:[%s2554_s3 + $0x68] sm:$0xff]  ;;  %v115_v61 = vld [vmem:[%s2554_s3 + $0xf8] sm:$0xff] }
  0x24   :  { %v255_v63 = vadd.f32 0.5, %v233_v56  ;;  %v256_v0 = vadd.f32 0.5, %v240_v57  ;;  %v179_v3 = vadd.f32 %v178_v44, %v177_v34  ;;  %v186_v4 = vadd.f32 %v185_v48, %v184_v35  ;;  %1312 = vst.msk [vmem:[%s2556_s7 + $0x105] ss:$8 sm:$0xf] %vm1554_vm4, %v280_v1  ;;  %v113_v34 = vld [vmem:[%s2554_s3 + $0xe8] sm:$0xff] }
  0x25   :  { %v247_v5 = vadd.f32 %v246_v59, %v245_v51  ;;  %v254_v6 = vadd.f32 %v253_v60, %v252_v52  ;;  %v1428_v8 = vmov 0.0   ;;  %v1237_v23 = vrot.slane %v1511_v21, 3  ;;  %v117_v35 = vld [vmem:[%s2554_s3 + $0x108] sm:$0x1f]  ;;  %v96_v51 = vld [vmem:[%s2554_s3 + $0x60] sm:$0xff]  ;;  %v98_v60 = vld [vmem:[%s2554_s3 + $0x70] sm:$0xff] }
  0x26   :  { %vm259_vm5 = vcmp.le.f32.partialorder %v165_v47, %v255_v63  ;;  %vm260_vm6 = vcmp.le.f32.partialorder %v172_v55, %v256_v0  ;;  %v1278_v11 = vsel %vm271_vm1, 1.0, %v1428_v8  ;;  %v1238_v20 = vrot.slane %v1513_v22, 3  ;;  %v118_v55 = vld [vmem:[%s2554_s3 + $0x110] sm:$0x1f]  ;;  %v119_v22 = vld [vmem:[%s2554_s3 + $0x118] sm:$0x1f] }
  0x27   :  { %v257_v33 = vadd.f32 0.5, %v247_v5  ;;  %v258_v7 = vadd.f32 0.5, %v254_v6  ;;  %v1275_v9 = vsel %vm260_vm6, 1.0, %v1428_v8  ;;  %v1274_v10 = vsel %vm259_vm5, 1.0, %v1428_v8  ;;  %1245 = vst [vmem:[%s2556_s7 + $0x100] sm:$0xc0] %v1237_v23 }
  0x28   :  { %v287_v12 = vrot.slane %v1275_v9, 7  ;;  %v282_v16 = vmul.f32 %v1278_v11, %v280_v1  ;;  %v1239_v24 = vrot.slane %v1515_v26, 3  ;;  %v1240_v29 = vrot.slane %v1517_v27, 3  ;;  %1246 = vst [vmem:[%s2556_s7 + $0x108] sm:$0xc0] %v1238_v20  ;;  %v99_v23 = vld [vmem:[%s2554_s3 + $0x78] sm:$0xff] }
  0x29   :  { %vm261_vm7 = vcmp.le.f32.partialorder %v179_v3, %v257_v33  ;;  %vm262_vm8 = vcmp.le.f32.partialorder %v186_v4, %v258_v7  ;;  %v1201_v38 = vrot.slane %v1511_v21, 7  ;;  %v1202_v57 = vrot.slane %v1515_v26, 7  ;;  %v1187_v62 = vld.sshfl [vmem:[#allocation1 + $0x10] sm:$0xff pattern:$0x73625140]  ;;  %v108_v20 = vld [vmem:[%s2554_s3 + $0xc0] sm:$0xff] }
  0x2a   :  { %v1276_v13 = vsel %vm261_vm7, 1.0, %v1428_v8  ;;  %v1277_v14 = vsel %vm262_vm8, 1.0, %v1428_v8  ;;  %v290_v19 = vsel %vm276_vm2, %v1274_v10, %v287_v12  ;;  %1247 = vst [vmem:[%s2556_s7 + $0x110] sm:$0xc0] %v1239_v24  ;;  %v1203_v63 = vrot.slane %v1517_v27, 7 }
  0x2b   :  { %v288_v17 = vrot.slane %v1276_v13, 6  ;;  %v289_v18 = vrot.slane %v1277_v14, 5  ;;  %1248 = vst [vmem:[%s2556_s7 + $0x118] sm:$0xc0] %v1240_v29 }
  0x2c   :  { %v1188_v15 = vld.sshfl [vmem:[#allocation1 + $0x18] sm:$0xff pattern:$0x73625140] }
  0x2d   :  { %v291_v25 = vsel %vm278_vm3, %v288_v17, %v289_v18 }
  0x2e   :  { %v292_v28 = vsel %vm158_vm0, %v290_v19, %v291_v25 }
  0x2f   :  { %v294_v32 = vmul.f32 %v292_v28, %v282_v16 }
  0x31   :  { %299 = vst.msk [vmem:[%s2558_s6] sm:$0xf] %vm1554_vm4, %v294_v32  ;;  %v1603_v37 = vperm.slane %v294_v32, 0  ;;  %v1606_v39 = vperm.slane %v294_v32, 1  ;;  %v1608_v40 = vperm.slane %v294_v32, 2  ;;  %v1636_v56 = vperm.slane %v294_v32, 3 }
  0x33   :  { %v1614_v41 = vmul.f32 %v1603_v37, %v112_v30  ;;  %v1178_v42 = vmul.f32 %v1603_v37, %v116_v31  ;;  %v1618_v44 = vmul.f32 %v1606_v39, %v113_v34  ;;  %v1179_v45 = vmul.f32 %v1606_v39, %v117_v35 }
  0x34   :  { %v1622_v21 = vmul.f32 %v1608_v40, %v114_v36  ;;  %v1180_v1 = vmul.f32 %v1608_v40, %v118_v55  ;;  %v1668_v3 = vmul.f32 %v1603_v37, %v96_v51  ;;  %v1676_v6 = vmul.f32 %v1636_v56, %v115_v61 }
  0x35   :  { %v1625_v46 = vmax.f32 %v1614_v41, 1e-06  ;;  %v1193_v47 = vadd.f32 %v1185_v43, %v1178_v42  ;;  %v1208_v48 = vadd.f32 %v1201_v38, %v1178_v42  ;;  %v1216_v49 = vadd.f32 1.0, %v1178_v42 }
  0x36   :  { %v1631_v52 = vmax.f32 %v1618_v44, 1e-06  ;;  %v1194_v54 = vadd.f32 %v1186_v50, %v1179_v45  ;;  %v1209_v59 = vadd.f32 %v1179_v45, %v274_v53  ;;  %v1217_v26 = vadd.f32 1.0, %v1179_v45 }
  0x37   :  { %1316 = vrcp.f32 %v1625_v46  ;;  %1197 = vst [vmem:[%s2556_s7 + $0x100] sm:$0x3] %v1193_v47  ;;  %v546_v53 = vand.u32 2147483647, %v1625_v46  ;;  %v1664_v0 = vmax.f32 %v1622_v21, 1e-06  ;;  %v1679_v27 = vmul.f32 %v1606_v39, %v97_v58 }
  0x38   :  { %1212 = vst [vmem:[%s2556_s7 + $0x100] sm:$0xc] %v1208_v48  ;;  %1318 = vrcp.f32 %v1631_v52  ;;  %v548_v4 = vand.u32 2147483648, %v1625_v46  ;;  %v561_v5 = vand.u32 2147483647, %v1631_v52  ;;  %v563_v33 = vand.u32 2147483648, %v1631_v52 }
  0x39   :  { %1224 = vst [vmem:[#allocation1] sm:$0xff] %v1216_v49  ;;  %v1686_v7 = vmul.f32 %v1608_v40, %v98_v60  ;;  %1320 = vrcp.f32 %v1664_v0  ;;  %v1195_v8 = vadd.f32 %v1187_v62, %v1180_v1  ;;  %v1210_v9 = vadd.f32 %v1202_v57, %v1180_v1  ;;  %v109_v47 = vld [vmem:[%s2554_s3 + $0xc8] sm:$0xff] }
  0x3a   :  { %1198 = vst [vmem:[%s2556_s7 + $0x108] sm:$0x3] %v1194_v54  ;;  %v1218_v10 = vadd.f32 1.0, %v1180_v1  ;;  %v1690_v11 = vmax.f32 %v1676_v6, 1e-06  ;;  %vm542_vm9 = vweird.f32 %v1625_v46  ;;  %vm1693_vm10 = vcmp.eq.f32.partialorder %v546_v53, 8.507059e+37 }
  0x3b   :  { %1213 = vst [vmem:[%s2556_s7 + $0x108] sm:$0xc] %v1209_v59  ;;  %vm557_vm11 = vweird.f32 %v1631_v52  ;;  %v1181_v14 = vmul.f32 %v1636_v56, %v119_v22  ;;  %v549_v18 = vor.u32 1.1754944e-38, %v548_v4  ;;  %vm1700_vm12 = vcmp.eq.f32.partialorder %v561_v5, 8.507059e+37  ;;  %v110_v54 = vld [vmem:[%s2554_s3 + $0xd0] sm:$0xff]  ;;  %v92_v53 = vld [vmem:[%s2554_s3 + $0x40] sm:$0xff] }
  0x3c   :  { %1225 = vst [vmem:[#allocation1 + $0x9] sm:$0xff] %v1217_v26  ;;  %1322 = vrcp.f32 %v1690_v11  ;;  %v564_v25 = vor.u32 1.1754944e-38, %v563_v33  ;;  %v578_v28 = vand.u32 2147483648, %v1664_v0  ;;  %v1720_v36 = vmul.f32 %v1636_v56, %v99_v23  ;;  %v93_v23 = vld [vmem:[%s2554_s3 + $0x48] sm:$0xff] }
  0x3d   :  { %v1317_v12 = vpop.eup %1316  ;;  %1199 = vst [vmem:[%s2556_s7 + $0x110] sm:$0x3] %v1195_v8  ;;  %v1196_v30 = vadd.f32 %v1188_v15, %v1181_v14  ;;  %v1211_v31 = vadd.f32 %v1203_v63, %v1181_v14  ;;  %v1219_v32 = vadd.f32 1.0, %v1181_v14  ;;  %v1723_v38 = vmul.f32 %v1603_v37, %v108_v20 }
  0x3e   :  { %v1319_v16 = vpop.eup %1318  ;;  %v538_v17 = vmul.f32 %v1317_v12, %v1625_v46  ;;  %vm543_vm13 = vweird.f32 %v1317_v12  ;;  %1214 = vst [vmem:[%s2556_s7 + $0x110] sm:$0xc] %v1210_v9  ;;  %vm572_vm15 = vweird.f32 %v1664_v0  ;;  %v576_v45 = vand.u32 2147483647, %v1664_v0 }
  0x3f   :  { %v553_v24 = vmul.f32 %v1319_v16, %v1631_v52  ;;  %1226 = vst [vmem:[#allocation1 + $0x12] sm:$0xff] %v1218_v10  ;;  %v1321_v34 = vpop.eup %1320  ;;  %vm558_vm14 = vweird.f32 %v1319_v16  ;;  %vm1737_vm0 = vmor %vm542_vm9, %vm543_vm13  ;;  %v579_v50 = vor.u32 1.1754944e-38, %v578_v28  ;;  %vm587_vm1 = vweird.f32 %v1690_v11 }
  0x40   :  { %v539_v29 = vsub.f32 1.0, %v538_v17  ;;  %v568_v43 = vmul.f32 %v1321_v34, %v1664_v0  ;;  %1200 = vst [vmem:[%s2556_s7 + $0x118] sm:$0x3] %v1196_v30  ;;  %v1746_v51 = vmax.f32 %v1723_v38, 1e-06  ;;  %vm1754_vm2 = vmor %vm557_vm11, %vm558_vm14  ;;  %vm573_vm3 = vweird.f32 %v1321_v34  ;;  %v95_v30 = vld [vmem:[%s2554_s3 + $0x58] sm:$0xff] }
  0x41   :  { %v554_v35 = vsub.f32 1.0, %v553_v24  ;;  %1215 = vst [vmem:[%s2556_s7 + $0x118] sm:$0xc] %v1211_v31  ;;  %v591_v59 = vand.u32 2147483647, %v1690_v11  ;;  %v1762_v26 = vmul.f32 %v1606_v39, %v109_v47  ;;  %v593_v22 = vand.u32 2147483648, %v1690_v11  ;;  %vm1779_vm5 = vmor %vm572_vm15, %vm573_vm3 }
  0x42   :  { %v540_v42 = vmul.f32 %v1317_v12, %v539_v29  ;;  %v1323_v46 = vpop.eup %1322  ;;  %v569_v58 = vsub.f32 1.0, %v568_v43  ;;  %1227 = vst [vmem:[#allocation1 + $0x1b] sm:$0xff] %v1219_v32  ;;  %1324 = vrcp.f32 %v1746_v51  ;;  %v1771_v63 = vmul.f32 %v1608_v40, %v110_v54  ;;  %v94_v29 = vld [vmem:[%s2554_s3 + $0x50] sm:$0xff] }
  0x43   :  { %v555_v49 = vmul.f32 %v1319_v16, %v554_v35  ;;  %v583_v61 = vmul.f32 %v1323_v46, %v1690_v11  ;;  %vm588_vm6 = vweird.f32 %v1323_v46  ;;  %vm577_vm7 = vcmp.eq.f32.partialorder %v576_v45, 8.507059e+37  ;;  %v106_v17 = vld [vmem:[%s2554_s3 + $0xb0] sm:$0xff] }
  0x44   :  { %v541_v55 = vadd.f32 %v1317_v12, %v540_v42  ;;  %v570_v62 = vmul.f32 %v1321_v34, %v569_v58  ;;  %v1791_v14 = vmul.f32 %v1603_v37, %v92_v53  ;;  %v1794_v15 = vmax.f32 %v1762_v26, 1e-06  ;;  %vm1800_vm8 = vmor %vm587_vm1, %vm588_vm6 }
  0x45   :  { %v556_v60 = vadd.f32 %v1319_v16, %v555_v49  ;;  %v584_v33 = vsub.f32 1.0, %v583_v61  ;;  %vm1804_vm9 = vcmp.eq.f32.partialorder %v591_v59, 8.507059e+37  ;;  %v594_v19 = vor.u32 1.1754944e-38, %v593_v22 }
  0x46   :  { %v545_v52 = vsel %vm1737_vm0, %v1317_v12, %v541_v55  ;;  %v571_v10 = vadd.f32 %v1321_v34, %v570_v62  ;;  %v111_v12 = vld [vmem:[%s2554_s3 + $0xd8] sm:$0xff]  ;;  %v1812_v20 = vmax.f32 %v1771_v63, 1e-06  ;;  %1326 = vrcp.f32 %v1794_v15 }
  0x47   :  { %v550_v1 = vsel %vm1693_vm10, %v549_v18, %v545_v52  ;;  %v560_v4 = vsel %vm1754_vm2, %v1319_v16, %v556_v60  ;;  %v585_v0 = vmul.f32 %v1323_v46, %v584_v33  ;;  %v1822_v31 = vmul.f32 %v1636_v56, %v111_v12  ;;  %v105_v52 = vld [vmem:[%s2554_s3 + $0xa8] sm:$0xff] }
  0x48   :  { %v551_v8 = vmul.f32 %v550_v1, %v1668_v3  ;;  %v565_v9 = vsel %vm1700_vm12, %v564_v25, %v560_v4  ;;  %v575_v16 = vsel %vm1779_vm5, %v1321_v34, %v571_v10  ;;  %v1325_v24 = vpop.eup %1324  ;;  %v486_v35 = vand.u32 2147483647, %v1746_v51 }
  0x49   :  { %v566_v13 = vmul.f32 %v565_v9, %v1679_v27  ;;  %v580_v25 = vsel %vm577_vm7, %v579_v50, %v575_v16  ;;  %v586_v11 = vadd.f32 %v1323_v46, %v585_v0  ;;  %v1229_v28 = vld [vmem:[#allocation1 + $0x4] ss:$9 sm:$0xff]  ;;  %v478_v34 = vmul.f32 %v1325_v24, %v1746_v51 }
  0x4a   :  { %690 = vmatpush.msra.mxu0 %v551_v8  ;;  %v581_v32 = vmul.f32 %v580_v25, %v1686_v7  ;;  %1311 = vst.msk [vmem:[%s2556_s7 + $0x104] ss:$8 sm:$0xf] %vm1554_vm4, %v1229_v28  ;;  %v488_v42 = vand.u32 2147483648, %v1746_v51  ;;  %vm482_vm10 = vweird.f32 %v1746_v51  ;;  %v1837_v45 = vmul.f32 %v1606_v39, %v93_v23  ;;  %v88_v50 = vld [vmem:[%s2554_s3 + $0x20] sm:$0xff] }
  0x4b   :  { %719 = vmatpush.msra.mxu1 %v566_v13  ;;  %v590_v43 = vsel %vm1800_vm8, %v1323_v46, %v586_v11  ;;  %1328 = vrcp.f32 %v1812_v20  ;;  %v479_v48 = vsub.f32 1.0, %v478_v34  ;;  %vm483_vm4 = vweird.f32 %v1325_v24 }
  0x4c   :  { %748 = vmatpush.msra.mxu2 %v581_v32  ;;  %v595_v47 = vsel %vm1804_vm9, %v594_v19, %v590_v43  ;;  %v501_v49 = vand.u32 2147483647, %v1794_v15  ;;  %v1851_v46 = vmul.f32 %v1608_v40, %v94_v29  ;;  %v1854_v55 = vmul.f32 %v1636_v56, %v95_v30  ;;  %v1327_v62 = vpop.eup %1326  ;;  %vm1871_vm12 = vmor %vm482_vm10, %vm483_vm4 }
  0x4d   :  { %v596_v54 = vmul.f32 %v595_v47, %v1720_v36  ;;  %v1857_v57 = vmax.f32 %v1822_v31, 1e-06  ;;  %v480_v58 = vmul.f32 %v1325_v24, %v479_v48  ;;  %vm1859_vm11 = vcmp.eq.f32.partialorder %v486_v35, 8.507059e+37 }
  0x4e   :  { %v489_v60 = vor.u32 1.1754944e-38, %v488_v42  ;;  %v1864_v61 = vmul.f32 %v1603_v37, %v104_v2  ;;  %vm497_vm13 = vweird.f32 %v1794_v15  ;;  %v503_v53 = vand.u32 2147483648, %v1794_v15  ;;  %v107_v2 = vld [vmem:[%s2554_s3 + $0xb8] sm:$0xff] }
  0x4f   :  { %777 = vmatpush.msra.mxu3 %v596_v54  ;;  %1330 = vrcp.f32 %v1857_v57  ;;  %v1879_v1 = vmul.f32 %v1603_v37, %v88_v50  ;;  %v481_v4 = vadd.f32 %v1325_v24, %v480_v58  ;;  %v493_v5 = vmul.f32 %v1327_v62, %v1794_v15 }
  0x50   :  { %vm1882_vm14 = vcmp.eq.f32.partialorder %v501_v49, 8.507059e+37  ;;  %vm512_vm15 = vweird.f32 %v1812_v20  ;;  %v516_v8 = vand.u32 2147483647, %v1812_v20  ;;  %v518_v9 = vand.u32 2147483648, %v1812_v20 }
  0x51   :  { %v1329_v51 = vpop.eup %1328  ;;  %v1890_v10 = vmax.f32 %v1864_v61, 1e-06  ;;  %v1893_v12 = vmul.f32 %v1606_v39, %v105_v52  ;;  %v485_v13 = vsel %vm1871_vm12, %v1325_v24, %v481_v4  ;;  %v494_v0 = vsub.f32 1.0, %v493_v5 }
  0x52   :  { %vm498_vm0 = vweird.f32 %v1327_v62  ;;  %v508_v16 = vmul.f32 %v1329_v51, %v1812_v20  ;;  %v490_v18 = vsel %vm1859_vm11, %v489_v60, %v485_v13  ;;  %v504_v19 = vor.u32 1.1754944e-38, %v503_v53 }
  0x53   :  { %v531_v23 = vand.u32 2147483647, %v1857_v57  ;;  %1332 = vrcp.f32 %v1890_v10  ;;  %v491_v25 = vmul.f32 %v490_v18, %v1791_v14  ;;  %v495_v11 = vmul.f32 %v1327_v62, %v494_v0  ;;  %vm1908_vm2 = vmor %vm497_vm13, %vm498_vm0 }
  0x54   :  { %v509_v24 = vsub.f32 1.0, %v508_v16  ;;  %vm513_vm1 = vweird.f32 %v1329_v51  ;;  %vm1912_vm3 = vcmp.eq.f32.partialorder %v516_v8, 8.507059e+37  ;;  %v519_v32 = vor.u32 1.1754944e-38, %v518_v9 }
  0x55   :  { %v1331_v28 = vpop.eup %1330  ;;  %v1917_v34 = vmax.f32 %v1893_v12, 1e-06  ;;  %v1920_v35 = vmul.f32 %v1608_v40, %v106_v17  ;;  %691 = vmatpush.msra.mxu0 %v491_v25  ;;  %v496_v42 = vadd.f32 %v1327_v62, %v495_v11  ;;  %vm527_vm5 = vweird.f32 %v1857_v57  ;;  %vm1929_vm6 = vmor %vm512_vm15, %vm513_vm1 }
  0x56   :  { %v510_v43 = vmul.f32 %v1329_v51, %v509_v24  ;;  %v523_v15 = vmul.f32 %v1331_v28, %v1857_v57  ;;  %vm1933_vm7 = vcmp.eq.f32.partialorder %v531_v23, 8.507059e+37  ;;  %v533_v49 = vand.u32 2147483648, %v1857_v57  ;;  %v89_v24 = vld [vmem:[%s2554_s3 + $0x28] sm:$0xff] }
  0x57   :  { %v426_v50 = vand.u32 2147483647, %v1890_v10  ;;  %1334 = vrcp.f32 %v1917_v34  ;;  %v500_v54 = vsel %vm1908_vm2, %v1327_v62, %v496_v42  ;;  %vm528_vm8 = vweird.f32 %v1331_v28 }
  0x58   :  { %v511_v58 = vadd.f32 %v1329_v51, %v510_v43  ;;  %v524_v59 = vsub.f32 1.0, %v523_v15  ;;  %v505_v60 = vsel %vm1882_vm14, %v504_v19, %v500_v54  ;;  %v428_v52 = vand.u32 2147483648, %v1890_v10  ;;  %vm1959_vm9 = vmor %vm527_vm5, %vm528_vm8  ;;  %v101_v15 = vld [vmem:[%s2554_s3 + $0x88] sm:$0xff] }
  0x59   :  { %v1333_v20 = vpop.eup %1332  ;;  %v1946_v22 = vmax.f32 %v1920_v35, 1e-06  ;;  %v1949_v53 = vmul.f32 %v1636_v56, %v107_v2  ;;  %v506_v4 = vmul.f32 %v505_v60, %v1837_v45  ;;  %v534_v13 = vor.u32 1.1754944e-38, %v533_v49 }
  0x5a   :  { %v515_v62 = vsel %vm1929_vm6, %v1329_v51, %v511_v58  ;;  %v525_v5 = vmul.f32 %v1331_v28, %v524_v59  ;;  %v418_v8 = vmul.f32 %v1333_v20, %v1890_v10  ;;  %vm422_vm10 = vweird.f32 %v1890_v10 }
  0x5b   :  { %v520_v33 = vsel %vm1912_vm3, %v519_v32, %v515_v62  ;;  %vm423_vm4 = vweird.f32 %v1333_v20  ;;  %720 = vmatpush.msra.mxu1 %v506_v4  ;;  %1336 = vrcp.f32 %v1946_v22  ;;  %vm1966_vm11 = vcmp.eq.f32.partialorder %v426_v50, 8.507059e+37  ;;  %v100_v32 = vld [vmem:[%s2554_s3 + $0x80] sm:$0xff] }
  0x5c   :  { %v521_v0 = vmul.f32 %v520_v33, %v1851_v46  ;;  %v526_v51 = vadd.f32 %v1331_v28, %v525_v5  ;;  %v419_v16 = vsub.f32 1.0, %v418_v8  ;;  %v429_v57 = vor.u32 1.1754944e-38, %v428_v52  ;;  %vm1989_vm12 = vmor %vm422_vm10, %vm423_vm4  ;;  %v102_v8 = vld [vmem:[%s2554_s3 + $0x90] sm:$0xff] }
  0x5d   :  { %v1335_v17 = vpop.eup %1334  ;;  %v441_v19 = vand.u32 2147483647, %v1917_v34  ;;  %v1972_v23 = vmax.f32 %v1949_v53, 1e-06  ;;  %v443_v30 = vand.u32 2147483648, %v1917_v34  ;;  %vm437_vm13 = vweird.f32 %v1917_v34 }
  0x5e   :  { %749 = vmatpush.msra.mxu2 %v521_v0  ;;  %v530_v25 = vsel %vm1959_vm9, %v1331_v28, %v526_v51  ;;  %v420_v11 = vmul.f32 %v1333_v20, %v419_v16  ;;  %v433_v29 = vmul.f32 %v1335_v17, %v1917_v34  ;;  %v458_v43 = vand.u32 2147483648, %v1946_v22 }
  0x5f   :  { %v535_v42 = vsel %vm1933_vm7, %v534_v13, %v530_v25  ;;  %1338 = vrcp.f32 %v1972_v23  ;;  %vm438_vm14 = vweird.f32 %v1335_v17  ;;  %v2001_v10 = vmul.f32 %v1606_v39, %v89_v24 }
  0x60   :  { %v536_v2 = vmul.f32 %v535_v42, %v1854_v55  ;;  %v421_v47 = vadd.f32 %v1333_v20, %v420_v11  ;;  %v434_v48 = vsub.f32 1.0, %v433_v29  ;;  %vm2003_vm15 = vcmp.eq.f32.partialorder %v441_v19, 8.507059e+37  ;;  %vm2019_vm0 = vmor %vm437_vm13, %vm438_vm14  ;;  %v91_v42 = vld [vmem:[%s2554_s3 + $0x38] sm:$0xff] }
  0x61   :  { %v2008_v50 = vmul.f32 %v1603_v37, %v100_v32  ;;  %v1337_v54 = vpop.eup %1336  ;;  %v444_v60 = vor.u32 1.1754944e-38, %v443_v30  ;;  %v2013_v52 = vmul.f32 %v1606_v39, %v101_v15  ;;  %vm452_vm1 = vweird.f32 %v1946_v22  ;;  %v86_v32 = vld [vmem:[%s2554_s3 + $0x10] sm:$0xff] }
  0x62   :  { %778 = vmatpush.msra.mxu3 %v536_v2  ;;  %v425_v58 = vsel %vm1989_vm12, %v1333_v20, %v421_v47  ;;  %v435_v59 = vmul.f32 %v1335_v17, %v434_v48  ;;  %v448_v5 = vmul.f32 %v1337_v54, %v1946_v22  ;;  %v456_v20 = vand.u32 2147483647, %v1946_v22  ;;  %v84_v47 = vld [vmem:[%s2554_s3] sm:$0xff] }
  0x63   :  { %v430_v4 = vsel %vm1966_vm11, %v429_v57, %v425_v58  ;;  %v459_v13 = vor.u32 1.1754944e-38, %v458_v43  ;;  %v2031_v34 = vmax.f32 %v2008_v50, 1e-06  ;;  %vm453_vm2 = vweird.f32 %v1337_v54  ;;  %v90_v57 = vld [vmem:[%s2554_s3 + $0x30] sm:$0xff]  ;;  %v103_v43 = vld [vmem:[%s2554_s3 + $0x98] sm:$0xff] }
  0x64   :  { %v431_v33 = vmul.f32 %v430_v4, %v1879_v1  ;;  %v436_v9 = vadd.f32 %v1335_v17, %v435_v59  ;;  %v449_v51 = vsub.f32 1.0, %v448_v5  ;;  %vm467_vm3 = vweird.f32 %v1972_v23  ;;  %vm2054_vm5 = vmor %vm452_vm1, %vm453_vm2 }
  0x65   :  { %v1339_v0 = vpop.eup %1338  ;;  %v2035_v16 = vmax.f32 %v2013_v52, 1e-06  ;;  %1340 = vrcp.f32 %v2031_v34  ;;  %v2045_v25 = vmul.f32 %v1608_v40, %v102_v8  ;;  %v471_v29 = vand.u32 2147483647, %v1972_v23 }
  0x66   :  { %692 = vmatpush.msra.mxu0 %v431_v33  ;;  %v440_v18 = vsel %vm2019_vm0, %v1335_v17, %v436_v9  ;;  %v463_v19 = vmul.f32 %v1339_v0, %v1972_v23  ;;  %v450_v24 = vmul.f32 %v1337_v54, %v449_v51  ;;  %v473_v30 = vand.u32 2147483648, %v1972_v23 }
  0x67   :  { %v445_v11 = vsel %vm2003_vm15, %v444_v60, %v440_v18  ;;  %vm468_vm6 = vweird.f32 %v1339_v0  ;;  %1342 = vrcp.f32 %v2035_v16  ;;  %v2066_v15 = vmul.f32 %v1608_v40, %v90_v57 }
  0x68   :  { %v446_v17 = vmul.f32 %v445_v11, %v2001_v10  ;;  %v464_v28 = vsub.f32 1.0, %v463_v19  ;;  %v451_v22 = vadd.f32 %v1337_v54, %v450_v24  ;;  %vm457_vm7 = vcmp.eq.f32.partialorder %v456_v20, 8.507059e+37  ;;  %vm2081_vm8 = vmor %vm467_vm3, %vm468_vm6 }
  0x69   :  { %v2072_v48 = vmax.f32 %v2045_v25, 1e-06  ;;  %v2077_v58 = vmul.f32 %v1636_v56, %v91_v42  ;;  %v474_v60 = vor.u32 1.1754944e-38, %v473_v30  ;;  %v2086_v4 = vmul.f32 %v1636_v56, %v103_v43 }
  0x6a   :  { %721 = vmatpush.msra.mxu1 %v446_v17  ;;  %v465_v2 = vmul.f32 %v1339_v0, %v464_v28  ;;  %v455_v49 = vsel %vm2054_vm5, %v1337_v54, %v451_v22  ;;  %vm472_vm9 = vcmp.eq.f32.partialorder %v471_v29, 8.507059e+37  ;;  %v2091_v8 = vmul.f32 %v1603_v37, %v84_v47  ;;  %v85_v37 = vld [vmem:[%s2554_s3 + $0x8] sm:$0xff] }
  0x6b   :  { %v1341_v62 = vpop.eup %1340  ;;  %v460_v5 = vsel %vm457_vm7, %v459_v13, %v455_v49  ;;  %1344 = vrcp.f32 %v2072_v48  ;;  %vm362_vm10 = vweird.f32 %v2031_v34  ;;  %v366_v51 = vand.u32 2147483647, %v2031_v34 }
  0x6c   :  { %v466_v20 = vadd.f32 %v1339_v0, %v465_v2  ;;  %v461_v54 = vmul.f32 %v460_v5, %v2066_v15  ;;  %v358_v23 = vmul.f32 %v1341_v62, %v2031_v34  ;;  %v368_v13 = vand.u32 2147483648, %v2031_v34  ;;  %v632_v34 = vld [vmem:[%s2559_s5 + $0x18] sm:$0xff] }
  0x6d   :  { %v1343_v33 = vpop.eup %1342  ;;  %v2100_v18 = vmax.f32 %v2086_v4, 1e-06  ;;  %vm363_vm4 = vweird.f32 %v1341_v62  ;;  %v383_v29 = vand.u32 2147483648, %v2035_v16  ;;  %vm377_vm11 = vweird.f32 %v2035_v16 }
  0x6e   :  { %v470_v9 = vsel %vm2081_vm8, %v1339_v0, %v466_v20  ;;  %750 = vmatpush.msra.mxu2 %v461_v54  ;;  %v359_v19 = vsub.f32 1.0, %v358_v23  ;;  %v373_v11 = vmul.f32 %v1343_v33, %v2035_v16  ;;  %v381_v0 = vand.u32 2147483647, %v2035_v16  ;;  %vm2116_vm13 = vmor %vm362_vm10, %vm363_vm4 }
  0x6f   :  { %v475_v57 = vsel %vm472_vm9, %v474_v60, %v470_v9  ;;  %1346 = vrcp.f32 %v2100_v18  ;;  %vm378_vm12 = vweird.f32 %v1343_v33  ;;  %v369_v43 = vor.u32 1.1754944e-38, %v368_v13 }
  0x70   :  { %v476_v24 = vmul.f32 %v475_v57, %v2077_v58  ;;  %v360_v30 = vmul.f32 %v1341_v62, %v359_v19  ;;  %v374_v17 = vsub.f32 1.0, %v373_v11  ;;  %v2121_v22 = vmul.f32 %v1606_v39, %v85_v37  ;;  %vm2126_vm15 = vmor %vm377_vm11, %vm378_vm12 }
  0x71   :  { %v1345_v42 = vpop.eup %1344  ;;  %v396_v2 = vand.u32 2147483647, %v2072_v48  ;;  %v398_v16 = vand.u32 2147483648, %v2072_v48  ;;  %vm367_vm14 = vcmp.eq.f32.partialorder %v366_v51, 8.507059e+37  ;;  %vm2130_vm0 = vcmp.eq.f32.partialorder %v381_v0, 8.507059e+37 }
  0x72   :  { %779 = vmatpush.msra.mxu3 %v476_v24  ;;  %v361_v47 = vadd.f32 %v1341_v62, %v360_v30  ;;  %v375_v49 = vmul.f32 %v1343_v33, %v374_v17  ;;  %v388_v59 = vmul.f32 %v1345_v42, %v2072_v48  ;;  %v384_v5 = vor.u32 1.1754944e-38, %v383_v29 }
  0x73   :  { %v2135_v39 = vmul.f32 %v1608_v40, %v86_v32  ;;  %vm392_vm1 = vweird.f32 %v2072_v48  ;;  %vm393_vm2 = vweird.f32 %v1345_v42  ;;  %vm2140_vm3 = vcmp.eq.f32.partialorder %v396_v2, 8.507059e+37  ;;  %v87_v32 = vld [vmem:[%s2554_s3 + $0x18] sm:$0xff] }
  0x74   :  { %v365_v20 = vsel %vm2116_vm13, %v1341_v62, %v361_v47  ;;  %v376_v54 = vadd.f32 %v1343_v33, %v375_v49  ;;  %v389_v23 = vsub.f32 1.0, %v388_v59  ;;  %v399_v57 = vor.u32 1.1754944e-38, %v398_v16  ;;  %v629_v62 = vld [vmem:[%s2559_s5] sm:$0xff]  ;;  %vm394_vm6 = vmor %vm392_vm1, %vm393_vm2 }
  0x75   :  { %v1347_v9 = vpop.eup %1346  ;;  %v370_v51 = vsel %vm367_vm14, %v369_v43, %v365_v20  ;;  %vm665_vm5 = vcmask 523264   ;;  %vm407_vm7 = vweird.f32 %v2100_v18  ;;  %v411_v0 = vand.u32 2147483647, %v2100_v18 }
  0x76   :  { %v371_v19 = vmul.f32 %v370_v51, %v2091_v8  ;;  %v380_v40 = vsel %vm2126_vm15, %v1343_v33, %v376_v54  ;;  %v390_v37 = vmul.f32 %v1345_v42, %v389_v23  ;;  %v403_v11 = vmul.f32 %v1347_v9, %v2100_v18 }
  0x77   :  { %v385_v24 = vsel %vm2130_vm0, %v384_v5, %v380_v40  ;;  %v413_v29 = vand.u32 2147483648, %v2100_v18  ;;  %vm408_vm8 = vweird.f32 %v1347_v9  ;;  %v2168_v16 = vmul.f32 %v1636_v56, %v87_v32  ;;  %v631_v56 = vld [vmem:[%s2559_s5 + $0x10] sm:$0xff] }
  0x78   :  { %693 = vmatpush.msra.mxu0 %v371_v19  ;;  %v386_v33 = vmul.f32 %v385_v24, %v2121_v22  ;;  %v391_v30 = vadd.f32 %v1345_v42, %v390_v37  ;;  %v404_v17 = vsub.f32 1.0, %v403_v11  ;;  %vm409_vm9 = vmor %vm407_vm7, %vm408_vm8  ;;  %vm412_vm10 = vcmp.eq.f32.partialorder %v411_v0, 8.507059e+37 }
  0x79   :  { %1279 = vmatmul.msk.f32.vlgmr.msra.gmra.mxu0 %vm665_vm5, %v629_v62  ;;  %v414_v18 = vor.u32 1.1754944e-38, %v413_v29 }
  0x7a   :  { %722 = vmatpush.msra.mxu1 %v386_v33  ;;  %v395_v48 = vsel %vm394_vm6, %v1345_v42, %v391_v30  ;;  %v405_v28 = vmul.f32 %v1347_v9, %v404_v17  ;;  %v630_v42 = vld [vmem:[%s2559_s5 + $0x8] sm:$0xff] }
  0x7b   :  { %v400_v43 = vsel %vm2140_vm3, %v399_v57, %v395_v48  ;;  %1283 = vmatmul.msk.f32.vlgmr.msra.gmra.mxu1 %vm665_vm5, %v629_v62 }
  0x7c   :  { %v401_v2 = vmul.f32 %v400_v43, %v2135_v39  ;;  %v406_v47 = vadd.f32 %v1347_v9, %v405_v28 }
  0x7e   :  { %751 = vmatpush.msra.mxu2 %v401_v2  ;;  %v410_v49 = vsel %vm409_vm9, %v1347_v9, %v406_v47 }
  0x7f   :  { %v415_v59 = vsel %vm412_vm10, %v414_v18, %v410_v49  ;;  %1287 = vmatmul.msk.f32.vlgmr.msra.gmra.mxu2 %vm665_vm5, %v629_v62 }
  0x80   :  { %v416_v60 = vmul.f32 %v415_v59, %v2168_v16 }
  0x81   :  { %1280 = vmatmul.msk.f32.gmra.mxu0 %vm665_vm5, %v630_v42 }
  0x82   :  { %780 = vmatpush.msra.mxu3 %v416_v60 }
  0x83   :  { %1291 = vmatmul.msk.f32.vlgmr.msra.gmra.mxu3 %vm665_vm5, %v629_v62  ;;  %1284 = vmatmul.msk.f32.gmra.mxu1 %vm665_vm5, %v630_v42 }
  0x87   :  { %1288 = vmatmul.msk.f32.gmra.mxu2 %vm665_vm5, %v630_v42 }
  0x89   :  { %1281 = vmatmul.msk.f32.gmra.mxu0 %vm665_vm5, %v631_v56 }
  0x8b   :  { %1292 = vmatmul.msk.f32.gmra.mxu3 %vm665_vm5, %v630_v42  ;;  %1285 = vmatmul.msk.f32.gmra.mxu1 %vm665_vm5, %v631_v56 }
  0x8f   :  { %1289 = vmatmul.msk.f32.gmra.mxu2 %vm665_vm5, %v631_v56 }
  0x91   :  { %1282 = vmatmul.msk.f32.gmra.mxu0 %vm665_vm5, %v632_v34 }
  0x93   :  { %1293 = vmatmul.msk.f32.gmra.mxu3 %vm665_vm5, %v631_v56  ;;  %1286 = vmatmul.msk.f32.gmra.mxu1 %vm665_vm5, %v632_v34 }
  0x97   :  { %1290 = vmatmul.msk.f32.gmra.mxu2 %vm665_vm5, %v632_v34 }
  0x9b   :  { %1294 = vmatmul.msk.f32.gmra.mxu3 %vm665_vm5, %v632_v34 }
  0xf6   :  { %v695_v5 = vpop.f32.mrf.mxu0 }
  0xf7   :  { %v1295_v20 = vmul.f32 -1.442695, %v695_v5 }
  0xf8   :  { %v724_v54 = vpop.f32.mrf.mxu1 }
  0xf9   :  { %1348 = vpow2.f32 %v1295_v20  ;;  %v1296_v23 = vmul.f32 -1.442695, %v724_v54 }
  0xfb   :  { %1350 = vpow2.f32 %v1296_v23 }
  0xfe   :  { %v698_v9 = vpop.f32.mrf.mxu0 }
  0xff   :  { %v1349_v51 = vpop.eup %1348  ;;  %v1299_v13 = vmul.f32 -1.442695, %v698_v9 }
 0x100   :  { %v842_v57 = vadd.f32 1.0, %v1349_v51  ;;  %v727_v19 = vpop.f32.mrf.mxu1 }
 0x101   :  { %v1351_v40 = vpop.eup %1350  ;;  %1352 = vpow2.f32 %v1299_v13  ;;  %v1300_v37 = vmul.f32 -1.442695, %v727_v19 }
 0x102   :  { %1354 = vrcp.f32 %v842_v57  ;;  %v753_v11 = vpop.f32.mrf.mxu2  ;;  %v2194_v62 = vadd.f32 1.0, %v1351_v40  ;;  %v867_v0 = vand.u32 2147483647, %v842_v57  ;;  %v869_v29 = vand.u32 2147483648, %v842_v57 }
 0x103   :  { %v1297_v24 = vmul.f32 -1.442695, %v753_v11  ;;  %1356 = vpow2.f32 %v1300_v37  ;;  %vm863_vm4 = vweird.f32 %v842_v57 }
 0x104   :  { %1358 = vrcp.f32 %v2194_v62  ;;  %v882_v48 = vand.u32 2147483647, %v2194_v62  ;;  %vm2200_vm11 = vcmp.eq.f32.partialorder %v867_v0, 8.507059e+37  ;;  %v870_v49 = vor.u32 1.1754944e-38, %v869_v29 }
 0x105   :  { %1360 = vpow2.f32 %v1297_v24  ;;  %v884_v42 = vand.u32 2147483648, %v2194_v62  ;;  %vm878_vm12 = vweird.f32 %v2194_v62 }
 0x106   :  { %v782_v33 = vpop.f32.mrf.mxu3  ;;  %v701_v2 = vpop.f32.mrf.mxu0  ;;  %vm2210_vm14 = vcmp.eq.f32.partialorder %v882_v48, 8.507059e+37 }
 0x107   :  { %v1353_v30 = vpop.eup %1352  ;;  %v1298_v17 = vmul.f32 -1.442695, %v782_v33  ;;  %v1303_v51 = vmul.f32 -1.442695, %v701_v2  ;;  %v885_v11 = vor.u32 1.1754944e-38, %v884_v42 }
 0x108   :  { %v1355_v32 = vpop.eup %1354  ;;  %v2198_v28 = vadd.f32 1.0, %v1353_v30  ;;  %v730_v20 = vpop.f32.mrf.mxu1 }
 0x109   :  { %v1357_v43 = vpop.eup %1356  ;;  %v859_v18 = vmul.f32 %v1355_v32, %v842_v57  ;;  %1362 = vpow2.f32 %v1298_v17  ;;  %vm864_vm13 = vweird.f32 %v1355_v32  ;;  %v2218_v24 = vmul.f32 -1.442695, %v730_v20  ;;  %v1412_v20 = vld [vmem:[%s1478_s8] sm:$0xff] }
 0x10a   :  { %1364 = vrcp.f32 %v2198_v28  ;;  %v756_v59 = vpop.f32.mrf.mxu2  ;;  %v1359_v60 = vpop.eup %1358  ;;  %v2207_v34 = vadd.f32 1.0, %v1357_v43  ;;  %v929_v40 = vand.u32 2147483648, %v2198_v28  ;;  %vm923_vm15 = vweird.f32 %v2198_v28  ;;  %vm865_vm0 = vmor %vm863_vm4, %vm864_vm13 }
 0x10b   :  { %v860_v56 = vsub.f32 1.0, %v859_v18  ;;  %v1301_v5 = vmul.f32 -1.442695, %v756_v59  ;;  %v1361_v54 = vpop.eup %1360  ;;  %v874_v23 = vmul.f32 %v1359_v60, %v2194_v62  ;;  %v927_v33 = vand.u32 2147483647, %v2198_v28 }
 0x10c   :  { %v2214_v19 = vadd.f32 1.0, %v1361_v54  ;;  %1366 = vrcp.f32 %v2207_v34  ;;  %vm879_vm1 = vweird.f32 %v1359_v60  ;;  %v930_v2 = vor.u32 1.1754944e-38, %v929_v40 }
 0x10d   :  { %v861_v13 = vmul.f32 %v1355_v32, %v860_v56  ;;  %v875_v37 = vsub.f32 1.0, %v874_v23  ;;  %1368 = vpow2.f32 %v1301_v5  ;;  %v942_v42 = vand.u32 2147483647, %v2207_v34  ;;  %vm880_vm2 = vmor %vm878_vm12, %vm879_vm1 }
 0x10e   :  { %1370 = vrcp.f32 %v2214_v19  ;;  %v897_v5 = vand.u32 2147483647, %v2214_v19  ;;  %v899_v23 = vand.u32 2147483648, %v2214_v19  ;;  %vm2244_vm3 = vcmp.eq.f32.partialorder %v927_v33, 8.507059e+37 }
 0x10f   :  { %v1363_v0 = vpop.eup %1362  ;;  %v862_v29 = vadd.f32 %v1355_v32, %v861_v13  ;;  %v876_v17 = vmul.f32 %v1359_v60, %v875_v37  ;;  %1372 = vpow2.f32 %v1303_v51  ;;  %vm938_vm5 = vweird.f32 %v2207_v34 }
 0x110   :  { %v2223_v30 = vpop.eup %1364  ;;  %v2227_v48 = vadd.f32 1.0, %v1363_v0  ;;  %vm893_vm6 = vweird.f32 %v2214_v19  ;;  %vm2259_vm7 = vcmp.eq.f32.partialorder %v942_v42, 8.507059e+37  ;;  %vm2266_vm8 = vcmp.eq.f32.partialorder %v897_v5, 8.507059e+37 }
 0x111   :  { %v866_v43 = vsel %vm865_vm0, %v1355_v32, %v862_v29  ;;  %v919_v18 = vmul.f32 %v2223_v30, %v2198_v28  ;;  %v877_v56 = vadd.f32 %v1359_v60, %v876_v17  ;;  %v785_v29 = vpop.f32.mrf.mxu3  ;;  %v1413_v17 = vld [vmem:[%s1478_s8 + $0x8] sm:$0xff]  ;;  %vm924_vm9 = vweird.f32 %v2223_v30 }
 0x112   :  { %v871_v59 = vsel %vm2200_vm11, %v870_v49, %v866_v43  ;;  %1374 = vrcp.f32 %v2227_v48  ;;  %v2236_v57 = vpop.eup %1366  ;;  %v900_v9 = vor.u32 1.1754944e-38, %v899_v23  ;;  %vm925_vm11 = vmor %vm923_vm15, %vm924_vm9  ;;  %vm908_vm15 = vweird.f32 %v2227_v48 }
 0x113   :  { %v1098_v54 = vmul.f32 %v1412_v20, %v871_v59  ;;  %v1146_v32 = vadd.f32 %v871_v59, %v2008_v50  ;;  %v1369_v49 = vpop.eup %1368  ;;  %v881_v51 = vsel %vm880_vm2, %v1359_v60, %v877_v56  ;;  %v920_v13 = vsub.f32 1.0, %v919_v18 }
 0x114   :  { %v934_v40 = vmul.f32 %v2236_v57, %v2207_v34  ;;  %v944_v50 = vand.u32 2147483648, %v2207_v34  ;;  %v1371_v37 = vpop.eup %1370  ;;  %v886_v0 = vsel %vm2210_vm14, %v885_v11, %v881_v51  ;;  %v912_v11 = vand.u32 2147483647, %v2227_v48 }
 0x115   :  { %v1114_v62 = vadd.f32 %v1098_v54, %v2091_v8  ;;  %1162 = vst [vmem:[%s2556_s7 + $0x80] sm:$0xff] %v1146_v32  ;;  %v1373_v33 = vpop.eup %1372  ;;  %v1099_v43 = vmul.f32 %v1413_v17, %v886_v0  ;;  %v1147_v18 = vadd.f32 %v886_v0, %v2013_v52  ;;  %v889_v8 = vmul.f32 %v1371_v37, %v2214_v19 }
 0x116   :  { %v921_v42 = vmul.f32 %v2223_v30, %v920_v13  ;;  %v935_v56 = vsub.f32 1.0, %v934_v40  ;;  %v2280_v54 = vadd.f32 1.0, %v1369_v49  ;;  %v1302_v32 = vmul.f32 -1.442695, %v785_v29 }
 0x117   :  { %1130 = vst [vmem:[%s2556_s7] sm:$0xff] %v1114_v62  ;;  %v1115_v52 = vadd.f32 %v1099_v43, %v2121_v22  ;;  %v890_v5 = vsub.f32 1.0, %v889_v8  ;;  %vm939_vm10 = vweird.f32 %v2236_v57  ;;  %vm894_vm4 = vweird.f32 %v1371_v37 }
 0x118   :  { %v1375_v20 = vpop.eup %1374  ;;  %1163 = vst [vmem:[%s2556_s7 + $0x88] sm:$0xff] %v1147_v18  ;;  %v922_v23 = vadd.f32 %v2223_v30, %v921_v42  ;;  %v936_v62 = vmul.f32 %v2236_v57, %v935_v56  ;;  %v914_v13 = vand.u32 2147483648, %v2227_v48  ;;  %1376 = vrcp.f32 %v2280_v54  ;;  %vm940_vm13 = vmor %vm938_vm5, %vm939_vm10  ;;  %v1414_v18 = vld [vmem:[%s1478_s8 + $0x20] sm:$0xff] }
 0x119   :  { %v904_v51 = vmul.f32 %v1375_v20, %v2227_v48  ;;  %1131 = vst [vmem:[%s2556_s7 + $0x8] sm:$0xff] %v1115_v52  ;;  %v891_v22 = vmul.f32 %v1371_v37, %v890_v5  ;;  %v945_v29 = vor.u32 1.1754944e-38, %v944_v50  ;;  %vm909_vm12 = vweird.f32 %v1375_v20  ;;  %vm895_vm14 = vmor %vm893_vm6, %vm894_vm4  ;;  %v1416_v52 = vld [vmem:[%s1478_s8 + $0x10] sm:$0xff]  ;;  %v759_v5 = vpop.f32.mrf.mxu2 }
 0x11a   :  { %v926_v40 = vsel %vm925_vm11, %v2223_v30, %v922_v23  ;;  %v937_v0 = vadd.f32 %v2236_v57, %v936_v62  ;;  %1378 = vpow2.f32 %v1302_v32  ;;  %vm910_vm0 = vmor %vm908_vm15, %vm909_vm12  ;;  %vm913_vm1 = vcmp.eq.f32.partialorder %v912_v11, 8.507059e+37  ;;  %v1417_v23 = vld [vmem:[%s1478_s8 + $0x18] sm:$0xff] }
 0x11b   :  { %v905_v49 = vsub.f32 1.0, %v904_v51  ;;  %v892_v17 = vadd.f32 %v1371_v37, %v891_v22  ;;  %v931_v43 = vsel %vm2244_vm3, %v930_v2, %v926_v40  ;;  %v2309_v2 = vadd.f32 1.0, %v1373_v33 }
 0x11c   :  { %v1102_v30 = vmul.f32 %v1414_v18, %v931_v43  ;;  %v1150_v8 = vadd.f32 %v931_v43, %v1864_v61  ;;  %v941_v50 = vsel %vm940_vm13, %v2236_v57, %v937_v0  ;;  %v1415_v61 = vld [vmem:[%s1478_s8 + $0x28] sm:$0xff]  ;;  %v915_v33 = vor.u32 1.1754944e-38, %v914_v13  ;;  %v704_v0 = vpop.f32.mrf.mxu0 }
 0x11d   :  { %v906_v28 = vmul.f32 %v1375_v20, %v905_v49  ;;  %v896_v42 = vsel %vm895_vm14, %v1371_v37, %v892_v17  ;;  %v946_v34 = vsel %vm2259_vm7, %v945_v29, %v941_v50  ;;  %1380 = vrcp.f32 %v2309_v2  ;;  %v788_v49 = vpop.f32.mrf.mxu3  ;;  %v733_v29 = vpop.f32.mrf.mxu1 }
 0x11e   :  { %v901_v19 = vsel %vm2266_vm8, %v900_v9, %v896_v42  ;;  %v1118_v56 = vadd.f32 %v1102_v30, %v1879_v1  ;;  %1166 = vst [vmem:[%s2556_s7 + $0xa0] sm:$0xff] %v1150_v8  ;;  %v1103_v57 = vmul.f32 %v1415_v61, %v946_v34  ;;  %v1377_v37 = vpop.eup %1376  ;;  %v957_v11 = vand.u32 2147483647, %v2280_v54 }
 0x11f   :  { %v907_v47 = vadd.f32 %v1375_v20, %v906_v28  ;;  %v1100_v48 = vmul.f32 %v1416_v52, %v901_v19  ;;  %v1148_v60 = vadd.f32 %v901_v19, %v2045_v25  ;;  %v949_v9 = vmul.f32 %v1377_v37, %v2280_v54 }
 0x120   :  { %1134 = vst [vmem:[%s2556_s7 + $0x20] sm:$0xff] %v1118_v56  ;;  %v1119_v1 = vadd.f32 %v1103_v57, %v2001_v10  ;;  %v1379_v32 = vpop.eup %1378  ;;  %1382 = vpow2.f32 %v2218_v24  ;;  %vm954_vm2 = vweird.f32 %v1377_v37  ;;  %vm953_vm3 = vweird.f32 %v2280_v54  ;;  %v1418_v56 = vld [vmem:[%s1478_s8 + $0x30] sm:$0xff] }
 0x121   :  { %v911_v59 = vsel %vm910_vm0, %v1375_v20, %v907_v47  ;;  %v1116_v25 = vadd.f32 %v1100_v48, %v2135_v39  ;;  %1164 = vst [vmem:[%s2556_s7 + $0x90] sm:$0xff] %v1148_v60  ;;  %v1151_v20 = vadd.f32 %v946_v34, %v1893_v12  ;;  %v950_v10 = vsub.f32 1.0, %v949_v9  ;;  %vm955_vm6 = vmor %vm953_vm3, %vm954_vm2  ;;  %v762_v60 = vpop.f32.mrf.mxu2 }
 0x122   :  { %v916_v51 = vsel %vm913_vm1, %v915_v33, %v911_v59  ;;  %1135 = vst [vmem:[%s2556_s7 + $0x28] sm:$0xff] %v1119_v1  ;;  %v2338_v13 = vadd.f32 1.0, %v1379_v32  ;;  %v959_v39 = vand.u32 2147483648, %v2280_v54  ;;  %v1305_v12 = vmul.f32 -1.442695, %v759_v5 }
 0x123   :  { %v1101_v62 = vmul.f32 %v1417_v23, %v916_v51  ;;  %v1149_v22 = vadd.f32 %v916_v51, %v2086_v4  ;;  %1132 = vst [vmem:[%s2556_s7 + $0x10] sm:$0xff] %v1116_v25  ;;  %v951_v4 = vmul.f32 %v1377_v37, %v950_v10  ;;  %v1381_v17 = vpop.eup %1380  ;;  %vm958_vm5 = vcmp.eq.f32.partialorder %v957_v11, 8.507059e+37 }
 0x124   :  { %1384 = vrcp.f32 %v2338_v13  ;;  %1167 = vst [vmem:[%s2556_s7 + $0xa8] sm:$0xff] %v1151_v20  ;;  %v979_v24 = vmul.f32 %v1381_v17, %v2309_v2  ;;  %v1306_v43 = vmul.f32 -1.442695, %v788_v49  ;;  %v960_v28 = vor.u32 1.1754944e-38, %v959_v39  ;;  %v1419_v39 = vld [vmem:[%s1478_s8 + $0x40] sm:$0xff] }
 0x125   :  { %v1117_v40 = vadd.f32 %v1101_v62, %v2168_v16  ;;  %1165 = vst [vmem:[%s2556_s7 + $0x98] sm:$0xff] %v1149_v22  ;;  %1386 = vpow2.f32 %v1305_v12  ;;  %v952_v16 = vadd.f32 %v1377_v37, %v951_v4  ;;  %vm983_vm7 = vweird.f32 %v2309_v2  ;;  %v791_v11 = vpop.f32.mrf.mxu3 }
 0x126   :  { %v1307_v18 = vmul.f32 -1.442695, %v704_v0  ;;  %v1308_v30 = vmul.f32 -1.442695, %v733_v29  ;;  %v980_v50 = vsub.f32 1.0, %v979_v24  ;;  %1388 = vpow2.f32 %v1306_v43  ;;  %v1383_v42 = vpop.eup %1382 }
 0x127   :  { %1133 = vst [vmem:[%s2556_s7 + $0x18] sm:$0xff] %v1117_v40  ;;  %v956_v8 = vsel %vm955_vm6, %v1377_v37, %v952_v16  ;;  %v987_v54 = vand.u32 2147483647, %v2309_v2  ;;  %vm984_vm8 = vweird.f32 %v1381_v17  ;;  %v989_v19 = vand.u32 2147483648, %v2309_v2 }
 0x128   :  { %v961_v34 = vsel %vm958_vm5, %v960_v28, %v956_v8  ;;  %1390 = vpow2.f32 %v1307_v18  ;;  %v981_v52 = vmul.f32 %v1381_v17, %v980_v50  ;;  %v2363_v48 = vadd.f32 1.0, %v1383_v42  ;;  %vm985_vm9 = vmor %vm983_vm7, %vm984_vm8  ;;  %v1420_v50 = vld [vmem:[%s1478_s8 + $0x38] sm:$0xff] }
 0x129   :  { %v1104_v61 = vmul.f32 %v1418_v56, %v961_v34  ;;  %v1152_v57 = vadd.f32 %v961_v34, %v1920_v35  ;;  %v972_v59 = vand.u32 2147483647, %v2338_v13  ;;  %1392 = vpow2.f32 %v1308_v30 }
 0x12a   :  { %v1385_v47 = vpop.eup %1384  ;;  %v974_v9 = vand.u32 2147483648, %v2338_v13  ;;  %v982_v5 = vadd.f32 %v1381_v17, %v981_v52  ;;  %1394 = vrcp.f32 %v2363_v48  ;;  %v990_v32 = vor.u32 1.1754944e-38, %v989_v19 }
 0x12b   :  { %v1387_v37 = vpop.eup %1386  ;;  %v964_v33 = vmul.f32 %v1385_v47, %v2338_v13  ;;  %v1120_v1 = vadd.f32 %v1104_v61, %v2066_v15  ;;  %1168 = vst [vmem:[%s2556_s7 + $0xb0] sm:$0xff] %v1152_v57  ;;  %v1309_v51 = vmul.f32 -1.442695, %v762_v60  ;;  %vm968_vm10 = vweird.f32 %v2338_v13 }
 0x12c   :  { %v2376_v25 = vadd.f32 1.0, %v1387_v37  ;;  %v1389_v15 = vpop.eup %1388  ;;  %v986_v20 = vsel %vm985_vm9, %v1381_v17, %v982_v5  ;;  %vm988_vm4 = vcmp.eq.f32.partialorder %v987_v54, 8.507059e+37  ;;  %vm969_vm11 = vweird.f32 %v1385_v47 }
 0x12d   :  { %v965_v35 = vsub.f32 1.0, %v964_v33  ;;  %1136 = vst [vmem:[%s2556_s7 + $0x30] sm:$0xff] %v1120_v1  ;;  %vm2382_vm12 = vcmp.eq.f32.partialorder %v972_v59, 8.507059e+37  ;;  %v991_v22 = vsel %vm988_vm4, %v990_v32, %v986_v20  ;;  %v975_v10 = vor.u32 1.1754944e-38, %v974_v9  ;;  %vm970_vm13 = vmor %vm968_vm10, %vm969_vm11 }
 0x12e   :  { %v1391_v23 = vpop.eup %1390  ;;  %v1106_v12 = vmul.f32 %v1419_v39, %v991_v22  ;;  %v1154_v49 = vadd.f32 %v991_v22, %v1723_v38  ;;  %1396 = vrcp.f32 %v2376_v25  ;;  %v2389_v0 = vadd.f32 1.0, %v1389_v15  ;;  %v1421_v22 = vld [vmem:[%s1478_s8 + $0x48] sm:$0xff] }
 0x12f   :  { %v966_v62 = vmul.f32 %v1385_v47, %v965_v35  ;;  %v1393_v40 = vpop.eup %1392  ;;  %1398 = vpow2.f32 %v1309_v51  ;;  %v1310_v29 = vmul.f32 -1.442695, %v791_v11  ;;  %v1002_v38 = vand.u32 2147483647, %v2363_v48 }
 0x130   :  { %v1395_v17 = vpop.eup %1394  ;;  %v1122_v16 = vadd.f32 %v1106_v12, %v1791_v14  ;;  %1170 = vst [vmem:[%s2556_s7 + $0xc0] sm:$0xff] %v1154_v49  ;;  %v1004_v24 = vand.u32 2147483648, %v2363_v48  ;;  %v2399_v43 = vadd.f32 1.0, %v1391_v23  ;;  %vm998_vm14 = vweird.f32 %v2363_v48 }
 0x131   :  { %v967_v4 = vadd.f32 %v1385_v47, %v966_v62  ;;  %v994_v18 = vmul.f32 %v1395_v17, %v2363_v48  ;;  %v1017_v13 = vand.u32 2147483647, %v2376_v25  ;;  %v1019_v30 = vand.u32 2147483648, %v2376_v25 }
 0x132   :  { %1138 = vst [vmem:[%s2556_s7 + $0x40] sm:$0xff] %v1122_v16  ;;  %1400 = vrcp.f32 %v2389_v0  ;;  %v2411_v8 = vadd.f32 1.0, %v1393_v40  ;;  %vm2415_vm15 = vcmp.eq.f32.partialorder %v1002_v38, 8.507059e+37  ;;  %v1005_v56 = vor.u32 1.1754944e-38, %v1004_v24 }
 0x133   :  { %v971_v28 = vsel %vm970_vm13, %v1385_v47, %v967_v4  ;;  %v995_v34 = vsub.f32 1.0, %v994_v18  ;;  %1402 = vpow2.f32 %v1310_v29  ;;  %vm1013_vm0 = vweird.f32 %v2376_v25 }
 0x134   :  { %v976_v14 = vsel %vm2382_vm12, %v975_v10, %v971_v28  ;;  %v1397_v19 = vpop.eup %1396  ;;  %1404 = vrcp.f32 %v2399_v43  ;;  %vm999_vm1 = vweird.f32 %v1395_v17  ;;  %vm2426_vm2 = vcmp.eq.f32.partialorder %v1017_v13, 8.507059e+37 }
 0x135   :  { %v1105_v54 = vmul.f32 %v1420_v50, %v976_v14  ;;  %v1153_v42 = vadd.f32 %v976_v14, %v1949_v53  ;;  %v1399_v61 = vpop.eup %1398  ;;  %v996_v53 = vmul.f32 %v1395_v17, %v995_v34  ;;  %v1009_v52 = vmul.f32 %v1397_v19, %v2376_v25  ;;  %vm1000_vm5 = vmor %vm998_vm14, %vm999_vm1 }
 0x136   :  { %v1020_v37 = vor.u32 1.1754944e-38, %v1019_v30  ;;  %v1032_v33 = vand.u32 2147483647, %v2389_v0  ;;  %v1034_v59 = vand.u32 2147483648, %v2389_v0  ;;  %vm1028_vm3 = vweird.f32 %v2389_v0 }
 0x137   :  { %v1121_v57 = vadd.f32 %v1105_v54, %v2077_v58  ;;  %1169 = vst [vmem:[%s2556_s7 + $0xb8] sm:$0xff] %v1153_v42  ;;  %v997_v58 = vadd.f32 %v1395_v17, %v996_v53  ;;  %v1010_v1 = vsub.f32 1.0, %v1009_v52  ;;  %1406 = vrcp.f32 %v2411_v8 }
 0x138   :  { %v1401_v9 = vpop.eup %1400  ;;  %vm1043_vm6 = vweird.f32 %v2399_v43  ;;  %v1047_v5 = vand.u32 2147483647, %v2399_v43  ;;  %v1049_v35 = vand.u32 2147483648, %v2399_v43  ;;  %v2442_v32 = vadd.f32 1.0, %v1399_v61 }
 0x139   :  { %1137 = vst [vmem:[%s2556_s7 + $0x38] sm:$0xff] %v1121_v57  ;;  %v1403_v51 = vpop.eup %1402  ;;  %v1001_v15 = vsel %vm1000_vm5, %v1395_v17, %v997_v58  ;;  %v1011_v20 = vmul.f32 %v1397_v19, %v1010_v1  ;;  %vm1014_vm7 = vweird.f32 %v1397_v19  ;;  %v1024_v11 = vmul.f32 %v1401_v9, %v2389_v0 }
 0x13a   :  { %v1405_v23 = vpop.eup %1404  ;;  %v1006_v48 = vsel %vm2415_vm15, %v1005_v56, %v1001_v15  ;;  %vm2447_vm8 = vcmp.eq.f32.partialorder %v1032_v33, 8.507059e+37  ;;  %v1035_v2 = vor.u32 1.1754944e-38, %v1034_v59  ;;  %1408 = vrcp.f32 %v2442_v32  ;;  %vm1015_vm9 = vmor %vm1013_vm0, %vm1014_vm7 }
 0x13b   :  { %v1107_v10 = vmul.f32 %v1421_v22, %v1006_v48  ;;  %v1155_v39 = vadd.f32 %v1006_v48, %v1762_v26  ;;  %v1012_v12 = vadd.f32 %v1397_v19, %v1011_v20  ;;  %v1025_v49 = vsub.f32 1.0, %v1024_v11 }
 0x13c   :  { %v1039_v40 = vmul.f32 %v1405_v23, %v2399_v43  ;;  %vm2457_vm10 = vcmp.eq.f32.partialorder %v1047_v5, 8.507059e+37  ;;  %v1050_v29 = vor.u32 1.1754944e-38, %v1049_v35  ;;  %vm1058_vm4 = vweird.f32 %v2411_v8  ;;  %v1424_v5 = vld [vmem:[%s1478_s8 + $0x60] sm:$0xff] }
 0x13d   :  { %v1407_v17 = vpop.eup %1406  ;;  %v1123_v16 = vadd.f32 %v1107_v10, %v1837_v45  ;;  %1171 = vst [vmem:[%s2556_s7 + $0xc8] sm:$0xff] %v1155_v39  ;;  %v1016_v26 = vsel %vm1015_vm9, %v1397_v19, %v1012_v12  ;;  %v1026_v25 = vmul.f32 %v1401_v9, %v1025_v49  ;;  %vm1029_vm11 = vweird.f32 %v1401_v9  ;;  %v1422_v45 = vld [vmem:[%s1478_s8 + $0x50] sm:$0xff] }
 0x13e   :  { %v1021_v38 = vsel %vm2426_vm2, %v1020_v37, %v1016_v26  ;;  %v1040_v24 = vsub.f32 1.0, %v1039_v40  ;;  %v1054_v28 = vmul.f32 %v1407_v17, %v2411_v8  ;;  %v1062_v18 = vand.u32 2147483647, %v2411_v8  ;;  %vm1030_vm12 = vmor %vm1028_vm3, %vm1029_vm11  ;;  %v1426_v10 = vld [vmem:[%s1478_s8 + $0x70] sm:$0xff] }
 0x13f   :  { %1139 = vst [vmem:[%s2556_s7 + $0x48] sm:$0xff] %v1123_v16  ;;  %v1108_v13 = vmul.f32 %v1422_v45, %v1021_v38  ;;  %v1156_v14 = vadd.f32 %v1021_v38, %v1771_v63  ;;  %v1027_v30 = vadd.f32 %v1401_v9, %v1026_v25  ;;  %v1064_v50 = vand.u32 2147483648, %v2411_v8  ;;  %v1427_v16 = vld [vmem:[%s1478_s8 + $0x78] sm:$0xff] }
 0x140   :  { %v1409_v54 = vpop.eup %1408  ;;  %v1041_v42 = vmul.f32 %v1405_v23, %v1040_v24  ;;  %vm1044_vm13 = vweird.f32 %v1405_v23  ;;  %v1055_v34 = vsub.f32 1.0, %v1054_v28  ;;  %v2478_v19 = vadd.f32 1.0, %v1403_v51 }
 0x141   :  { %v1124_v47 = vadd.f32 %v1108_v13, %v1851_v46  ;;  %1172 = vst [vmem:[%s2556_s7 + $0xd0] sm:$0xff] %v1156_v14  ;;  %v1031_v63 = vsel %vm1030_vm12, %v1401_v9, %v1027_v30  ;;  %vm1059_vm14 = vweird.f32 %v1407_v17  ;;  %v1069_v56 = vmul.f32 %v1409_v54, %v2442_v32  ;;  %v1423_v46 = vld [vmem:[%s1478_s8 + $0x58] sm:$0xff]  ;;  %vm1045_vm15 = vmor %vm1043_vm6, %vm1044_vm13 }
 0x142   :  { %v1036_v0 = vsel %vm2447_vm8, %v1035_v2, %v1031_v63  ;;  %v1042_v61 = vadd.f32 %v1405_v23, %v1041_v42  ;;  %v1056_v57 = vmul.f32 %v1407_v17, %v1055_v34  ;;  %1410 = vrcp.f32 %v2478_v19  ;;  %vm1060_vm0 = vmor %vm1058_vm4, %vm1059_vm14 }
 0x143   :  { %1140 = vst [vmem:[%s2556_s7 + $0x50] sm:$0xff] %v1124_v47  ;;  %v1109_v53 = vmul.f32 %v1423_v46, %v1036_v0  ;;  %v1157_v52 = vadd.f32 %v1036_v0, %v1822_v31  ;;  %v1065_v60 = vor.u32 1.1754944e-38, %v1064_v50  ;;  %v1070_v37 = vsub.f32 1.0, %v1069_v56 }
 0x144   :  { %v1046_v33 = vsel %vm1045_vm15, %v1405_v23, %v1042_v61  ;;  %v1057_v59 = vadd.f32 %v1407_v17, %v1056_v57  ;;  %v1077_v58 = vand.u32 2147483647, %v2442_v32  ;;  %v1079_v1 = vand.u32 2147483648, %v2442_v32  ;;  %v1425_v23 = vld [vmem:[%s1478_s8 + $0x68] sm:$0xff] }
 0x145   :  { %v1125_v9 = vadd.f32 %v1109_v53, %v1854_v55  ;;  %1173 = vst [vmem:[%s2556_s7 + $0xd8] sm:$0xff] %v1157_v52  ;;  %v1051_v31 = vsel %vm2457_vm10, %v1050_v29, %v1046_v33  ;;  %v1071_v43 = vmul.f32 %v1409_v54, %v1070_v37  ;;  %vm1074_vm1 = vweird.f32 %v1409_v54 }
 0x146   :  { %v1110_v35 = vmul.f32 %v1424_v5, %v1051_v31  ;;  %v1158_v51 = vadd.f32 %v1051_v31, %v1614_v41  ;;  %v1061_v15 = vsel %vm1060_vm0, %v1407_v17, %v1057_v59  ;;  %vm1063_vm2 = vcmp.eq.f32.partialorder %v1062_v18, 8.507059e+37 }
 0x147   :  { %1141 = vst [vmem:[%s2556_s7 + $0x58] sm:$0xff] %v1125_v9  ;;  %v1066_v55 = vsel %vm1063_vm2, %v1065_v60, %v1061_v15  ;;  %v1072_v20 = vadd.f32 %v1409_v54, %v1071_v43  ;;  %vm1073_vm3 = vweird.f32 %v2442_v32  ;;  %v1080_v62 = vor.u32 1.1754944e-38, %v1079_v1 }
 0x148   :  { %v1411_v8 = vpop.eup %1410  ;;  %v1126_v11 = vadd.f32 %v1110_v35, %v1668_v3  ;;  %1174 = vst [vmem:[%s2556_s7 + $0xe0] sm:$0xff] %v1158_v51  ;;  %v1111_v41 = vmul.f32 %v1425_v23, %v1066_v55  ;;  %v1159_v48 = vadd.f32 %v1066_v55, %v1618_v44  ;;  %vm1075_vm5 = vmor %vm1073_vm3, %vm1074_vm1  ;;  %vm1078_vm6 = vcmp.eq.f32.partialorder %v1077_v58, 8.507059e+37 }
 0x149   :  { %v1076_v2 = vsel %vm1075_vm5, %v1409_v54, %v1072_v20  ;;  %v1084_v22 = vmul.f32 %v1411_v8, %v2478_v19  ;;  %v1094_v49 = vand.u32 2147483648, %v2478_v19  ;;  %vm1089_vm7 = vweird.f32 %v1411_v8 }
 0x14a   :  { %1142 = vst [vmem:[%s2556_s7 + $0x60] sm:$0xff] %v1126_v11  ;;  %v1127_v3 = vadd.f32 %v1111_v41, %v1679_v27  ;;  %v1081_v32 = vsel %vm1078_vm6, %v1080_v62, %v1076_v2  ;;  %v1092_v4 = vand.u32 2147483647, %v2478_v19  ;;  %vm1088_vm8 = vweird.f32 %v2478_v19 }
 0x14b   :  { %1175 = vst [vmem:[%s2556_s7 + $0xe8] sm:$0xff] %v1159_v48  ;;  %v1112_v44 = vmul.f32 %v1426_v10, %v1081_v32  ;;  %v1160_v39 = vadd.f32 %v1081_v32, %v1622_v21  ;;  %v1085_v12 = vsub.f32 1.0, %v1084_v22  ;;  %vm1090_vm9 = vmor %vm1088_vm8, %vm1089_vm7  ;;  %v1095_v29 = vor.u32 1.1754944e-38, %v1094_v49 }
 0x14c   :  { %1143 = vst [vmem:[%s2556_s7 + $0x68] sm:$0xff] %v1127_v3  ;;  %vm1093_vm10 = vcmp.eq.f32.partialorder %v1092_v4, 8.507059e+37 }
 0x14d   :  { %v1128_v40 = vadd.f32 %v1112_v44, %v1686_v7  ;;  %1176 = vst [vmem:[%s2556_s7 + $0xf0] sm:$0xff] %v1160_v39  ;;  %v1086_v27 = vmul.f32 %v1411_v8, %v1085_v12 }
 0x14f   :  { %1144 = vst [vmem:[%s2556_s7 + $0x70] sm:$0xff] %v1128_v40  ;;  %v1087_v21 = vadd.f32 %v1411_v8, %v1086_v27 }
 0x151   :  { %v1091_v17 = vsel %vm1090_vm9, %v1411_v8, %v1087_v21 }
 0x152   :  { %v1096_v7 = vsel %vm1093_vm10, %v1095_v29, %v1091_v17 }
 0x153   :  { %v1113_v26 = vmul.f32 %v1427_v16, %v1096_v7  ;;  %v1161_v25 = vadd.f32 %v1096_v7, %v1676_v6 }
 0x155   :  { %v1129_v38 = vadd.f32 %v1113_v26, %v1720_v36  ;;  %1177 = vst [vmem:[%s2556_s7 + $0xf8] sm:$0xff] %v1161_v25 }
 0x157   :  { %1145 = vst [vmem:[%s2556_s7 + $0x78] sm:$0xff] %v1129_v38 }

// kernel: dense_trajectory_forward.5
= control target key start
LH: loop header
LB: loop body
LE: loop exit
PB: predicated region body
PF: predicated region fallthrough
CT: control target
= control target key end

     0   :  { %s908_s12 = smov 0   ;;  %s910_s13 = smov 0   ;;  %s1081_s0 = inlined_call_operand.vmem [shape: f32[4,72,512], index: 0, kind: input, shape index: {}]   ;;  %s1082_s1 = inlined_call_operand.vmem [shape: f32[32,4], index: 1, kind: input, shape index: {}]   ;;  %s1083_s2 = inlined_call_operand.vmem [shape: f32[32,32], index: 2, kind: input, shape index: {}]   ;;  %s1084_s3 = inlined_call_operand.vmem [shape: f32[4,32,512], index: 3, kind: output, shape index: {}]  }
   0x1   :  { %s912_s14 = smov 0  }
   0x2 LB: > { %s25_s15 = sadd.s32 1, %s882_s13  ;;  %p756_p0 = scmp.ge.s32.totalorder %s886_s14, 1  ;;  %s886_s14 = sphi %s912_s14, %s13_s14   ;;  %s882_s13 = sphi %s910_s13, %s1086_s13   ;;  %s878_s12 = sphi %s908_s12, %s1085_s12  }
   0x3   : > { %p27_p1 = scmp.ge.s32.totalorder %s25_s15, 4  ;;  %p158_p2 = scmp.lt.s32.totalorder %s886_s14, 5 }
   0x5   : > { %s1088_s15 = smov (%p27_p1, %s25_s15), 0  ;;  %p159_p3 = pnand %p756_p0, %p158_p2 }
   0x6   : > { %p191_p4 = scmp.lt.s32.totalorder (!%p159_p3), %s878_s12, 3 }
   0x7   : > { %162 = sbr.rel (%p159_p3) target bundleno = 357 (0x165), region = 32 }
   0xc   : > { %s1090_s12 = smov (!%p191_p4, %s878_s12), 3  ;;  %vm275_vm0 = vcmask 1043456   ;;  %v258_v12 = vld [vmem:[%s1082_s1] sm:$0xff]  ;;  %vm262_vm1 = vcmask 31744   ;;  %v259_v17 = vld [vmem:[%s1082_s1 + $0x8] sm:$0xff]  ;;  %v260_v18 = vld [vmem:[%s1082_s1 + $0x10] sm:$0xff] }
   0xd   : > { %s799_s16 = smul.u32 288, %s1090_s12  ;;  %v261_v19 = vld [vmem:[%s1082_s1 + $0x18] sm:$0xff]  ;;  %v452_v51 = vld [vmem:[%s1083_s2] sm:$0xff]  ;;  %vm456_vm11 = vcmask 261120   ;;  %s798_s9 = sshll.u32 %s1090_s12, 7 }
   0xf   : > { %s932_s19 = scalar_lea.vmem %s1081_s0, %s799_s16  ;;  %s1032_s16 = scalar_lea.vmem %s1084_s3, %s798_s9 }
  0x10   : > { %v242_v0 = vld [vmem:[%s932_s19 + $0x100] sm:$0x1f]  ;;  %v243_v1 = vld [vmem:[%s932_s19 + $0x108] sm:$0x1f]  ;;  %v244_v2 = vld [vmem:[%s932_s19 + $0x110] sm:$0x1f] }
  0x11   : > { %824 = vrcp.f32 %v242_v0  ;;  %v245_v3 = vld [vmem:[%s932_s19 + $0x118] sm:$0x1f] }
  0x12   : > { %826 = vrcp.f32 %v243_v1 }
  0x13   : > { %828 = vrcp.f32 %v244_v2 }
  0x14   : > { %830 = vrcp.f32 %v245_v3 }
  0x17   : > { %v825_v4 = vpop.eup %824 }
  0x18   : > { %v827_v5 = vpop.eup %826  ;;  %v250_v6 = vperm.slane %v825_v4, 4 }
  0x19   : > { %v829_v7 = vpop.eup %828  ;;  %v251_v8 = vperm.slane %v827_v5, 4  ;;  %v453_v5 = vld [vmem:[%s1083_s2 + $0x8] sm:$0xff] }
  0x1a   : > { %v831_v9 = vpop.eup %830  ;;  %v254_v10 = vmul.f32 %v250_v6, %v242_v0  ;;  %v252_v11 = vperm.slane %v829_v7, 4  ;;  %v454_v6 = vld [vmem:[%s1083_s2 + $0x10] sm:$0xff]  ;;  %v455_v7 = vld [vmem:[%s1083_s2 + $0x18] sm:$0xff] }
  0x1b   : > { %v255_v13 = vmul.f32 %v251_v8, %v243_v1  ;;  %v253_v14 = vperm.slane %v831_v9, 4  ;;  %v226_v8 = vld [vmem:[%s932_s19 + $0x80] sm:$0xff]  ;;  %v227_v9 = vld [vmem:[%s932_s19 + $0x88] sm:$0xff] }
  0x1c   : > { %760 = vmatpush.msk.msra.mxu0 %vm275_vm0, %v254_v10  ;;  %v256_v15 = vmul.f32 %v252_v11, %v244_v2  ;;  %v585_v10 = vmax.f32 %v226_v8, 1e-12  ;;  %v586_v11 = vmax.f32 %v227_v9, 1e-12  ;;  %v216_v9 = vld [vmem:[%s932_s19 + $0x30] sm:$0xff] }
  0x1d   : > { %765 = vmatpush.msk.msra.mxu1 %vm275_vm0, %v255_v13  ;;  %v257_v16 = vmul.f32 %v253_v14, %v245_v3  ;;  %761 = vmatmul.msk.f32.vlgmr.msra.gmra.mxu0 %vm262_vm1, %v258_v12  ;;  %v231_v13 = vld [vmem:[%s932_s19 + $0xa8] sm:$0xff] }
  0x1e   : > { %770 = vmatpush.msk.msra.mxu2 %vm275_vm0, %v256_v15  ;;  %766 = vmatmul.msk.f32.vlgmr.msra.gmra.mxu1 %vm262_vm1, %v258_v12  ;;  %832 = vrcp.f32 %v585_v10 }
  0x1f   : > { %775 = vmatpush.msk.msra.mxu3 %vm275_vm0, %v257_v16  ;;  %771 = vmatmul.msk.f32.vlgmr.msra.gmra.mxu2 %vm262_vm1, %v258_v12  ;;  %834 = vrcp.f32 %v586_v11  ;;  %v210_v16 = vld [vmem:[%s932_s19] sm:$0xff]  ;;  %v217_v11 = vld [vmem:[%s932_s19 + $0x38] sm:$0xff] }
  0x20   : > { %776 = vmatmul.msk.f32.vlgmr.msra.gmra.mxu3 %vm262_vm1, %v258_v12  ;;  %v230_v12 = vld [vmem:[%s932_s19 + $0xa0] sm:$0xff] }
  0x21   : > { %v589_v14 = vmax.f32 %v230_v12, 1e-12 }
  0x23   : > { %836 = vrcp.f32 %v589_v14 }
  0x24   : > { %v833_v15 = vpop.eup %832 }
  0x25   : > { %762 = vmatmul.msk.f32.gmra.mxu0 %vm262_vm1, %v259_v17 }
  0x26   : > { %767 = vmatmul.msk.f32.gmra.mxu1 %vm262_vm1, %v259_v17 }
  0x27   : > { %772 = vmatmul.msk.f32.gmra.mxu2 %vm262_vm1, %v259_v17 }
  0x28   : > { %777 = vmatmul.msk.f32.gmra.mxu3 %vm262_vm1, %v259_v17  ;;  %v590_v17 = vmax.f32 %v231_v13, 1e-12 }
  0x2a   : > { %838 = vrcp.f32 %v590_v17 }
  0x2d   : > { %763 = vmatmul.msk.f32.gmra.mxu0 %vm262_vm1, %v260_v18 }
  0x2e   : > { %768 = vmatmul.msk.f32.gmra.mxu1 %vm262_vm1, %v260_v18 }
  0x2f   : > { %773 = vmatmul.msk.f32.gmra.mxu2 %vm262_vm1, %v260_v18 }
  0x30   : > { %778 = vmatmul.msk.f32.gmra.mxu3 %vm262_vm1, %v260_v18  ;;  %v835_v18 = vpop.eup %834 }
  0x35   : > { %764 = vmatmul.msk.f32.gmra.mxu0 %vm262_vm1, %v261_v19 }
  0x36   : > { %769 = vmatmul.msk.f32.gmra.mxu1 %vm262_vm1, %v261_v19 }
  0x37   : > { %774 = vmatmul.msk.f32.gmra.mxu2 %vm262_vm1, %v261_v19 }
  0x38   : > { %779 = vmatmul.msk.f32.gmra.mxu3 %vm262_vm1, %v261_v19  ;;  %v211_v19 = vld [vmem:[%s932_s19 + $0x8] sm:$0xff] }
  0x9a   : > { %v305_v20 = vpop.f32.mrf.mxu0 }
  0x9b   : > { %v334_v21 = vpop.f32.mrf.mxu1  ;;  %v420_v37 = vmul.f32 0.01, %v305_v20  ;;  %vm404_vm8 = vcmp.gt.f32.partialorder %v305_v20, 0.0 }
  0x9c   : > { %v421_v39 = vmul.f32 0.01, %v334_v21  ;;  %vm405_vm9 = vcmp.gt.f32.partialorder %v334_v21, 0.0 }
  0x9d   : > { %v436_v49 = vsel %vm404_vm8, %v305_v20, %v420_v37  ;;  %v228_v20 = vld [vmem:[%s932_s19 + $0x90] sm:$0xff] }
  0x9e   : > { %v437_v50 = vsel %vm405_vm9, %v334_v21, %v421_v39  ;;  %v229_v21 = vld [vmem:[%s932_s19 + $0x98] sm:$0xff] }
  0x9f   : > { %v233_v39 = vld [vmem:[%s932_s19 + $0xb8] sm:$0xff] }
  0xa2   : > { %v970_v22 = vpop.f32.mrf.mxu2  ;;  %v308_v23 = vpop.f32.mrf.mxu0 }
  0xa3   : > { %v972_v24 = vpop.f32.mrf.mxu3  ;;  %v337_v25 = vpop.f32.mrf.mxu1  ;;  %v424_v40 = vmul.f32 0.01, %v308_v23  ;;  %vm408_vm6 = vcmp.gt.f32.partialorder %v308_v23, 0.0  ;;  %v422_v61 = vmul.f32 0.01, %v970_v22  ;;  %vm406_vm1 = vcmp.gt.f32.partialorder %v970_v22, 0.0 }
  0xa4   : > { %v425_v43 = vmul.f32 0.01, %v337_v25  ;;  %vm409_vm7 = vcmp.gt.f32.partialorder %v337_v25, 0.0  ;;  %v423_v63 = vmul.f32 0.01, %v972_v24 }
  0xa5   : > { %v440_v46 = vsel %vm408_vm6, %v308_v23, %v424_v40  ;;  %v438_v3 = vsel %vm406_vm1, %v970_v22, %v422_v61  ;;  %v617_v22 = vmul.f32 %v833_v15, %v210_v16  ;;  %v618_v23 = vmul.f32 %v835_v18, %v211_v19  ;;  %v222_v18 = vld [vmem:[%s932_s19 + $0x60] sm:$0xff]  ;;  %v240_v19 = vld [vmem:[%s932_s19 + $0xf0] sm:$0xff] }
  0xa6   : > { %v441_v48 = vsel %vm409_vm7, %v337_v25, %v425_v43  ;;  %v234_v25 = vld [vmem:[%s932_s19 + $0xc0] sm:$0xff] }
  0xaa   : > { %v974_v26 = vpop.f32.mrf.mxu2  ;;  %v311_v27 = vpop.f32.mrf.mxu0 }
  0xab   : > { %v976_v28 = vpop.f32.mrf.mxu3  ;;  %v340_v29 = vpop.f32.mrf.mxu1  ;;  %v428_v30 = vmul.f32 0.01, %v311_v27  ;;  %vm412_vm2 = vcmp.gt.f32.partialorder %v311_v27, 0.0  ;;  %v426_v57 = vmul.f32 0.01, %v974_v26  ;;  %vm410_vm15 = vcmp.gt.f32.partialorder %v974_v26, 0.0 }
  0xac   : > { %v429_v31 = vmul.f32 0.01, %v340_v29  ;;  %vm413_vm4 = vcmp.gt.f32.partialorder %v340_v29, 0.0  ;;  %v427_v59 = vmul.f32 0.01, %v976_v28  ;;  %vm411_vm0 = vcmp.gt.f32.partialorder %v976_v28, 0.0 }
  0xad   : > { %v444_v42 = vsel %vm412_vm2, %v311_v27, %v428_v30  ;;  %v442_v1 = vsel %vm410_vm15, %v974_v26, %v426_v57  ;;  %vm407_vm2 = vcmp.gt.f32.partialorder %v972_v24, 0.0  ;;  %v588_v26 = vmax.f32 %v229_v21, 1e-12  ;;  %v235_v27 = vld [vmem:[%s932_s19 + $0xc8] sm:$0xff] }
  0xae   : > { %v445_v45 = vsel %vm413_vm4, %v340_v29, %v429_v31  ;;  %v443_v2 = vsel %vm411_vm0, %v976_v28, %v427_v59  ;;  %v439_v4 = vsel %vm407_vm2, %v972_v24, %v423_v63  ;;  %v587_v24 = vmax.f32 %v228_v20, 1e-12  ;;  %v236_v59 = vld [vmem:[%s932_s19 + $0xd0] sm:$0xff]  ;;  %v237_v63 = vld [vmem:[%s932_s19 + $0xd8] sm:$0xff] }
  0xaf   : > { %v593_v31 = vmax.f32 %v234_v25, 1e-12 }
  0xb0   : > { %840 = vrcp.f32 %v587_v24 }
  0xb1   : > { %842 = vrcp.f32 %v588_v26  ;;  %v599_v26 = vmax.f32 %v240_v19, 1e-12 }
  0xb2   : > { %v369_v32 = vpop.f32.mrf.mxu2  ;;  %v314_v33 = vpop.f32.mrf.mxu0  ;;  %844 = vrcp.f32 %v593_v31 }
  0xb3   : > { %v398_v34 = vpop.f32.mrf.mxu3  ;;  %v432_v35 = vmul.f32 0.01, %v314_v33  ;;  %v343_v36 = vpop.f32.mrf.mxu1  ;;  %vm416_vm3 = vcmp.gt.f32.partialorder %v314_v33, 0.0  ;;  %v430_v52 = vmul.f32 0.01, %v369_v32  ;;  %vm414_vm13 = vcmp.gt.f32.partialorder %v369_v32, 0.0 }
  0xb4   : > { %v433_v38 = vmul.f32 0.01, %v343_v36  ;;  %vm417_vm5 = vcmp.gt.f32.partialorder %v343_v36, 0.0  ;;  %v431_v55 = vmul.f32 0.01, %v398_v34  ;;  %vm415_vm14 = vcmp.gt.f32.partialorder %v398_v34, 0.0 }
  0xb5   : > { %v448_v41 = vsel %vm416_vm3, %v314_v33, %v432_v35  ;;  %v446_v62 = vsel %vm414_vm13, %v369_v32, %v430_v52  ;;  %v594_v33 = vmax.f32 %v235_v27, 1e-12  ;;  %v214_v35 = vld [vmem:[%s932_s19 + $0x20] sm:$0xff] }
  0xb6   : > { %481 = vmatpush.msrb.mxu0 %v448_v41  ;;  %v449_v44 = vsel %vm417_vm5, %v343_v36, %v433_v38  ;;  %v447_v0 = vsel %vm415_vm14, %v398_v34, %v431_v55  ;;  %v837_v34 = vpop.eup %836  ;;  %v232_v36 = vld [vmem:[%s932_s19 + $0xb0] sm:$0xff]  ;;  %v215_v38 = vld [vmem:[%s932_s19 + $0x28] sm:$0xff] }
  0xb7   : > { %510 = vmatpush.msrb.mxu1 %v449_v44  ;;  %v839_v37 = vpop.eup %838  ;;  %v621_v40 = vmul.f32 %v837_v34, %v214_v35  ;;  %v591_v41 = vmax.f32 %v232_v36, 1e-12  ;;  %846 = vrcp.f32 %v594_v33  ;;  %v592_v44 = vmax.f32 %v233_v39, 1e-12  ;;  %v220_v33 = vld [vmem:[%s932_s19 + $0x50] sm:$0xff]  ;;  %v221_v35 = vld [vmem:[%s932_s19 + $0x58] sm:$0xff] }
  0xb8   : > { %482 = vmatpush.msrb.mxu0 %v444_v42  ;;  %v238_v42 = vld [vmem:[%s932_s19 + $0xe0] sm:$0xff]  ;;  %v622_v43 = vmul.f32 %v839_v37, %v215_v38 }
  0xb9   : > { %511 = vmatpush.msrb.mxu1 %v445_v45  ;;  %v239_v45 = vld [vmem:[%s932_s19 + $0xe8] sm:$0xff]  ;;  %848 = vrcp.f32 %v591_v41 }
  0xba   : > { %v372_v47 = vpop.f32.mrf.mxu2  ;;  %483 = vmatpush.msrb.mxu0 %v440_v46  ;;  %v841_v46 = vpop.eup %840  ;;  %850 = vrcp.f32 %v592_v44 }
  0xbb   : > { %v434_v53 = vmul.f32 0.01, %v372_v47  ;;  %v401_v54 = vpop.f32.mrf.mxu3  ;;  %512 = vmatpush.msrb.mxu1 %v441_v48  ;;  %vm418_vm10 = vcmp.gt.f32.partialorder %v372_v47, 0.0  ;;  %v843_v48 = vpop.eup %842 }
  0xbc   : > { %v435_v56 = vmul.f32 0.01, %v401_v54  ;;  %484 = vmatpush.msrb.mxu0 %v436_v49  ;;  %vm419_vm12 = vcmp.gt.f32.partialorder %v401_v54, 0.0  ;;  %v213_v49 = vld [vmem:[%s932_s19 + $0x18] sm:$0xff]  ;;  %v845_v55 = vpop.eup %844 }
  0xbd   : > { %513 = vmatpush.msrb.mxu1 %v437_v50  ;;  %v450_v58 = vsel %vm418_vm10, %v372_v47, %v434_v53  ;;  %780 = vmatmul.msk.f32.vlgmr.msrb.gmra.mxu0 %vm456_vm11, %v452_v51  ;;  %v212_v47 = vld [vmem:[%s932_s19 + $0x10] sm:$0xff]  ;;  %v620_v61 = vmul.f32 %v843_v48, %v213_v49  ;;  %v225_v49 = vld [vmem:[%s932_s19 + $0x78] sm:$0xff] }
  0xbe   : > { %539 = vmatpush.msrb.mxu2 %v450_v58  ;;  %v451_v60 = vsel %vm419_vm12, %v401_v54, %v435_v56  ;;  %784 = vmatmul.msk.f32.vlgmr.msrb.gmra.mxu1 %vm456_vm11, %v452_v51  ;;  %v598_v54 = vmax.f32 %v239_v45, 1e-12  ;;  %v619_v56 = vmul.f32 %v841_v46, %v212_v47  ;;  %v218_v58 = vld [vmem:[%s932_s19 + $0x40] sm:$0xff]  ;;  %v224_v47 = vld [vmem:[%s932_s19 + $0x70] sm:$0xff] }
  0xbf   : > { %568 = vmatpush.msrb.mxu3 %v451_v60  ;;  %v847_v60 = vpop.eup %846 }
  0xc0   : > { %540 = vmatpush.msrb.mxu2 %v446_v62  ;;  %v219_v62 = vld [vmem:[%s932_s19 + $0x48] sm:$0xff] }
  0xc1   : > { %569 = vmatpush.msrb.mxu3 %v447_v0 }
  0xc2   : > { %541 = vmatpush.msrb.mxu2 %v442_v1  ;;  %v625_v1 = vmul.f32 %v845_v55, %v218_v58 }
  0xc3   : > { %570 = vmatpush.msrb.mxu3 %v443_v2  ;;  %v595_v2 = vmax.f32 %v236_v59, 1e-12 }
  0xc4   : > { %542 = vmatpush.msrb.mxu2 %v438_v3 }
  0xc5   : > { %571 = vmatpush.msrb.mxu3 %v439_v4  ;;  %788 = vmatmul.msk.f32.vlgmr.msrb.gmra.mxu2 %vm456_vm11, %v452_v51 }
  0xc6   : > { %792 = vmatmul.msk.f32.vlgmr.msrb.gmra.mxu3 %vm456_vm11, %v452_v51  ;;  %781 = vmatmul.msk.f32.gmra.mxu0 %vm456_vm11, %v453_v5  ;;  %v597_v51 = vmax.f32 %v238_v42, 1e-12 }
  0xc7   : > { %785 = vmatmul.msk.f32.gmra.mxu1 %vm456_vm11, %v453_v5 }
  0xc8   : > { %852 = vrcp.f32 %v597_v51 }
  0xc9   : > { %854 = vrcp.f32 %v598_v54 }
  0xca   : > { %856 = vrcp.f32 %v595_v2 }
  0xcd   : > { %789 = vmatmul.msk.f32.gmra.mxu2 %vm456_vm11, %v453_v5 }
  0xce   : > { %793 = vmatmul.msk.f32.gmra.mxu3 %vm456_vm11, %v453_v5  ;;  %782 = vmatmul.msk.f32.gmra.mxu0 %vm456_vm11, %v454_v6  ;;  %v626_v5 = vmul.f32 %v847_v60, %v219_v62 }
  0xcf   : > { %786 = vmatmul.msk.f32.gmra.mxu1 %vm456_vm11, %v454_v6 }
  0xd5   : > { %790 = vmatmul.msk.f32.gmra.mxu2 %vm456_vm11, %v454_v6 }
  0xd6   : > { %794 = vmatmul.msk.f32.gmra.mxu3 %vm456_vm11, %v454_v6  ;;  %783 = vmatmul.msk.f32.gmra.mxu0 %vm456_vm11, %v455_v7  ;;  %v596_v6 = vmax.f32 %v237_v63, 1e-12 }
  0xd7   : > { %787 = vmatmul.msk.f32.gmra.mxu1 %vm456_vm11, %v455_v7 }
  0xd8   : > { %858 = vrcp.f32 %v596_v6 }
  0xd9   : > { %860 = vrcp.f32 %v599_v26 }
  0xdd   : > { %791 = vmatmul.msk.f32.gmra.mxu2 %vm456_vm11, %v455_v7 }
  0xde   : > { %795 = vmatmul.msk.f32.gmra.mxu3 %vm456_vm11, %v455_v7  ;;  %v849_v7 = vpop.eup %848 }
  0xdf   : > { %v851_v10 = vpop.eup %850  ;;  %v623_v16 = vmul.f32 %v849_v7, %v216_v9 }
  0xe0   : > { %v853_v15 = vpop.eup %852  ;;  %v624_v21 = vmul.f32 %v851_v10, %v217_v11 }
  0xe1   : > { %v855_v20 = vpop.eup %854  ;;  %v629_v25 = vmul.f32 %v853_v15, %v222_v18 }
  0xe2   : > { %v857_v31 = vpop.eup %856 }
  0xe3   : > { %v859_v34 = vpop.eup %858  ;;  %v627_v39 = vmul.f32 %v857_v31, %v220_v33 }
  0xe4   : > { %v628_v41 = vmul.f32 %v859_v34, %v221_v35  ;;  %v861_v45 = vpop.eup %860 }
 0x13a   : > { %v486_v28 = vpop.f32.mrf.mxu0 }
 0x13b   : > { %v633_v29 = vadd.f32 %v617_v22, %v486_v28  ;;  %v515_v30 = vpop.f32.mrf.mxu1  ;;  %v223_v22 = vld [vmem:[%s932_s19 + $0x68] sm:$0xff] }
 0x13c   : > { %v634_v32 = vadd.f32 %v618_v23, %v515_v30  ;;  %v241_v23 = vld [vmem:[%s932_s19 + $0xf8] sm:$0xff] }
 0x13d   : > { %649 = vst [vmem:[%s1032_s16] sm:$0xff] %v633_v29  ;;  %v630_v29 = vmul.f32 %v855_v20, %v223_v22  ;;  %v600_v30 = vmax.f32 %v241_v23, 1e-12 }
 0x13e   : > { %650 = vst [vmem:[%s1032_s16 + $0x8] sm:$0xff] %v634_v32 }
 0x13f   : > { %862 = vrcp.f32 %v600_v30 }
 0x143   : > { %v489_v50 = vpop.f32.mrf.mxu0 }
 0x144   : > { %v637_v52 = vadd.f32 %v621_v40, %v489_v50  ;;  %v518_v53 = vpop.f32.mrf.mxu1  ;;  %v631_v50 = vmul.f32 %v861_v45, %v224_v47 }
 0x145   : > { %v638_v57 = vadd.f32 %v622_v43, %v518_v53  ;;  %v863_v48 = vpop.eup %862 }
 0x146   : > { %653 = vst [vmem:[%s1032_s16 + $0x20] sm:$0xff] %v637_v52  ;;  %v632_v51 = vmul.f32 %v863_v48, %v225_v49 }
 0x147   : > { %654 = vst [vmem:[%s1032_s16 + $0x28] sm:$0xff] %v638_v57 }
 0x148   : > { %v544_v0 = vpop.f32.mrf.mxu2 }
 0x149   : > { %v635_v3 = vadd.f32 %v619_v56, %v544_v0  ;;  %v573_v4 = vpop.f32.mrf.mxu3 }
 0x14a   : > { %v636_v8 = vadd.f32 %v620_v61, %v573_v4 }
 0x14b   : > { %651 = vst [vmem:[%s1032_s16 + $0x10] sm:$0xff] %v635_v3  ;;  %v492_v12 = vpop.f32.mrf.mxu0 }
 0x14c   : > { %652 = vst [vmem:[%s1032_s16 + $0x18] sm:$0xff] %v636_v8  ;;  %v641_v13 = vadd.f32 %v625_v1, %v492_v12  ;;  %v521_v14 = vpop.f32.mrf.mxu1 }
 0x14d   : > { %v642_v17 = vadd.f32 %v626_v5, %v521_v14 }
 0x14e   : > { %657 = vst [vmem:[%s1032_s16 + $0x40] sm:$0xff] %v641_v13 }
 0x14f   : > { %658 = vst [vmem:[%s1032_s16 + $0x48] sm:$0xff] %v642_v17 }
 0x150   : > { %v547_v24 = vpop.f32.mrf.mxu2 }
 0x151   : > { %v639_v27 = vadd.f32 %v623_v16, %v547_v24  ;;  %v576_v28 = vpop.f32.mrf.mxu3 }
 0x152   : > { %v640_v32 = vadd.f32 %v624_v21, %v576_v28 }
 0x153   : > { %655 = vst [vmem:[%s1032_s16 + $0x30] sm:$0xff] %v639_v27  ;;  %v495_v36 = vpop.f32.mrf.mxu0 }
 0x154   : > { %656 = vst [vmem:[%s1032_s16 + $0x38] sm:$0xff] %v640_v32  ;;  %v645_v37 = vadd.f32 %v629_v25, %v495_v36  ;;  %v524_v38 = vpop.f32.mrf.mxu1 }
 0x155   : > { %v646_v40 = vadd.f32 %v630_v29, %v524_v38 }
 0x156   : > { %661 = vst [vmem:[%s1032_s16 + $0x60] sm:$0xff] %v645_v37 }
 0x157   : > { %662 = vst [vmem:[%s1032_s16 + $0x68] sm:$0xff] %v646_v40 }
 0x158   : > { %v550_v42 = vpop.f32.mrf.mxu2 }
 0x159   : > { %v643_v43 = vadd.f32 %v627_v39, %v550_v42  ;;  %v579_v44 = vpop.f32.mrf.mxu3 }
 0x15a   : > { %v644_v46 = vadd.f32 %v628_v41, %v579_v44 }
 0x15b   : > { %659 = vst [vmem:[%s1032_s16 + $0x50] sm:$0xff] %v643_v43 }
 0x15c   : > { %660 = vst [vmem:[%s1032_s16 + $0x58] sm:$0xff] %v644_v46 }
 0x160   : > { %v553_v52 = vpop.f32.mrf.mxu2 }
 0x161   : > { %v647_v53 = vadd.f32 %v631_v50, %v553_v52  ;;  %v582_v54 = vpop.f32.mrf.mxu3 }
 0x162   : > { %v648_v55 = vadd.f32 %v632_v51, %v582_v54 }
 0x163   : > { %663 = vst [vmem:[%s1032_s16 + $0x70] sm:$0xff] %v647_v53 }
 0x164   : > { %664 = vst [vmem:[%s1032_s16 + $0x78] sm:$0xff] %v648_v55 }
 0x165 PF: > { %s13_s14 = sadd.s32 1, %s886_s14   ;;  %s1085_s12 = smov %s882_s13 }
 0x166   : > { %p10_p5 = scmp.ge.s32.totalorder %s13_s14, 6   ;;  %s1086_s13 = smov %s1088_s15 }
 0x168   :  { %12 = sbr.rel (!%p10_p5) target bundleno = 2 (0x2), region = 62 }

</bundles_post_ra>
